<compile_context>
chip_gen: v5e
topology: v5e:2x2
jax: 0.10.0
libtpu: 0.0.40
codegen_flags: <defaults>
</compile_context>

<pallas_src>
import functools

import jax
import jax.numpy as jnp
from jax.experimental import pallas as pl
from jax.experimental.pallas import tpu as pltpu

# ---------------------------------------------------------------------------
# scaled-down model dims (PyTorch original: img 1024, patch 16, D=1024,
# C3=256, C4=512, C5=1024).  Ratios are preserved.
# ---------------------------------------------------------------------------
B_EX = 2
IMG = 64
PATCH = 16
D_EMB = 32
C_P3 = 8     # 256 / 32x scale
C_P4 = 16    # 512
C_P5 = 32    # 1024

LANE = 128
K_RESIDENT_CAP = 2048      # keep K resident in VMEM (single-shot MXU) up to here
ROW_TILE_TARGET = 4        # output rows per conv/upsample grid step
                           # (per-generation tunable: raise on v5e/v6e, keep
                           #  small on v7x's 64 MiB VMEM)


def _round_up(x, m):
    return ((x + m - 1) // m) * m


def _vmem_limit_bytes():
    """Generation-aware scoped-VMEM limit: min(96 MiB, physical/2), >=32 MiB."""
    try:
        phys = int(pltpu.get_tpu_info().vmem_capacity_bytes)
        return max(32 * 1024 * 1024, min(96 * 1024 * 1024, phys // 2))
    except Exception:
        return 32 * 1024 * 1024


def _pick_rows(total, target, even=False):
    """Largest divisor of `total` that is <= target (even divisor if `even`)."""
    start = 2 if even else 1
    step = 2 if even else 1
    best = None
    c = start
    while c <= min(total, target):
        if total % c == 0:
            best = c
        c += step
    return best if best is not None else total


# ---------------------------------------------------------------------------
# GEMM kernels (patch-embed stem and the 1x1 conv p4)
# ---------------------------------------------------------------------------
def _matmul_bias_kernel(a_ref, b_ref, bias_ref, o_ref):
    """Single-shot o = a @ b + bias.  bf16 operands, f32 MXU accumulation.
    K is fully resident in VMEM -> no reduction grid axis, no scratch."""
    o_ref[...] = (
        jnp.dot(a_ref[...], b_ref[...], preferred_element_type=jnp.float32)
        + bias_ref[...]
    ).astype(o_ref.dtype)


def _matmul_bias_ksplit_kernel(a_ref, b_ref, bias_ref, o_ref, acc_ref):
    """Fallback for very large K: K-reduction on grid axis 2 with a resident
    f32 accumulator in VMEM."""
    k = pl.program_id(2)

    @pl.when(k == 0)
    def _():
        acc_ref[...] = jnp.zeros_like(acc_ref)

    acc_ref[...] += jnp.dot(a_ref[...], b_ref[...],
                            preferred_element_type=jnp.float32)

    @pl.when(k == pl.num_programs(2) - 1)
    def _():
        o_ref[...] = (acc_ref[...] + bias_ref[...]).astype(o_ref.dtype)


def _pick_m_tiling(m):
    """Return (TM, M_pad).  Only split M when each tile is still >= 256 rows
    (splitting tiny M just adds grid-step overhead, feedback #6)."""
    m8 = _round_up(m, 8)
    if m8 <= 512:
        return m8, m8
    for tm in (512, 256):
        if m8 % tm == 0:
            return tm, m8
    return 512, _round_up(m8, 512)


def _pick_n_tiling(n):
    """Return (TN, N_pad).  N padded to a multiple of 128 -> lane-dense,
    unmasked output stores."""
    npad = _round_up(n, LANE)
    if npad <= 512:
        return npad, npad
    for tn in (512, 384, 256, 128):
        if npad % tn == 0:
            return tn, npad
    return LANE, npad


def matmul_bias(a, b, bias=None, out_dtype=jnp.float32):
    """(M,K) @ (K,N) + bias(N,) with bf16 operands and f32 accumulation."""
    m, k = a.shape
    k2, n = b.shape
    assert k == k2
    tm, mp = _pick_m_tiling(m)
    tn, npad = _pick_n_tiling(n)

    a_p = a if mp == m else jnp.pad(a, ((0, mp - m), (0, 0)))
    a_p = a_p.astype(jnp.bfloat16)
    b_p = b if npad == n else jnp.pad(b, ((0, 0), (0, npad - n)))
    b_p = b_p.astype(jnp.bfloat16)
    if bias is None:
        bias = jnp.zeros((n,), jnp.float32)
    bias_p = jnp.pad(bias.astype(jnp.float32), (0, npad - n)).reshape(1, npad)

    vm = _vmem_limit_bytes()
    if k <= K_RESIDENT_CAP:
        out = pl.pallas_call(
            _matmul_bias_kernel,
            out_shape=jax.ShapeDtypeStruct((mp, npad), out_dtype),
            grid=(mp // tm, npad // tn),
            in_specs=[
                pl.BlockSpec((tm, k), lambda i, j: (i, 0)),
                pl.BlockSpec((k, tn), lambda i, j: (0, j)),
                pl.BlockSpec((1, tn), lambda i, j: (0, j)),
            ],
            out_specs=pl.BlockSpec((tm, tn), lambda i, j: (i, j)),
            compiler_params=pltpu.CompilerParams(
                dimension_semantics=("parallel", "parallel"),
                vmem_limit_bytes=vm),
        )(a_p, b_p, bias_p)
    else:
        tk = 512
        kp = _round_up(k, tk)
        if kp != k:
            a_p = jnp.pad(a_p, ((0, 0), (0, kp - k)))
            b_p = jnp.pad(b_p, ((0, kp - k), (0, 0)))
        out = pl.pallas_call(
            _matmul_bias_ksplit_kernel,
            out_shape=jax.ShapeDtypeStruct((mp, npad), out_dtype),
            grid=(mp // tm, npad // tn, kp // tk),
            in_specs=[
                pl.BlockSpec((tm, tk), lambda i, j, kk: (i, kk)),
                pl.BlockSpec((tk, tn), lambda i, j, kk: (kk, j)),
                pl.BlockSpec((1, tn), lambda i, j, kk: (0, j)),
            ],
            out_specs=pl.BlockSpec((tm, tn), lambda i, j, kk: (i, j)),
            scratch_shapes=[pltpu.VMEM((tm, tn), jnp.float32)],
            compiler_params=pltpu.CompilerParams(
                dimension_semantics=("parallel", "parallel", "arbitrary"),
                vmem_limit_bytes=vm),
        )(a_p, b_p, bias_p)
    return out[:m, :n]


# ---------------------------------------------------------------------------
# p3: FUSED bilinear x2 upsample (align_corners=False) + Conv3x3(s1, p1)
# ---------------------------------------------------------------------------
def _p3_fused_kernel(f_top, f_main, f_bot, w_ref, b_ref, o_ref, *,
                     t_rows, width, d, total_rows):
    """One (batch, row-tile) step: t_rows output rows, all 2*width columns.
    Feature rows i = t*tf-1 .. (t+1)*tf arrive edge-clamped via the halo
    index_maps; the upsampled map is built in VMEM and never hits HBM."""
    t = pl.program_id(1)
    tf = t_rows // 2
    xb = jnp.concatenate([f_top[...], f_main[...], f_bot[...]],
                         axis=0).astype(jnp.float32)              # (tf+2, W, D)

    # vertical bilinear x2: up rows u = t*t_rows - 1 .. (t+1)*t_rows
    a = xb[0:tf + 1]
    bn = xb[1:tf + 2]
    row_odd = 0.75 * a + 0.25 * bn        # up rows t*t_rows - 1 + 2j
    row_even = 0.25 * a + 0.75 * bn       # up rows t*t_rows     + 2j
    uband = jnp.stack([row_odd, row_even], axis=1).reshape(t_rows + 2, width, d)

    # conv zero-padding in the row direction (up rows -1 and 2h are zero)
    u0 = t * t_rows - 1
    first_ok = (u0 >= 0).astype(uband.dtype)
    last_ok = (u0 + t_rows + 1 <= total_rows - 1).astype(uband.dtype)
    uband = jnp.concatenate(
        [uband[:1] * first_ok, uband[1:-1], uband[-1:] * last_ok], axis=0)

    # horizontal bilinear x2 (even/odd output-column planes), edge clamped
    left = jnp.concatenate([uband[:, :1], uband[:, :width - 1]], axis=1)
    right = jnp.concatenate([uband[:, 1:], uband[:, width - 1:]], axis=1)
    ue = 0.25 * left + 0.75 * uband       # up cols 2m
    uo = 0.75 * uband + 0.25 * right      # up cols 2m+1

    # conv zero-padding in the column direction (up cols -1 and 2w are zero)
    zcol = jnp.zeros_like(uo[:, :1])
    uo_prev = jnp.concatenate([zcol, uo[:, :width - 1]], axis=1)   # up col 2m-1
    ue_next = jnp.concatenate([ue[:, 1:], zcol], axis=1)           # up col 2m+2

    # one fat matmul per output-column parity: K = 9*D slab built in VMEM
    even_pieces, odd_pieces = [], []
    for dr in range(3):
        sl = slice(dr, dr + t_rows)
        even_pieces += [uo_prev[sl], ue[sl], uo[sl]]   # taps for cols s = 2m
        odd_pieces += [ue[sl], uo[sl], ue_next[sl]]    # taps for cols s = 2m+1

    def _run(pieces):
        slab = jnp.concatenate(pieces, axis=-1)                    # (T, W, 9D)
        slab = slab.reshape(t_rows * width, 9 * d).astype(jnp.bfloat16)
        y = jnp.dot(slab, w_ref[...], preferred_element_type=jnp.float32)
        return (y + b_ref[...]).reshape(t_rows, width, -1)

    ye = _run(even_pieces)
    yo = _run(odd_pieces)
    # column interleave is folded into the wrapper's NCHW transpose
    o_ref[...] = jnp.concatenate([ye, yo], axis=-1).astype(o_ref.dtype)


def fused_upsample_conv3x3_p3(x_nhwc, weight, bias):
    """nn.Upsample(x2, bilinear, align_corners=False) + nn.Conv2d(D, C, 3, 1, 1)
    fused in one kernel.  Returns ((B, 2h, w, 2*coutp), coutp): last axis holds
    the even-column plane followed by the odd-column plane."""
    b, h, w, d = x_nhwc.shape
    cout = weight.shape[0]
    assert weight.shape == (cout, d, 3, 3)
    coutp = _round_up(cout, LANE)

    # weights -> (9*Cin, Coutp) with rows ordered (dr, dc, cin); bf16
    wmat = jnp.transpose(weight, (2, 3, 1, 0)).reshape(9 * d, cout)
    wmat = jnp.pad(wmat, ((0, 0), (0, coutp - cout))).astype(jnp.bfloat16)
    bvec = jnp.pad(bias.astype(jnp.float32), (0, coutp - cout)).reshape(1, coutp)

    total = 2 * h                                  # output rows
    t_rows = _pick_rows(total, ROW_TILE_TARGET, even=True)
    tf = t_rows // 2
    nt = total // t_rows
    x_bf = x_nhwc.astype(jnp.bfloat16)

    out = pl.pallas_call(
        functools.partial(_p3_fused_kernel, t_rows=t_rows, width=w, d=d,
                          total_rows=total),
        out_shape=jax.ShapeDtypeStruct((b, total, w, 2 * coutp), jnp.float32),
        grid=(b, nt),
        in_specs=[
            # 1-row top halo, clamped at the image edge (bilinear replicate)
            pl.BlockSpec((None, 1, w, d),
                         lambda bi, ti: (bi, jnp.maximum(ti * tf - 1, 0), 0, 0)),
            # main row band of the feature map
            pl.BlockSpec((None, tf, w, d), lambda bi, ti: (bi, ti, 0, 0)),
            # 1-row bottom halo, clamped
            pl.BlockSpec((None, 1, w, d),
                         lambda bi, ti: (bi, jnp.minimum((ti + 1) * tf, h - 1), 0, 0)),
            pl.BlockSpec((9 * d, coutp), lambda bi, ti: (0, 0)),
            pl.BlockSpec((1, coutp), lambda bi, ti: (0, 0)),
        ],
        out_specs=pl.BlockSpec((None, t_rows, w, 2 * coutp),
                               lambda bi, ti: (bi, ti, 0, 0)),
        compiler_params=pltpu.CompilerParams(
            dimension_semantics=("parallel", "parallel"),
            vmem_limit_bytes=_vmem_limit_bytes()),
    )(x_bf, x_bf, x_bf, wmat, bvec)
    return out, coutp


# ---------------------------------------------------------------------------
# p5: Conv3x3 stride 2, padding 1 -- one slab matmul per row tile
# ---------------------------------------------------------------------------
def _conv3x3_s2_kernel(x_main, x_halo, w_ref, b_ref, o_ref, *, t_rows, wo, d):
    """Input is the padded map split into 4 row/col parity planes so every
    tap slice is contiguous and unit-stride.  One (T*wo, 9*Cin) slab matmul."""
    band = jnp.concatenate([x_main[...], x_halo[...]], axis=1)  # (4, T+1, wo+1, D)
    rsel = ((0, 0), (1, 0), (0, 1))   # (row_parity, row_offset) for dr = 0,1,2
    csel = ((0, 0), (1, 0), (0, 1))   # (col_parity, col_offset) for dc = 0,1,2
    pieces = []
    for rp, ro in rsel:
        for cp, co in csel:
            pieces.append(band[rp * 2 + cp, ro:ro + t_rows, co:co + wo, :])
    slab = jnp.concatenate(pieces, axis=-1)                      # (T, wo, 9D)
    slab = slab.reshape(t_rows * wo, 9 * d).astype(jnp.bfloat16)
    y = jnp.dot(slab, w_ref[...], preferred_element_type=jnp.float32) + b_ref[...]
    o_ref[...] = y.reshape(t_rows, wo, -1).astype(o_ref.dtype)


def conv3x3_s2(x_nhwc, weight, bias):
    """nn.Conv2d(Cin, Cout, 3, stride=2, padding=1), NHWC in / NHWC out (f32)."""
    b, h, w, cin = x_nhwc.shape
    cout = weight.shape[0]
    assert weight.shape == (cout, cin, 3, 3)
    assert h % 2 == 0 and w % 2 == 0
    ho, wo = h // 2, w // 2
    coutp = _round_up(cout, LANE)

    wmat = jnp.transpose(weight, (2, 3, 1, 0)).reshape(9 * cin, cout)
    wmat = jnp.pad(wmat, ((0, 0), (0, coutp - cout))).astype(jnp.bfloat16)
    bvec = jnp.pad(bias.astype(jnp.float32), (0, coutp - cout)).reshape(1, coutp)

    # zero-pad once (feat-sized, cheap) and split rows/cols by parity so the
    # kernel only ever needs contiguous unit-stride slices.
    xpad = jnp.pad(x_nhwc.astype(jnp.bfloat16), ((0, 0), (1, 1), (1, 1), (0, 0)))
    hp, wp = h + 2, w + 2
    xq = xpad.reshape(b, hp // 2, 2, wp // 2, 2, cin)
    xq = jnp.transpose(xq, (0, 2, 4, 1, 3, 5)).reshape(b, 4, hp // 2, wp // 2, cin)

    t_rows = _pick_rows(ho, ROW_TILE_TARGET)
    nt = ho // t_rows

    out = pl.pallas_call(
        functools.partial(_conv3x3_s2_kernel, t_rows=t_rows, wo=wo, d=cin),
        out_shape=jax.ShapeDtypeStruct((b, ho, wo, coutp), jnp.float32),
        grid=(b, nt),
        in_specs=[
            # main row band (all 4 parity planes)
            pl.BlockSpec((None, 4, t_rows, wp // 2, cin),
                         lambda bi, ti: (bi, 0, ti, 0, 0)),
            # 1-row bottom halo
            pl.BlockSpec((None, 4, 1, wp // 2, cin),
                         lambda bi, ti: (bi, 0, (ti + 1) * t_rows, 0, 0)),
            pl.BlockSpec((9 * cin, coutp), lambda bi, ti: (0, 0)),
            pl.BlockSpec((1, coutp), lambda bi, ti: (0, 0)),
        ],
        out_specs=pl.BlockSpec((None, t_rows, wo, coutp),
                               lambda bi, ti: (bi, ti, 0, 0)),
        compiler_params=pltpu.CompilerParams(
            dimension_semantics=("parallel", "parallel"),
            vmem_limit_bytes=_vmem_limit_bytes()),
    )(xq, xq, wmat, bvec)
    return out[..., :cout]            # (B, ho, wo, cout) f32, NHWC


# ---------------------------------------------------------------------------
# ViT patch-embed stem with T.Normalize folded into the weights
# ---------------------------------------------------------------------------
def patch_embed_folded(x_nchw, w_pe, b_pe, mean, std, patch):
    """((x - mean)/std) @ W + b  ==  x @ (W * (1/std)) + (b - (mean/std) @ W).
    Returns the flat token matrix (B*h*w, D) in bf16 plus (h, w).
    NOTE: patches flatten in (pi, pj, cin) order; a real PyTorch Conv2d
    patch-embed checkpoint (D, Cin, 16, 16) must be permuted accordingly.
    TODO(synk): fold the patch extraction into the GEMM's BlockSpec/index_map
    to remove this wrapper transpose (feedback #7)."""
    b, c, hh, ww = x_nchw.shape
    h, w = hh // patch, ww // patch
    inv_std = 1.0 / std
    scale = jnp.tile(inv_std, patch * patch)          # matches (pi, pj, c) order
    shift = jnp.tile(mean * inv_std, patch * patch)
    w_eff = w_pe * scale[:, None]
    b_eff = b_pe - shift @ w_pe

    x_nhwc = jnp.transpose(x_nchw, (0, 2, 3, 1))
    p = x_nhwc.reshape(b, h, patch, w, patch, c)
    p = jnp.transpose(p, (0, 1, 3, 2, 4, 5)).reshape(b * h * w, patch * patch * c)
    feat_flat = matmul_bias(p, w_eff, b_eff, out_dtype=jnp.bfloat16)
    return feat_flat, h, w


# ---------------------------------------------------------------------------
# Full forward
# ---------------------------------------------------------------------------
def modified_sapiens_vit_forward(params, x):
    b = x.shape[0]
    # 1) self.normalize(x)  +  2) vit patch-embed stem (normalize folded in)
    feat_flat, h, w = patch_embed_folded(
        x, params["w_pe"], params["b_pe"], params["mean"], params["std"], PATCH)
    d = feat_flat.shape[1]
    # TODO(synk): Sapiens-0.3b transformer encoder blocks omitted -- the
    # architecture definition and checkpoint are not available in-script.
    feat = feat_flat.reshape(b, h, w, d)          # bf16 NHWC, re-read by p3/p4/p5

    # p3: fused bilinear x2 upsample + 3x3 s1 conv (single kernel)
    c3 = params["w_p3"].shape[0]
    p3_planes, c3p = fused_upsample_conv3x3_p3(feat, params["w_p3"], params["b_p3"])
    p3 = p3_planes.reshape(b, 2 * h, w, 2, c3p)[..., :c3]
    # even/odd column interleave is folded into the (required) NCHW transpose
    p3 = jnp.transpose(p3, (0, 4, 1, 2, 3)).reshape(b, c3, 2 * h, 2 * w)

    # p4: 1x1 conv == plain GEMM directly on the flat bf16 token matrix
    c4 = params["w_p4"].shape[0]
    w4 = jnp.transpose(params["w_p4"].reshape(c4, d))
    p4 = matmul_bias(feat_flat, w4, params["b_p4"])
    p4 = jnp.transpose(p4.reshape(b, h, w, c4), (0, 3, 1, 2))

    # p5: 3x3 stride-2 conv (slab matmul on a parity-split padded map)
    p5 = conv3x3_s2(feat, params["w_p5"], params["b_p5"])
    p5 = jnp.transpose(p5, (0, 3, 1, 2))
    return p3, p4, p5


# ---------------------------------------------------------------------------
# pure-JAX reference (f32) for a numerical check of the kernels
# ---------------------------------------------------------------------------
def reference_forward(params, x):
    b = x.shape[0]
    mean = params["mean"].reshape(1, 3, 1, 1)
    std = params["std"].reshape(1, 3, 1, 1)
    xn = (x - mean) / std
    h, w = IMG // PATCH, IMG // PATCH
    xh = jnp.transpose(xn, (0, 2, 3, 1))
    p = xh.reshape(b, h, PATCH, w, PATCH, 3)
    p = jnp.transpose(p, (0, 1, 3, 2, 4, 5)).reshape(b * h * w, PATCH * PATCH * 3)
    feat = (p @ params["w_pe"] + params["b_pe"]).reshape(b, h, w, D_EMB)

    def up2x(t):   # bilinear x2, align_corners=False (same taps as PyTorch)
        tm1 = jnp.concatenate([t[:, :1], t[:, :-1]], axis=1)
        tp1 = jnp.concatenate([t[:, 1:], t[:, -1:]], axis=1)
        re = 0.25 * tm1 + 0.75 * t
        ro = 0.75 * t + 0.25 * tp1
        rows = jnp.stack([re, ro], axis=2).reshape(
            t.shape[0], 2 * t.shape[1], t.shape[2], t.shape[3])
        cm1 = jnp.concatenate([rows[:, :, :1], rows[:, :, :-1]], axis=2)
        cp1 = jnp.concatenate([rows[:, :, 1:], rows[:, :, -1:]], axis=2)
        ce = 0.25 * cm1 + 0.75 * rows
        co = 0.75 * rows + 0.25 * cp1
        return jnp.stack([ce, co], axis=3).reshape(
            rows.shape[0], rows.shape[1], 2 * rows.shape[2], rows.shape[3])

    def conv(t, wgt, bias, stride, pad):
        kern = jnp.transpose(wgt, (2, 3, 1, 0))
        y = jax.lax.conv_general_dilated(
            t, kern, (stride, stride), [(pad, pad), (pad, pad)],
            dimension_numbers=("NHWC", "HWIO", "NHWC"))
        return y + bias.reshape(1, 1, 1, -1)

    p3 = conv(up2x(feat), params["w_p3"], params["b_p3"], 1, 1)
    c4 = params["w_p4"].shape[0]
    p4 = (feat.reshape(-1, D_EMB) @ params["w_p4"].reshape(c4, D_EMB).T
          + params["b_p4"]).reshape(b, h, w, c4)
    p5 = conv(feat, params["w_p5"], params["b_p5"], 2, 1)
    to_nchw = lambda t: jnp.transpose(t, (0, 3, 1, 2))
    return to_nchw(p3), to_nchw(p4), to_nchw(p5)


# ---------------------------------------------------------------------------
# main
# ---------------------------------------------------------------------------
if __name__ == "__main__":
    key = jax.random.PRNGKey(0)
    keys = jax.random.split(key, 9)

    x = jax.random.uniform(keys[0], (B_EX, 3, IMG, IMG),
                           jnp.float32, minval=0.0, maxval=255.0)

    params = {
        "mean": jnp.array([123.675, 116.28, 103.53], jnp.float32),
        "std": jnp.array([58.395, 57.12, 57.375], jnp.float32),
        # ViT patch-embed stem
        "w_pe": 0.02 * jax.random.normal(keys[1], (PATCH * PATCH * 3, D_EMB), jnp.float32),
        "b_pe": 0.02 * jax.random.normal(keys[2], (D_EMB,), jnp.float32),
        # conv_p3: Conv2d(D, C3, 3, 1, 1)
        "w_p3": 0.05 * jax.random.normal(keys[3], (C_P3, D_EMB, 3, 3), jnp.float32),
        "b_p3": 0.05 * jax.random.normal(keys[4], (C_P3,), jnp.float32),
        # conv_p4: Conv2d(D, C4, 1, 1, 0)
        "w_p4": 0.05 * jax.random.normal(keys[5], (C_P4, D_EMB, 1, 1), jnp.float32),
        "b_p4": 0.05 * jax.random.normal(keys[6], (C_P4,), jnp.float32),
        # conv_p5: Conv2d(D, C5, 3, 2, 1)
        "w_p5": 0.05 * jax.random.normal(keys[7], (C_P5, D_EMB, 3, 3), jnp.float32),
        "b_p5": 0.05 * jax.random.normal(keys[8], (C_P5,), jnp.float32),
    }

    p3, p4, p5 = jax.jit(modified_sapiens_vit_forward)(params, x)
    jax.block_until_ready((p3, p4, p5))

    h = IMG // PATCH
    assert p3.shape == (B_EX, C_P3, 2 * h, 2 * h), p3.shape
    assert p4.shape == (B_EX, C_P4, h, h), p4.shape
    assert p5.shape == (B_EX, C_P5, h // 2, h // 2), p5.shape

    # numerical check against a pure-JAX f32 reference (bf16-level tolerance)
    r3, r4, r5 = jax.jit(reference_forward)(params, x)
    for name, got, ref in (("p3", p3, r3), ("p4", p4, r4), ("p5", p5, r5)):
        err = float(jnp.max(jnp.abs(got - ref)))
        scale = float(jnp.max(jnp.abs(ref))) + 1e-6
        assert err <= 3e-2 * scale + 1e-2, (name, err, scale)

    print("KERNEL_OK")
</pallas_src>

<mosaic_0001>
module attributes {stable_mosaic.version = 11 : i64} {
  func.func @_matmul_bias_kernel(%arg0: i32, %arg1: i32, %arg2: memref<32x768xbf16, #tpu.memory_space<vmem>>, %arg3: memref<768x128xbf16, #tpu.memory_space<vmem>>, %arg4: memref<1x128xf32, #tpu.memory_space<vmem>>, %arg5: memref<32x128xbf16, #tpu.memory_space<vmem>>) attributes {dimension_semantics = [#tpu.dimension_semantics<parallel>, #tpu.dimension_semantics<parallel>], iteration_bounds = array<i64: 1, 1>, scalar_prefetch = 0 : i64, scratch_operands = 0 : i64, tpu.core_type = #tpu.core_type<tc>, window_params = [{transform_indices = @transform_0, window_bounds = array<i64: 32, 768>}, {transform_indices = @transform_1, window_bounds = array<i64: 768, 128>}, {transform_indices = @transform_2, window_bounds = array<i64: 1, 128>}, {transform_indices = @transform_3, window_bounds = array<i64: 32, 128>}]} {
    %c0 = arith.constant 0 : index
    %c0_0 = arith.constant 0 : index
    %0 = vector.load %arg2[%c0, %c0_0] : memref<32x768xbf16, #tpu.memory_space<vmem>>, vector<32x768xbf16>
    %c0_1 = arith.constant 0 : index
    %c0_2 = arith.constant 0 : index
    %1 = vector.load %arg3[%c0_1, %c0_2] : memref<768x128xbf16, #tpu.memory_space<vmem>>, vector<768x128xbf16>
    %cst = arith.constant dense<0.000000e+00> : vector<32x128xf32>
    %2 = tpu.matmul %0, %1, %cst {dimension_numbers = #tpu.dot_dimension_numbers<[1], [0], [0], [1], [0, 0, 1, 1], [], []>} : vector<32x768xbf16>, vector<768x128xbf16>, vector<32x128xf32> -> vector<32x128xf32>
    %c0_3 = arith.constant 0 : index
    %c0_4 = arith.constant 0 : index
    %3 = vector.load %arg4[%c0_3, %c0_4] : memref<1x128xf32, #tpu.memory_space<vmem>>, vector<1x128xf32>
    %4 = vector.broadcast %3 : vector<1x128xf32> to vector<32x128xf32>
    %5 = arith.addf %2, %4 : vector<32x128xf32>
    %6 = arith.truncf %5 : vector<32x128xf32> to vector<32x128xbf16>
    %c0_5 = arith.constant 0 : index
    %c0_6 = arith.constant 0 : index
    %7 = vector.load %arg5[%c0_5, %c0_6] : memref<32x128xbf16, #tpu.memory_space<vmem>>, vector<32x128xbf16>
    tpu.vector_store %arg5[%c0_5, %c0_6], %6 {strides = array<i32>} : memref<32x128xbf16, #tpu.memory_space<vmem>>, vector<32x128xbf16>,
    return
  }
  func.func @transform_0(%arg0: i32, %arg1: i32) -> (i32, i32) {
    %c0_i32 = arith.constant 0 : i32
    %c0_i32_0 = arith.constant 0 : i32
    return %arg0, %c0_i32 : i32, i32
  }
  func.func @transform_1(%arg0: i32, %arg1: i32) -> (i32, i32) {
    %c0_i32 = arith.constant 0 : i32
    %c0_i32_0 = arith.constant 0 : i32
    return %c0_i32, %arg1 : i32, i32
  }
  func.func @transform_2(%arg0: i32, %arg1: i32) -> (i32, i32) {
    %c0_i32 = arith.constant 0 : i32
    %c0_i32_0 = arith.constant 0 : i32
    return %c0_i32, %arg1 : i32, i32
  }
  func.func @transform_3(%arg0: i32, %arg1: i32) -> (i32, i32) {
    %c0_i32 = arith.constant 0 : i32
    return %arg0, %arg1 : i32, i32
  }
}

module attributes {stable_mosaic.version = 11 : i64} {
  func.func @_p3_fused_kernel(%arg0: i32, %arg1: i32, %arg2: memref<1x1x4x32xbf16, #tpu.memory_space<vmem>>, %arg3: memref<1x2x4x32xbf16, #tpu.memory_space<vmem>>, %arg4: memref<1x1x4x32xbf16, #tpu.memory_space<vmem>>, %arg5: memref<288x128xbf16, #tpu.memory_space<vmem>>, %arg6: memref<1x128xf32, #tpu.memory_space<vmem>>, %arg7: memref<1x4x4x256xf32, #tpu.memory_space<vmem>>) attributes {dimension_semantics = [#tpu.dimension_semantics<parallel>, #tpu.dimension_semantics<parallel>], iteration_bounds = array<i64: 2, 2>, scalar_prefetch = 0 : i64, scratch_operands = 0 : i64, tpu.core_type = #tpu.core_type<tc>, window_params = [{transform_indices = @transform_0, window_bounds = array<i64: 1, 1, 4, 32>}, {transform_indices = @transform_1, window_bounds = array<i64: 1, 2, 4, 32>}, {transform_indices = @transform_2, window_bounds = array<i64: 1, 1, 4, 32>}, {pipeline_mode = #tpu.pipeline_mode<synchronous>, transform_indices = @transform_3, window_bounds = array<i64: 288, 128>}, {pipeline_mode = #tpu.pipeline_mode<synchronous>, transform_indices = @transform_4, window_bounds = array<i64: 1, 128>}, {transform_indices = @transform_5, window_bounds = array<i64: 1, 4, 4, 256>}]} {
    %c0 = arith.constant 0 : index
    %c0_0 = arith.constant 0 : index
    %c0_1 = arith.constant 0 : index
    %c0_2 = arith.constant 0 : index
    %0 = vector.load %arg2[%c0, %c0_0, %c0_1, %c0_2] : memref<1x1x4x32xbf16, #tpu.memory_space<vmem>>, vector<1x1x4x32xbf16>
    %1 = vector.shape_cast %0 : vector<1x1x4x32xbf16> to vector<1x4x32xbf16>
    %c0_3 = arith.constant 0 : index
    %c0_4 = arith.constant 0 : index
    %c0_5 = arith.constant 0 : index
    %c0_6 = arith.constant 0 : index
    %2 = vector.load %arg3[%c0_3, %c0_4, %c0_5, %c0_6] : memref<1x2x4x32xbf16, #tpu.memory_space<vmem>>, vector<1x2x4x32xbf16>
    %3 = vector.shape_cast %2 : vector<1x2x4x32xbf16> to vector<2x4x32xbf16>
    %c0_7 = arith.constant 0 : index
    %c0_8 = arith.constant 0 : index
    %c0_9 = arith.constant 0 : index
    %c0_10 = arith.constant 0 : index
    %4 = vector.load %arg4[%c0_7, %c0_8, %c0_9, %c0_10] : memref<1x1x4x32xbf16, #tpu.memory_space<vmem>>, vector<1x1x4x32xbf16>
    %5 = vector.shape_cast %4 : vector<1x1x4x32xbf16> to vector<1x4x32xbf16>
    %6 = tpu.concatenate %1, %3, %5 in 0 : vector<1x4x32xbf16>, vector<2x4x32xbf16>, vector<1x4x32xbf16> -> vector<4x4x32xbf16>
    %7 = arith.extf %6 : vector<4x4x32xbf16> to vector<4x4x32xf32>
    %8 = vector.extract_strided_slice %7 {offsets = [0, 0, 0], sizes = [3, 4, 32], strides = [1, 1, 1]} : vector<4x4x32xf32> to vector<3x4x32xf32>
    %9 = vector.extract_strided_slice %7 {offsets = [1, 0, 0], sizes = [3, 4, 32], strides = [1, 1, 1]} : vector<4x4x32xf32> to vector<3x4x32xf32>
    %cst = arith.constant 7.500000e-01 : f32
    %10 = vector.broadcast %cst : f32 to vector<3x4x32xf32>
    %11 = arith.mulf %10, %8 : vector<3x4x32xf32>
    %cst_11 = arith.constant 2.500000e-01 : f32
    %12 = vector.broadcast %cst_11 : f32 to vector<3x4x32xf32>
    %13 = arith.mulf %12, %9 : vector<3x4x32xf32>
    %14 = arith.addf %11, %13 : vector<3x4x32xf32>
    %cst_12 = arith.constant 2.500000e-01 : f32
    %15 = vector.broadcast %cst_12 : f32 to vector<3x4x32xf32>
    %16 = arith.mulf %15, %8 : vector<3x4x32xf32>
    %cst_13 = arith.constant 7.500000e-01 : f32
    %17 = vector.broadcast %cst_13 : f32 to vector<3x4x32xf32>
    %18 = arith.mulf %17, %9 : vector<3x4x32xf32>
    %19 = arith.addf %16, %18 : vector<3x4x32xf32>
    %20 = vector.shape_cast %14 : vector<3x4x32xf32> to vector<3x1x4x32xf32>
    %21 = vector.shape_cast %19 : vector<3x4x32xf32> to vector<3x1x4x32xf32>
    %22 = tpu.concatenate %20, %21 in 1 : vector<3x1x4x32xf32>, vector<3x1x4x32xf32> -> vector<3x2x4x32xf32>
    %23 = vector.shape_cast %22 : vector<3x2x4x32xf32> to vector<6x4x32xf32>
    %c4_i32 = arith.constant 4 : i32
    %24 = arith.muli %arg1, %c4_i32 : i32
    %c1_i32 = arith.constant 1 : i32
    %25 = arith.subi %24, %c1_i32 : i32
    %c0_i32 = arith.constant 0 : i32
    %26 = arith.cmpi sge, %25, %c0_i32 : i32
    %27 = arith.extui %26 : i1 to i32
    %28 = arith.sitofp %27 : i32 to f32
    %c4_i32_14 = arith.constant 4 : i32
    %29 = arith.addi %25, %c4_i32_14 : i32
    %c1_i32_15 = arith.constant 1 : i32
    %30 = arith.addi %29, %c1_i32_15 : i32
    %c7_i32 = arith.constant 7 : i32
    %31 = arith.cmpi sle, %30, %c7_i32 : i32
    %32 = arith.extui %31 : i1 to i32
    %33 = arith.sitofp %32 : i32 to f32
    %34 = vector.extract_strided_slice %23 {offsets = [0, 0, 0], sizes = [1, 4, 32], strides = [1, 1, 1]} : vector<6x4x32xf32> to vector<1x4x32xf32>
    %35 = vector.broadcast %28 : f32 to vector<1x4x32xf32>
    %36 = arith.mulf %34, %35 : vector<1x4x32xf32>
    %37 = vector.extract_strided_slice %23 {offsets = [1, 0, 0], sizes = [4, 4, 32], strides = [1, 1, 1]} : vector<6x4x32xf32> to vector<4x4x32xf32>
    %38 = vector.extract_strided_slice %23 {offsets = [5, 0, 0], sizes = [1, 4, 32], strides = [1, 1, 1]} : vector<6x4x32xf32> to vector<1x4x32xf32>
    %39 = vector.broadcast %33 : f32 to vector<1x4x32xf32>
    %40 = arith.mulf %38, %39 : vector<1x4x32xf32>
    %41 = tpu.concatenate %36, %37, %40 in 0 : vector<1x4x32xf32>, vector<4x4x32xf32>, vector<1x4x32xf32> -> vector<6x4x32xf32>
    %42 = vector.extract_strided_slice %41 {offsets = [0, 0, 0], sizes = [6, 1, 32], strides = [1, 1, 1]} : vector<6x4x32xf32> to vector<6x1x32xf32>
    %43 = vector.extract_strided_slice %41 {offsets = [0, 0, 0], sizes = [6, 3, 32], strides = [1, 1, 1]} : vector<6x4x32xf32> to vector<6x3x32xf32>
    %44 = tpu.concatenate %42, %43 in 1 : vector<6x1x32xf32>, vector<6x3x32xf32> -> vector<6x4x32xf32>
    %45 = vector.extract_strided_slice %41 {offsets = [0, 1, 0], sizes = [6, 3, 32], strides = [1, 1, 1]} : vector<6x4x32xf32> to vector<6x3x32xf32>
    %46 = vector.extract_strided_slice %41 {offsets = [0, 3, 0], sizes = [6, 1, 32], strides = [1, 1, 1]} : vector<6x4x32xf32> to vector<6x1x32xf32>
    %47 = tpu.concatenate %45, %46 in 1 : vector<6x3x32xf32>, vector<6x1x32xf32> -> vector<6x4x32xf32>
    %cst_16 = arith.constant 2.500000e-01 : f32
    %48 = vector.broadcast %cst_16 : f32 to vector<6x4x32xf32>
    %49 = arith.mulf %48, %44 : vector<6x4x32xf32>
    %cst_17 = arith.constant 7.500000e-01 : f32
    %50 = vector.broadcast %cst_17 : f32 to vector<6x4x32xf32>
    %51 = arith.mulf %50, %41 : vector<6x4x32xf32>
    %52 = arith.addf %49, %51 : vector<6x4x32xf32>
    %cst_18 = arith.constant 7.500000e-01 : f32
    %53 = vector.broadcast %cst_18 : f32 to vector<6x4x32xf32>
    %54 = arith.mulf %53, %41 : vector<6x4x32xf32>
    %cst_19 = arith.constant 2.500000e-01 : f32
    %55 = vector.broadcast %cst_19 : f32 to vector<6x4x32xf32>
    %56 = arith.mulf %55, %47 : vector<6x4x32xf32>
    %57 = arith.addf %54, %56 : vector<6x4x32xf32>
    %cst_20 = arith.constant 0.000000e+00 : f32
    %58 = vector.broadcast %cst_20 : f32 to vector<6x1x32xf32>
    %59 = vector.extract_strided_slice %57 {offsets = [0, 0, 0], sizes = [6, 3, 32], strides = [1, 1, 1]} : vector<6x4x32xf32> to vector<6x3x32xf32>
    %60 = tpu.concatenate %58, %59 in 1 : vector<6x1x32xf32>, vector<6x3x32xf32> -> vector<6x4x32xf32>
    %61 = vector.extract_strided_slice %52 {offsets = [0, 1, 0], sizes = [6, 3, 32], strides = [1, 1, 1]} : vector<6x4x32xf32> to vector<6x3x32xf32>
    %62 = tpu.concatenate %61, %58 in 1 : vector<6x3x32xf32>, vector<6x1x32xf32> -> vector<6x4x32xf32>
    %63 = vector.extract_strided_slice %60 {offsets = [0, 0, 0], sizes = [4, 4, 32], strides = [1, 1, 1]} : vector<6x4x32xf32> to vector<4x4x32xf32>
    %64 = vector.extract_strided_slice %52 {offsets = [0, 0, 0], sizes = [4, 4, 32], strides = [1, 1, 1]} : vector<6x4x32xf32> to vector<4x4x32xf32>
    %65 = vector.extract_strided_slice %57 {offsets = [0, 0, 0], sizes = [4, 4, 32], strides = [1, 1, 1]} : vector<6x4x32xf32> to vector<4x4x32xf32>
    %66 = vector.extract_strided_slice %52 {offsets = [0, 0, 0], sizes = [4, 4, 32], strides = [1, 1, 1]} : vector<6x4x32xf32> to vector<4x4x32xf32>
    %67 = vector.extract_strided_slice %57 {offsets = [0, 0, 0], sizes = [4, 4, 32], strides = [1, 1, 1]} : vector<6x4x32xf32> to vector<4x4x32xf32>
    %68 = vector.extract_strided_slice %62 {offsets = [0, 0, 0], sizes = [4, 4, 32], strides = [1, 1, 1]} : vector<6x4x32xf32> to vector<4x4x32xf32>
    %69 = vector.extract_strided_slice %60 {offsets = [1, 0, 0], sizes = [4, 4, 32], strides = [1, 1, 1]} : vector<6x4x32xf32> to vector<4x4x32xf32>
    %70 = vector.extract_strided_slice %52 {offsets = [1, 0, 0], sizes = [4, 4, 32], strides = [1, 1, 1]} : vector<6x4x32xf32> to vector<4x4x32xf32>
    %71 = vector.extract_strided_slice %57 {offsets = [1, 0, 0], sizes = [4, 4, 32], strides = [1, 1, 1]} : vector<6x4x32xf32> to vector<4x4x32xf32>
    %72 = vector.extract_strided_slice %52 {offsets = [1, 0, 0], sizes = [4, 4, 32], strides = [1, 1, 1]} : vector<6x4x32xf32> to vector<4x4x32xf32>
    %73 = vector.extract_strided_slice %57 {offsets = [1, 0, 0], sizes = [4, 4, 32], strides = [1, 1, 1]} : vector<6x4x32xf32> to vector<4x4x32xf32>
    %74 = vector.extract_strided_slice %62 {offsets = [1, 0, 0], sizes = [4, 4, 32], strides = [1, 1, 1]} : vector<6x4x32xf32> to vector<4x4x32xf32>
    %75 = vector.extract_strided_slice %60 {offsets = [2, 0, 0], sizes = [4, 4, 32], strides = [1, 1, 1]} : vector<6x4x32xf32> to vector<4x4x32xf32>
    %76 = vector.extract_strided_slice %52 {offsets = [2, 0, 0], sizes = [4, 4, 32], strides = [1, 1, 1]} : vector<6x4x32xf32> to vector<4x4x32xf32>
    %77 = vector.extract_strided_slice %57 {offsets = [2, 0, 0], sizes = [4, 4, 32], strides = [1, 1, 1]} : vector<6x4x32xf32> to vector<4x4x32xf32>
    %78 = vector.extract_strided_slice %52 {offsets = [2, 0, 0], sizes = [4, 4, 32], strides = [1, 1, 1]} : vector<6x4x32xf32> to vector<4x4x32xf32>
    %79 = vector.extract_strided_slice %57 {offsets = [2, 0, 0], sizes = [4, 4, 32], strides = [1, 1, 1]} : vector<6x4x32xf32> to vector<4x4x32xf32>
    %80 = vector.extract_strided_slice %62 {offsets = [2, 0, 0], sizes = [4, 4, 32], strides = [1, 1, 1]} : vector<6x4x32xf32> to vector<4x4x32xf32>
    %81 = tpu.concatenate %63, %64, %65, %69, %70, %71, %75, %76, %77 in 2 : vector<4x4x32xf32>, vector<4x4x32xf32>, vector<4x4x32xf32>, vector<4x4x32xf32>, vector<4x4x32xf32>, vector<4x4x32xf32>, vector<4x4x32xf32>, vector<4x4x32xf32>, vector<4x4x32xf32> -> vector<4x4x288xf32>
    %82 = vector.shape_cast %81 : vector<4x4x288xf32> to vector<16x288xf32>
    %83 = arith.truncf %82 : vector<16x288xf32> to vector<16x288xbf16>
    %c0_21 = arith.constant 0 : index
    %c0_22 = arith.constant 0 : index
    %84 = vector.load %arg5[%c0_21, %c0_22] : memref<288x128xbf16, #tpu.memory_space<vmem>>, vector<288x128xbf16>
    %cst_23 = arith.constant dense<0.000000e+00> : vector<16x128xf32>
    %85 = tpu.matmul %83, %84, %cst_23 {dimension_numbers = #tpu.dot_dimension_numbers<[1], [0], [0], [1], [0, 0, 1, 1], [], []>} : vector<16x288xbf16>, vector<288x128xbf16>, vector<16x128xf32> -> vector<16x128xf32>
    %c0_24 = arith.constant 0 : index
    %c0_25 = arith.constant 0 : index
    %86 = vector.load %arg6[%c0_24, %c0_25] : memref<1x128xf32, #tpu.memory_space<vmem>>, vector<1x128xf32>
    %87 = vector.broadcast %86 : vector<1x128xf32> to vector<16x128xf32>
    %88 = arith.addf %85, %87 : vector<16x128xf32>
    %89 = vector.shape_cast %88 : vector<16x128xf32> to vector<4x4x128xf32>
    %90 = tpu.concatenate %66, %67, %68, %72, %73, %74, %78, %79, %80 in 2 : vector<4x4x32xf32>, vector<4x4x32xf32>, vector<4x4x32xf32>, vector<4x4x32xf32>, vector<4x4x32xf32>, vector<4x4x32xf32>, vector<4x4x32xf32>, vector<4x4x32xf32>, vector<4x4x32xf32> -> vector<4x4x288xf32>
    %91 = vector.shape_cast %90 : vector<4x4x288xf32> to vector<16x288xf32>
    %92 = arith.truncf %91 : vector<16x288xf32> to vector<16x288xbf16>
    %c0_26 = arith.constant 0 : index
    %c0_27 = arith.constant 0 : index
    %93 = vector.load %arg5[%c0_26, %c0_27] : memref<288x128xbf16, #tpu.memory_space<vmem>>, vector<288x128xbf16>
    %cst_28 = arith.constant dense<0.000000e+00> : vector<16x128xf32>
    %94 = tpu.matmul %92, %93, %cst_28 {dimension_numbers = #tpu.dot_dimension_numbers<[1], [0], [0], [1], [0, 0, 1, 1], [], []>} : vector<16x288xbf16>, vector<288x128xbf16>, vector<16x128xf32> -> vector<16x128xf32>
    %c0_29 = arith.constant 0 : index
    %c0_30 = arith.constant 0 : index
    %95 = vector.load %arg6[%c0_29, %c0_30] : memref<1x128xf32, #tpu.memory_space<vmem>>, vector<1x128xf32>
    %96 = vector.broadcast %95 : vector<1x128xf32> to vector<16x128xf32>
    %97 = arith.addf %94, %96 : vector<16x128xf32>
    %98 = vector.shape_cast %97 : vector<16x128xf32> to vector<4x4x128xf32>
    %99 = tpu.concatenate %89, %98 in 2 : vector<4x4x128xf32>, vector<4x4x128xf32> -> vector<4x4x256xf32>
    %c0_31 = arith.constant 0 : index
    %c0_32 = arith.constant 0 : index
    %c0_33 = arith.constant 0 : index
    %c0_34 = arith.constant 0 : index
    %100 = vector.load %arg7[%c0_31, %c0_32, %c0_33, %c0_34] : memref<1x4x4x256xf32, #tpu.memory_space<vmem>>, vector<1x4x4x256xf32>
    %101 = vector.shape_cast %100 : vector<1x4x4x256xf32> to vector<4x4x256xf32>
    %102 = vector.shape_cast %99 : vector<4x4x256xf32> to vector<1x4x4x256xf32>
    tpu.vector_store %arg7[%c0_31, %c0_32, %c0_33, %c0_34], %102 {strides = array<i32>} : memref<1x4x4x256xf32, #tpu.memory_space<vmem>>, vector<1x4x4x256xf32>,
    return
  }
  func.func @transform_0(%arg0: i32, %arg1: i32) -> (i32, i32, i32, i32) {
    %c2_i32 = arith.constant 2 : i32
    %0 = arith.muli %arg1, %c2_i32 : i32
    %c1_i32 = arith.constant 1 : i32
    %1 = arith.subi %0, %c1_i32 : i32
    %c0_i32 = arith.constant 0 : i32
    %2 = arith.maxsi %1, %c0_i32 : i32
    %c0_i32_0 = arith.constant 0 : i32
    %c0_i32_1 = arith.constant 0 : i32
    %c0_i32_2 = arith.constant 0 : i32
    return %arg0, %2, %c0_i32_0, %c0_i32_1 : i32, i32, i32, i32
  }
  func.func @transform_1(%arg0: i32, %arg1: i32) -> (i32, i32, i32, i32) {
    %c0_i32 = arith.constant 0 : i32
    %c0_i32_0 = arith.constant 0 : i32
    %c0_i32_1 = arith.constant 0 : i32
    return %arg0, %arg1, %c0_i32, %c0_i32_0 : i32, i32, i32, i32
  }
  func.func @transform_2(%arg0: i32, %arg1: i32) -> (i32, i32, i32, i32) {
    %c1_i32 = arith.constant 1 : i32
    %0 = arith.addi %arg1, %c1_i32 : i32
    %c2_i32 = arith.constant 2 : i32
    %1 = arith.muli %0, %c2_i32 : i32
    %c3_i32 = arith.constant 3 : i32
    %2 = arith.minsi %1, %c3_i32 : i32
    %c0_i32 = arith.constant 0 : i32
    %c0_i32_0 = arith.constant 0 : i32
    %c0_i32_1 = arith.constant 0 : i32
    return %arg0, %2, %c0_i32, %c0_i32_0 : i32, i32, i32, i32
  }
  func.func @transform_3(%arg0: i32, %arg1: i32) -> (i32, i32) {
    %c0_i32 = arith.constant 0 : i32
    %c0_i32_0 = arith.constant 0 : i32
    %c0_i32_1 = arith.constant 0 : i32
    return %c0_i32, %c0_i32_0 : i32, i32
  }
  func.func @transform_4(%arg0: i32, %arg1: i32) -> (i32, i32) {
    %c0_i32 = arith.constant 0 : i32
    %c0_i32_0 = arith.constant 0 : i32
    %c0_i32_1 = arith.constant 0 : i32
    return %c0_i32, %c0_i32_0 : i32, i32
  }
  func.func @transform_5(%arg0: i32, %arg1: i32) -> (i32, i32, i32, i32) {
    %c0_i32 = arith.constant 0 : i32
    %c0_i32_0 = arith.constant 0 : i32
    %c0_i32_1 = arith.constant 0 : i32
    return %arg0, %arg1, %c0_i32, %c0_i32_0 : i32, i32, i32, i32
  }
}

module attributes {stable_mosaic.version = 11 : i64} {
  func.func @_matmul_bias_kernel(%arg0: i32, %arg1: i32, %arg2: memref<32x32xbf16, #tpu.memory_space<vmem>>, %arg3: memref<32x128xbf16, #tpu.memory_space<vmem>>, %arg4: memref<1x128xf32, #tpu.memory_space<vmem>>, %arg5: memref<32x128xf32, #tpu.memory_space<vmem>>) attributes {dimension_semantics = [#tpu.dimension_semantics<parallel>, #tpu.dimension_semantics<parallel>], iteration_bounds = array<i64: 1, 1>, scalar_prefetch = 0 : i64, scratch_operands = 0 : i64, tpu.core_type = #tpu.core_type<tc>, window_params = [{transform_indices = @transform_0, window_bounds = array<i64: 32, 32>}, {transform_indices = @transform_1, window_bounds = array<i64: 32, 128>}, {transform_indices = @transform_2, window_bounds = array<i64: 1, 128>}, {transform_indices = @transform_3, window_bounds = array<i64: 32, 128>}]} {
    %c0 = arith.constant 0 : index
    %c0_0 = arith.constant 0 : index
    %0 = vector.load %arg2[%c0, %c0_0] : memref<32x32xbf16, #tpu.memory_space<vmem>>, vector<32x32xbf16>
    %c0_1 = arith.constant 0 : index
    %c0_2 = arith.constant 0 : index
    %1 = vector.load %arg3[%c0_1, %c0_2] : memref<32x128xbf16, #tpu.memory_space<vmem>>, vector<32x128xbf16>
    %cst = arith.constant dense<0.000000e+00> : vector<32x128xf32>
    %2 = tpu.matmul %0, %1, %cst {dimension_numbers = #tpu.dot_dimension_numbers<[1], [0], [0], [1], [0, 0, 1, 1], [], []>} : vector<32x32xbf16>, vector<32x128xbf16>, vector<32x128xf32> -> vector<32x128xf32>
    %c0_3 = arith.constant 0 : index
    %c0_4 = arith.constant 0 : index
    %3 = vector.load %arg4[%c0_3, %c0_4] : memref<1x128xf32, #tpu.memory_space<vmem>>, vector<1x128xf32>
    %4 = vector.broadcast %3 : vector<1x128xf32> to vector<32x128xf32>
    %5 = arith.addf %2, %4 : vector<32x128xf32>
    %c0_5 = arith.constant 0 : index
    %c0_6 = arith.constant 0 : index
    %6 = vector.load %arg5[%c0_5, %c0_6] : memref<32x128xf32, #tpu.memory_space<vmem>>, vector<32x128xf32>
    tpu.vector_store %arg5[%c0_5, %c0_6], %5 {strides = array<i32>} : memref<32x128xf32, #tpu.memory_space<vmem>>, vector<32x128xf32>,
    return
  }
  func.func @transform_0(%arg0: i32, %arg1: i32) -> (i32, i32) {
    %c0_i32 = arith.constant 0 : i32
    %c0_i32_0 = arith.constant 0 : i32
    return %arg0, %c0_i32 : i32, i32
  }
  func.func @transform_1(%arg0: i32, %arg1: i32) -> (i32, i32) {
    %c0_i32 = arith.constant 0 : i32
    %c0_i32_0 = arith.constant 0 : i32
    return %c0_i32, %arg1 : i32, i32
  }
  func.func @transform_2(%arg0: i32, %arg1: i32) -> (i32, i32) {
    %c0_i32 = arith.constant 0 : i32
    %c0_i32_0 = arith.constant 0 : i32
    return %c0_i32, %arg1 : i32, i32
  }
  func.func @transform_3(%arg0: i32, %arg1: i32) -> (i32, i32) {
    %c0_i32 = arith.constant 0 : i32
    return %arg0, %arg1 : i32, i32
  }
}

module attributes {stable_mosaic.version = 11 : i64} {
  func.func @_conv3x3_s2_kernel(%arg0: i32, %arg1: i32, %arg2: memref<1x4x2x3x32xbf16, #tpu.memory_space<vmem>>, %arg3: memref<1x4x1x3x32xbf16, #tpu.memory_space<vmem>>, %arg4: memref<288x128xbf16, #tpu.memory_space<vmem>>, %arg5: memref<1x128xf32, #tpu.memory_space<vmem>>, %arg6: memref<1x2x2x128xf32, #tpu.memory_space<vmem>>) attributes {dimension_semantics = [#tpu.dimension_semantics<parallel>, #tpu.dimension_semantics<parallel>], iteration_bounds = array<i64: 2, 1>, scalar_prefetch = 0 : i64, scratch_operands = 0 : i64, tpu.core_type = #tpu.core_type<tc>, window_params = [{transform_indices = @transform_0, window_bounds = array<i64: 1, 4, 2, 3, 32>}, {transform_indices = @transform_1, window_bounds = array<i64: 1, 4, 1, 3, 32>}, {pipeline_mode = #tpu.pipeline_mode<synchronous>, transform_indices = @transform_2, window_bounds = array<i64: 288, 128>}, {pipeline_mode = #tpu.pipeline_mode<synchronous>, transform_indices = @transform_3, window_bounds = array<i64: 1, 128>}, {transform_indices = @transform_4, window_bounds = array<i64: 1, 2, 2, 128>}]} {
    %c0 = arith.constant 0 : index
    %c0_0 = arith.constant 0 : index
    %c0_1 = arith.constant 0 : index
    %c0_2 = arith.constant 0 : index
    %c0_3 = arith.constant 0 : index
    %0 = vector.load %arg2[%c0, %c0_0, %c0_1, %c0_2, %c0_3] : memref<1x4x2x3x32xbf16, #tpu.memory_space<vmem>>, vector<1x4x2x3x32xbf16>
    %1 = vector.shape_cast %0 : vector<1x4x2x3x32xbf16> to vector<4x2x3x32xbf16>
    %c0_4 = arith.constant 0 : index
    %c0_5 = arith.constant 0 : index
    %c0_6 = arith.constant 0 : index
    %c0_7 = arith.constant 0 : index
    %c0_8 = arith.constant 0 : index
    %2 = vector.load %arg3[%c0_4, %c0_5, %c0_6, %c0_7, %c0_8] : memref<1x4x1x3x32xbf16, #tpu.memory_space<vmem>>, vector<1x4x1x3x32xbf16>
    %3 = vector.shape_cast %2 : vector<1x4x1x3x32xbf16> to vector<4x1x3x32xbf16>
    %4 = tpu.concatenate %1, %3 in 1 : vector<4x2x3x32xbf16>, vector<4x1x3x32xbf16> -> vector<4x3x3x32xbf16>
    %5 = vector.extract_strided_slice %4 {offsets = [0, 0, 0, 0], sizes = [1, 2, 2, 32], strides = [1, 1, 1, 1]} : vector<4x3x3x32xbf16> to vector<1x2x2x32xbf16>
    %6 = vector.shape_cast %5 : vector<1x2x2x32xbf16> to vector<2x2x32xbf16>
    %7 = vector.extract_strided_slice %4 {offsets = [1, 0, 0, 0], sizes = [1, 2, 2, 32], strides = [1, 1, 1, 1]} : vector<4x3x3x32xbf16> to vector<1x2x2x32xbf16>
    %8 = vector.shape_cast %7 : vector<1x2x2x32xbf16> to vector<2x2x32xbf16>
    %9 = vector.extract_strided_slice %4 {offsets = [0, 0, 1, 0], sizes = [1, 2, 2, 32], strides = [1, 1, 1, 1]} : vector<4x3x3x32xbf16> to vector<1x2x2x32xbf16>
    %10 = vector.shape_cast %9 : vector<1x2x2x32xbf16> to vector<2x2x32xbf16>
    %11 = vector.extract_strided_slice %4 {offsets = [2, 0, 0, 0], sizes = [1, 2, 2, 32], strides = [1, 1, 1, 1]} : vector<4x3x3x32xbf16> to vector<1x2x2x32xbf16>
    %12 = vector.shape_cast %11 : vector<1x2x2x32xbf16> to vector<2x2x32xbf16>
    %13 = vector.extract_strided_slice %4 {offsets = [3, 0, 0, 0], sizes = [1, 2, 2, 32], strides = [1, 1, 1, 1]} : vector<4x3x3x32xbf16> to vector<1x2x2x32xbf16>
    %14 = vector.shape_cast %13 : vector<1x2x2x32xbf16> to vector<2x2x32xbf16>
    %15 = vector.extract_strided_slice %4 {offsets = [2, 0, 1, 0], sizes = [1, 2, 2, 32], strides = [1, 1, 1, 1]} : vector<4x3x3x32xbf16> to vector<1x2x2x32xbf16>
    %16 = vector.shape_cast %15 : vector<1x2x2x32xbf16> to vector<2x2x32xbf16>
    %17 = vector.extract_strided_slice %4 {offsets = [0, 1, 0, 0], sizes = [1, 2, 2, 32], strides = [1, 1, 1, 1]} : vector<4x3x3x32xbf16> to vector<1x2x2x32xbf16>
    %18 = vector.shape_cast %17 : vector<1x2x2x32xbf16> to vector<2x2x32xbf16>
    %19 = vector.extract_strided_slice %4 {offsets = [1, 1, 0, 0], sizes = [1, 2, 2, 32], strides = [1, 1, 1, 1]} : vector<4x3x3x32xbf16> to vector<1x2x2x32xbf16>
    %20 = vector.shape_cast %19 : vector<1x2x2x32xbf16> to vector<2x2x32xbf16>
    %21 = vector.extract_strided_slice %4 {offsets = [0, 1, 1, 0], sizes = [1, 2, 2, 32], strides = [1, 1, 1, 1]} : vector<4x3x3x32xbf16> to vector<1x2x2x32xbf16>
    %22 = vector.shape_cast %21 : vector<1x2x2x32xbf16> to vector<2x2x32xbf16>
    %23 = tpu.concatenate %6, %8, %10, %12, %14, %16, %18, %20, %22 in 2 : vector<2x2x32xbf16>, vector<2x2x32xbf16>, vector<2x2x32xbf16>, vector<2x2x32xbf16>, vector<2x2x32xbf16>, vector<2x2x32xbf16>, vector<2x2x32xbf16>, vector<2x2x32xbf16>, vector<2x2x32xbf16> -> vector<2x2x288xbf16>
    %24 = vector.shape_cast %23 : vector<2x2x288xbf16> to vector<4x288xbf16>
    %c0_9 = arith.constant 0 : index
    %c0_10 = arith.constant 0 : index
    %25 = vector.load %arg4[%c0_9, %c0_10] : memref<288x128xbf16, #tpu.memory_space<vmem>>, vector<288x128xbf16>
    %cst = arith.constant dense<0.000000e+00> : vector<4x128xf32>
    %26 = tpu.matmul %24, %25, %cst {dimension_numbers = #tpu.dot_dimension_numbers<[1], [0], [0], [1], [0, 0, 1, 1], [], []>} : vector<4x288xbf16>, vector<288x128xbf16>, vector<4x128xf32> -> vector<4x128xf32>
    %c0_11 = arith.constant 0 : index
    %c0_12 = arith.constant 0 : index
    %27 = vector.load %arg5[%c0_11, %c0_12] : memref<1x128xf32, #tpu.memory_space<vmem>>, vector<1x128xf32>
    %28 = vector.broadcast %27 : vector<1x128xf32> to vector<4x128xf32>
    %29 = arith.addf %26, %28 : vector<4x128xf32>
    %30 = vector.shape_cast %29 : vector<4x128xf32> to vector<2x2x128xf32>
    %c0_13 = arith.constant 0 : index
    %c0_14 = arith.constant 0 : index
    %c0_15 = arith.constant 0 : index
    %c0_16 = arith.constant 0 : index
    %31 = vector.load %arg6[%c0_13, %c0_14, %c0_15, %c0_16] : memref<1x2x2x128xf32, #tpu.memory_space<vmem>>, vector<1x2x2x128xf32>
    %32 = vector.shape_cast %31 : vector<1x2x2x128xf32> to vector<2x2x128xf32>
    %33 = vector.shape_cast %30 : vector<2x2x128xf32> to vector<1x2x2x128xf32>
    tpu.vector_store %arg6[%c0_13, %c0_14, %c0_15, %c0_16], %33 {strides = array<i32>} : memref<1x2x2x128xf32, #tpu.memory_space<vmem>>, vector<1x2x2x128xf32>,
    return
  }
  func.func @transform_0(%arg0: i32, %arg1: i32) -> (i32, i32, i32, i32, i32) {
    %c0_i32 = arith.constant 0 : i32
    %c0_i32_0 = arith.constant 0 : i32
    %c0_i32_1 = arith.constant 0 : i32
    %c0_i32_2 = arith.constant 0 : i32
    return %arg0, %c0_i32, %arg1, %c0_i32_0, %c0_i32_1 : i32, i32, i32, i32, i32
  }
  func.func @transform_1(%arg0: i32, %arg1: i32) -> (i32, i32, i32, i32, i32) {
    %c1_i32 = arith.constant 1 : i32
    %0 = arith.addi %arg1, %c1_i32 : i32
    %c2_i32 = arith.constant 2 : i32
    %1 = arith.muli %0, %c2_i32 : i32
    %c0_i32 = arith.constant 0 : i32
    %c0_i32_0 = arith.constant 0 : i32
    %c0_i32_1 = arith.constant 0 : i32
    %c0_i32_2 = arith.constant 0 : i32
    return %arg0, %c0_i32, %1, %c0_i32_0, %c0_i32_1 : i32, i32, i32, i32, i32
  }
  func.func @transform_2(%arg0: i32, %arg1: i32) -> (i32, i32) {
    %c0_i32 = arith.constant 0 : i32
    %c0_i32_0 = arith.constant 0 : i32
    %c0_i32_1 = arith.constant 0 : i32
    return %c0_i32, %c0_i32_0 : i32, i32
  }
  func.func @transform_3(%arg0: i32, %arg1: i32) -> (i32, i32) {
    %c0_i32 = arith.constant 0 : i32
    %c0_i32_0 = arith.constant 0 : i32
    %c0_i32_1 = arith.constant 0 : i32
    return %c0_i32, %c0_i32_0 : i32, i32
  }
  func.func @transform_4(%arg0: i32, %arg1: i32) -> (i32, i32, i32, i32) {
    %c0_i32 = arith.constant 0 : i32
    %c0_i32_0 = arith.constant 0 : i32
    %c0_i32_1 = arith.constant 0 : i32
    return %arg0, %arg1, %c0_i32, %c0_i32_0 : i32, i32, i32, i32
  }
}

</mosaic_0001>

<bundles_post_ra>
// kernel: tile.13
= control target key start
LH: loop header
LB: loop body
LE: loop exit
PB: predicated region body
PF: predicated region fallthrough
CT: control target
= control target key end

     0   :  { %s208_s0 = inlined_call_operand.vmem [shape: f32[3], index: 0, kind: input, shape index: {}]   ;;  %s209_s1 = inlined_call_operand.vmem [shape: f32[256,3], index: 1, kind: output, shape index: {}]  }
   0x1   :  { %v4_v0 = vld [vmem:[%s208_s0] ss:$0 sm:$0xff] }
   0x2   :  { %5 = vst [vmem:[%s209_s1] sm:$0xff] %v4_v0 }
   0x3   :  { %68 = vst [vmem:[%s209_s1 + $0x8] sm:$0xff] %v4_v0 }
   0x4   :  { %69 = vst [vmem:[%s209_s1 + $0x10] sm:$0xff] %v4_v0 }
   0x5   :  { %70 = vst [vmem:[%s209_s1 + $0x18] sm:$0xff] %v4_v0 }
   0x6   :  { %71 = vst [vmem:[%s209_s1 + $0x20] sm:$0xff] %v4_v0 }
   0x7   :  { %72 = vst [vmem:[%s209_s1 + $0x28] sm:$0xff] %v4_v0 }
   0x8   :  { %73 = vst [vmem:[%s209_s1 + $0x30] sm:$0xff] %v4_v0 }
   0x9   :  { %74 = vst [vmem:[%s209_s1 + $0x38] sm:$0xff] %v4_v0 }
   0xa   :  { %75 = vst [vmem:[%s209_s1 + $0x40] sm:$0xff] %v4_v0 }
   0xb   :  { %76 = vst [vmem:[%s209_s1 + $0x48] sm:$0xff] %v4_v0 }
   0xc   :  { %77 = vst [vmem:[%s209_s1 + $0x50] sm:$0xff] %v4_v0 }
   0xd   :  { %78 = vst [vmem:[%s209_s1 + $0x58] sm:$0xff] %v4_v0 }
   0xe   :  { %79 = vst [vmem:[%s209_s1 + $0x60] sm:$0xff] %v4_v0 }
   0xf   :  { %80 = vst [vmem:[%s209_s1 + $0x68] sm:$0xff] %v4_v0 }
  0x10   :  { %81 = vst [vmem:[%s209_s1 + $0x70] sm:$0xff] %v4_v0 }
  0x11   :  { %82 = vst [vmem:[%s209_s1 + $0x78] sm:$0xff] %v4_v0 }
  0x12   :  { %83 = vst [vmem:[%s209_s1 + $0x80] sm:$0xff] %v4_v0 }
  0x13   :  { %84 = vst [vmem:[%s209_s1 + $0x88] sm:$0xff] %v4_v0 }
  0x14   :  { %85 = vst [vmem:[%s209_s1 + $0x90] sm:$0xff] %v4_v0 }
  0x15   :  { %86 = vst [vmem:[%s209_s1 + $0x98] sm:$0xff] %v4_v0 }
  0x16   :  { %87 = vst [vmem:[%s209_s1 + $0xa0] sm:$0xff] %v4_v0 }
  0x17   :  { %88 = vst [vmem:[%s209_s1 + $0xa8] sm:$0xff] %v4_v0 }
  0x18   :  { %89 = vst [vmem:[%s209_s1 + $0xb0] sm:$0xff] %v4_v0 }
  0x19   :  { %90 = vst [vmem:[%s209_s1 + $0xb8] sm:$0xff] %v4_v0 }
  0x1a   :  { %91 = vst [vmem:[%s209_s1 + $0xc0] sm:$0xff] %v4_v0 }
  0x1b   :  { %92 = vst [vmem:[%s209_s1 + $0xc8] sm:$0xff] %v4_v0 }
  0x1c   :  { %93 = vst [vmem:[%s209_s1 + $0xd0] sm:$0xff] %v4_v0 }
  0x1d   :  { %94 = vst [vmem:[%s209_s1 + $0xd8] sm:$0xff] %v4_v0 }
  0x1e   :  { %95 = vst [vmem:[%s209_s1 + $0xe0] sm:$0xff] %v4_v0 }
  0x1f   :  { %96 = vst [vmem:[%s209_s1 + $0xe8] sm:$0xff] %v4_v0 }
  0x20   :  { %97 = vst [vmem:[%s209_s1 + $0xf0] sm:$0xff] %v4_v0 }
  0x21   :  { %98 = vst [vmem:[%s209_s1 + $0xf8] sm:$0xff] %v4_v0 }

// kernel: mul.7
= control target key start
LH: loop header
LB: loop body
LE: loop exit
PB: predicated region body
PF: predicated region fallthrough
CT: control target
= control target key end

     0   :  { %vm5_vm0 = vcmask 1041409   ;;  %vm21_vm1 = vcmask 7168   ;;  %s1859_s20 = smov 125   ;;  %s1860_s27 = smov 127   ;;  %vm25_vm2 = vcmask 15360   ;;  %vm7_vm3 = vcmask 23552   ;;  %s3303_s0 = inlined_call_operand.vmem [shape: f32[256,3], index: 0, kind: input, shape index: {}]   ;;  %s3304_s1 = inlined_call_operand.vmem [shape: f32[768], index: 1, kind: output, shape index: {}]  }
   0x1   :  { %v1387_v0 = vld [vmem:[%s3303_s0 + $0x55] sm:$0x1]   ;;  %v1398_v5 = vld [vmem:[%s3303_s0 + $0x7f] sm:$0x1]   ;;  %v1393_v9 = vld [vmem:[%s3303_s0 + $0x2a] sm:$0x1]  }
   0x2   :  { %v1388_v1 = vld [vmem:[%s3303_s0 + $0xd4] sm:$0x2]   ;;  %v1399_v6 = vld [vmem:[%s3303_s0 + $0xfe] sm:$0x2]   ;;  %v1394_v11 = vld [vmem:[%s3303_s0 + $0xa9] sm:$0x2]  }
   0x3   :  { %v1389_v2 = vld [vmem:[%s3303_s0 + $0x55] sm:$0x1]   ;;  %v14_v3 = vsel %vm5_vm0, %v1388_v1, %v1387_v0  ;;  %v57_v8 = vsel %vm5_vm0, %v1399_v6, %v1398_v5  ;;  %v1395_v12 = vld [vmem:[%s3303_s0 + $0x2a] sm:$0x1]   ;;  %v1401_v14 = vld [vmem:[%s3303_s0 + $0x54] sm:$0x1]   ;;  %v36_v16 = vsel %vm5_vm0, %v1394_v11, %v1393_v9 }
   0x4   :  { %v1390_v4 = vld [vmem:[%s3303_s0 + $0xd4] sm:$0x2]   ;;  %58 = vrot.lane.b32.xlu1 %v57_v8, %s1859_s20  ;;  %v1396_v13 = vld [vmem:[%s3303_s0 + $0xa9] sm:$0x2]   ;;  %v1402_v15 = vld [vmem:[%s3303_s0 + $0xd3] sm:$0x2]  }
   0x5   :  { %v20_v7 = vsel %vm5_vm0, %v1390_v4, %v1389_v2  ;;  %v42_v17 = vsel %vm5_vm0, %v1396_v13, %v1395_v12  ;;  %v1404_v18 = vld [vmem:[%s3303_s0 + $0x29] sm:$0x1]   ;;  %v68_v20 = vsel %vm5_vm0, %v1402_v15, %v1401_v14  ;;  %s1861_s7 = smov 123   ;;  %s1862_s8 = smov 124   ;;  %v1406_v23 = vld [vmem:[%s3303_s0 + $0x7e] sm:$0x1]  }
   0x6   :  { %v22_v10 = vsel %vm21_vm1, %v20_v7, %v14_v3  ;;  %v1405_v19 = vld [vmem:[%s3303_s0 + $0xa8] sm:$0x2]   ;;  %v44_v22 = vsel %vm25_vm2, %v42_v17, %v36_v16  ;;  %v1407_v24 = vld [vmem:[%s3303_s0 + $0xfd] sm:$0x2]   ;;  %s1863_s13 = smov 126   ;;  %s1864_s22 = smov 122  }
   0x7   :  { %23 = vrot.lane.b32.xlu0 %v22_v10, %s1860_s27  ;;  %v79_v21 = vsel %vm5_vm0, %v1405_v19, %v1404_v18  ;;  %v1412_v25 = vld [vmem:[%s3303_s0 + $0x28] sm:$0x1]   ;;  %v1409_v27 = vld [vmem:[%s3303_s0 + $0x53] sm:$0x1]   ;;  %v89_v29 = vsel %vm5_vm0, %v1407_v24, %v1406_v23  ;;  %s1865_s23 = smov 120   ;;  %s1866_s28 = smov 121  }
   0x8   :  { %80 = vrot.lane.b32.xlu2 %v79_v21, %s1861_s7  ;;  %v1413_v26 = vld [vmem:[%s3303_s0 + $0xa7] sm:$0x2]   ;;  %v1410_v28 = vld [vmem:[%s3303_s0 + $0xd2] sm:$0x2]   ;;  %v1414_v32 = vld [vmem:[%s3303_s0 + $0x7d] sm:$0x1]  }
   0x9   :  { %v111_v30 = vsel %vm5_vm0, %v1413_v26, %v1412_v25  ;;  %v100_v31 = vsel %vm5_vm0, %v1410_v28, %v1409_v27  ;;  %v1415_v33 = vld [vmem:[%s3303_s0 + $0xfc] sm:$0x2]   ;;  %v1420_v34 = vld [vmem:[%s3303_s0 + $0x27] sm:$0x1]   ;;  %v1417_v36 = vld [vmem:[%s3303_s0 + $0x52] sm:$0x1]  }
   0xa   :  { %v1421_v35 = vld [vmem:[%s3303_s0 + $0xa6] sm:$0x2]   ;;  %v1418_v37 = vld [vmem:[%s3303_s0 + $0xd1] sm:$0x2]   ;;  %v121_v38 = vsel %vm5_vm0, %v1415_v33, %v1414_v32  ;;  %s1868_s9 = smov 117   ;;  %s1869_s14 = smov 118  }
   0xb   :  { %v143_v39 = vsel %vm5_vm0, %v1421_v35, %v1420_v34  ;;  %v132_v40 = vsel %vm5_vm0, %v1418_v37, %v1417_v36  ;;  %v1422_v41 = vld [vmem:[%s3303_s0 + $0x7c] sm:$0x1]   ;;  %v1428_v43 = vld [vmem:[%s3303_s0 + $0x26] sm:$0x1]   ;;  %v1425_v45 = vld [vmem:[%s3303_s0 + $0x51] sm:$0x1]  }
   0xc   :  { %69 = vrot.lane.b32.xlu1 %v68_v20, %s1862_s8  ;;  %s1867_s8 = smov 119   ;;  %v1423_v42 = vld [vmem:[%s3303_s0 + $0xfb] sm:$0x2]   ;;  %v1429_v44 = vld [vmem:[%s3303_s0 + $0xa5] sm:$0x2]   ;;  %s1871_s24 = smov 114  }
   0xd   :  { %v1426_v46 = vld [vmem:[%s3303_s0 + $0xd0] sm:$0x2]   ;;  %v153_v47 = vsel %vm5_vm0, %v1423_v42, %v1422_v41  ;;  %v175_v48 = vsel %vm5_vm0, %v1429_v44, %v1428_v43  ;;  %v1430_v50 = vld [vmem:[%s3303_s0 + $0x7b] sm:$0x1]   ;;  %s1872_s29 = smov 115   ;;  %s1874_s10 = smov 111  }
   0xe   :  { %v164_v49 = vsel %vm5_vm0, %v1426_v46, %v1425_v45  ;;  %v1431_v51 = vld [vmem:[%s3303_s0 + $0xfa] sm:$0x2]   ;;  %v1436_v52 = vld [vmem:[%s3303_s0 + $0x25] sm:$0x1]   ;;  %v1433_v54 = vld [vmem:[%s3303_s0 + $0x50] sm:$0x1]  }
   0xf   :  { %45 = vrot.lane.b32.xlu0 %v44_v22, %s1863_s13  ;;  %v1437_v53 = vld [vmem:[%s3303_s0 + $0xa4] sm:$0x2]   ;;  %v1434_v55 = vld [vmem:[%s3303_s0 + $0xcf] sm:$0x2]   ;;  %v185_v56 = vsel %vm5_vm0, %v1431_v51, %v1430_v50  ;;  %v1438_v59 = vld [vmem:[%s3303_s0 + $0x7a] sm:$0x1]  }
  0x10   :  { %90 = vrot.lane.b32.xlu2 %v89_v29, %s1864_s22  ;;  %v207_v57 = vsel %vm5_vm0, %v1437_v53, %v1436_v52  ;;  %v196_v58 = vsel %vm5_vm0, %v1434_v55, %v1433_v54  ;;  %v1439_v60 = vld [vmem:[%s3303_s0 + $0xf9] sm:$0x2]   ;;  %s1875_s15 = smov 112   ;;  %v1444_v61 = vld [vmem:[%s3303_s0 + $0x24] sm:$0x1]   ;;  %s1877_s25 = smov 108  }
  0x11   :  { %v1445_v62 = vld [vmem:[%s3303_s0 + $0xa3] sm:$0x2]   ;;  %v1441_v63 = vld [vmem:[%s3303_s0 + $0x4f] sm:$0x1]   ;;  %v217_v1 = vsel %vm5_vm0, %v1439_v60, %v1438_v59  ;;  %v1446_v4 = vld [vmem:[%s3303_s0 + $0x79] sm:$0x1]  }
  0x12   :  { %v1442_v0 = vld [vmem:[%s3303_s0 + $0xce] sm:$0x2]   ;;  %v239_v2 = vsel %vm5_vm0, %v1445_v62, %v1444_v61  ;;  %v1447_v5 = vld [vmem:[%s3303_s0 + $0xf8] sm:$0x2]   ;;  %s1878_s30 = smov 109   ;;  %s1880_s11 = smov 105  }
  0x13   :  { %v228_v3 = vsel %vm5_vm0, %v1442_v0, %v1441_v63  ;;  %v1452_v6 = vld [vmem:[%s3303_s0 + $0x23] sm:$0x1]   ;;  %v1449_v8 = vld [vmem:[%s3303_s0 + $0x4e] sm:$0x1]   ;;  %v249_v10 = vsel %vm5_vm0, %v1447_v5, %v1446_v4  ;;  %v1454_v13 = vld [vmem:[%s3303_s0 + $0x78] sm:$0x1]  }
  0x14   :  { %112 = vrot.lane.b32.xlu1 %v111_v30, %s1865_s23  ;;  %s1870_s23 = smov 116   ;;  %v1453_v7 = vld [vmem:[%s3303_s0 + $0xa2] sm:$0x2]   ;;  %v1450_v9 = vld [vmem:[%s3303_s0 + $0xcd] sm:$0x2]   ;;  %s1881_s16 = smov 106  }
  0x15   :  { %v271_v11 = vsel %vm5_vm0, %v1453_v7, %v1452_v6  ;;  %v260_v12 = vsel %vm5_vm0, %v1450_v9, %v1449_v8  ;;  %v1455_v14 = vld [vmem:[%s3303_s0 + $0xf7] sm:$0x2]   ;;  %v1460_v15 = vld [vmem:[%s3303_s0 + $0x22] sm:$0x1]   ;;  %v1457_v17 = vld [vmem:[%s3303_s0 + $0x4d] sm:$0x1]  }
  0x16   :  { %v1461_v16 = vld [vmem:[%s3303_s0 + $0xa1] sm:$0x2]   ;;  %v1458_v18 = vld [vmem:[%s3303_s0 + $0xcc] sm:$0x2]   ;;  %v281_v19 = vsel %vm5_vm0, %v1455_v14, %v1454_v13  ;;  %s1883_s26 = smov 102   ;;  %s1884_s2 = smov 103  }
  0x17   :  { %101 = vrot.lane.b32.xlu0 %v100_v31, %s1866_s28  ;;  %v303_v20 = vsel %vm5_vm0, %v1461_v16, %v1460_v15  ;;  %v292_v21 = vsel %vm5_vm0, %v1458_v18, %v1457_v17  ;;  %v1462_v22 = vld [vmem:[%s3303_s0 + $0x77] sm:$0x1]   ;;  %v1468_v24 = vld [vmem:[%s3303_s0 + $0x21] sm:$0x1]   ;;  %v1465_v26 = vld [vmem:[%s3303_s0 + $0x4c] sm:$0x1]  }
  0x18   :  { %122 = vrot.lane.b32.xlu2 %v121_v38, %s1867_s8  ;;  %v1463_v23 = vld [vmem:[%s3303_s0 + $0xf6] sm:$0x2]   ;;  %v1469_v25 = vld [vmem:[%s3303_s0 + $0xa0] sm:$0x2]   ;;  %v1466_v27 = vld [vmem:[%s3303_s0 + $0xcb] sm:$0x2]  }
  0x19   :  { %v313_v28 = vsel %vm5_vm0, %v1463_v23, %v1462_v22  ;;  %v335_v29 = vsel %vm5_vm0, %v1469_v25, %v1468_v24  ;;  %v324_v30 = vsel %vm5_vm0, %v1466_v27, %v1465_v26  ;;  %s1886_s12 = smov 99   ;;  %v1470_v31 = vld [vmem:[%s3303_s0 + $0x76] sm:$0x1]   ;;  %s1887_s17 = smov 100   ;;  %v1476_v33 = vld [vmem:[%s3303_s0 + $0x20] sm:$0x1]  }
  0x1a   :  { %v1471_v32 = vld [vmem:[%s3303_s0 + $0xf5] sm:$0x2]   ;;  %v1477_v34 = vld [vmem:[%s3303_s0 + $0x9f] sm:$0x2]   ;;  %v1473_v35 = vld [vmem:[%s3303_s0 + $0x4b] sm:$0x1]  }
  0x1b   :  { %v1474_v36 = vld [vmem:[%s3303_s0 + $0xca] sm:$0x2]   ;;  %v345_v37 = vsel %vm5_vm0, %v1471_v32, %v1470_v31  ;;  %v367_v38 = vsel %vm5_vm0, %v1477_v34, %v1476_v33  ;;  %s1889_s27 = smov 96   ;;  %v1479_v41 = vld [vmem:[%s3303_s0 + $0xf4] sm:$0x2]   ;;  %s1890_s3 = smov 97  }
  0x1c   :  { %144 = vrot.lane.b32.xlu1 %v143_v39, %s1868_s9  ;;  %s1873_s9 = smov 113   ;;  %v356_v39 = vsel %vm5_vm0, %v1474_v36, %v1473_v35  ;;  %v1484_v42 = vld [vmem:[%s3303_s0 + $0x1f] sm:$0x1]   ;;  %v1481_v44 = vld [vmem:[%s3303_s0 + $0x4a] sm:$0x1]   ;;  %s1892_s13 = smov 93  }
  0x1d   :  { %v1485_v43 = vld [vmem:[%s3303_s0 + $0x9e] sm:$0x2]   ;;  %v1482_v45 = vld [vmem:[%s3303_s0 + $0xc9] sm:$0x2]   ;;  %v1487_v50 = vld [vmem:[%s3303_s0 + $0xf3] sm:$0x2]  }
  0x1e   :  { %s1893_s18 = smov 94   ;;  %v1492_v51 = vld [vmem:[%s3303_s0 + $0x1e] sm:$0x1]   ;;  %v2_v53 = vld [vmem:[%s3303_s0] sm:$0x1]   ;;  %s1894_s4 = smov 92  }
  0x1f   :  { %133 = vrot.lane.b32.xlu0 %v132_v40, %s1869_s14  ;;  %v1478_v40 = vld [vmem:[%s3303_s0 + $0x75] sm:$0x1]   ;;  %v1493_v52 = vld [vmem:[%s3303_s0 + $0x9d] sm:$0x2]   ;;  %v1386_v54 = vld [vmem:[%s3303_s0 + $0x7f] sm:$0x2]  }
  0x20   :  { %154 = vrot.lane.b32.xlu2 %v153_v47, %s1870_s23  ;;  %v377_v46 = vsel %vm5_vm0, %v1479_v41, %v1478_v40  ;;  %v399_v47 = vsel %vm5_vm0, %v1485_v43, %v1484_v42  ;;  %v1489_v55 = vld [vmem:[%s3303_s0 + $0x49] sm:$0x1]   ;;  %v431_v59 = vsel %vm5_vm0, %v1493_v52, %v1492_v51  ;;  %s1895_s5 = smov 90   ;;  %v1494_v62 = vld [vmem:[%s3303_s0 + $0x73] sm:$0x1]   ;;  %s1897_s19 = smov 89  }
  0x21   :  { %v1495_v63 = vld [vmem:[%s3303_s0 + $0xf2] sm:$0x2]   ;;  %v1500_v0 = vld [vmem:[%s3303_s0 + $0x1d] sm:$0x1]   ;;  %s1898_s20 = smov 87   ;;  %s1901_s6 = smov 84  }
  0x22   :  { %v441_v4 = vsel %vm5_vm0, %v1495_v63, %v1494_v62  ;;  %v1502_v8 = vld [vmem:[%s3303_s0 + $0x72] sm:$0x1]   ;;  %v1506_v13 = vld [vmem:[%s3303_s0 + $0xc6] sm:$0x2]   ;;  %v1510_v18 = vld [vmem:[%s3303_s0 + $0x71] sm:$0x1]  }
  0x23   :  { %v1503_v9 = vld [vmem:[%s3303_s0 + $0xf1] sm:$0x2]   ;;  %vm28_vm4 = vcmask 1048568   ;;  %v1517_v22 = vld [vmem:[%s3303_s0 + $0x9a] sm:$0x2]   ;;  %vm60_vm5 = vcmask 1048552  }
  0x24   :  { %176 = vrot.lane.b32.xlu1 %v175_v48, %s1871_s24  ;;  %s1876_s24 = smov 110   ;;  %v388_v48 = vsel %vm5_vm0, %v1482_v45, %v1481_v44  ;;  %v473_v14 = vsel %vm5_vm0, %v1503_v9, %v1502_v8  ;;  %v1513_v24 = vld [vmem:[%s3303_s0 + $0x46] sm:$0x1]   ;;  %vm92_vm6 = vcmask 1023952   ;;  %vm124_vm7 = vcmask 999352   ;;  %s1905_s7 = smov 82  }
  0x25   :  { %v1514_v25 = vld [vmem:[%s3303_s0 + $0xc5] sm:$0x2]   ;;  %vm156_vm8 = vcmask 974752   ;;  %v1519_v31 = vld [vmem:[%s3303_s0 + $0xef] sm:$0x2]   ;;  %vm50_vm9 = vcmask 1048560  }
  0x26   :  { %v1524_v33 = vld [vmem:[%s3303_s0 + $0x1a] sm:$0x1]   ;;  %vm82_vm10 = vcmask 1032152   ;;  %v1521_v36 = vld [vmem:[%s3303_s0 + $0x45] sm:$0x1]   ;;  %vm71_vm11 = vcmask 1040352  }
  0x27   :  { %165 = vrot.lane.b32.xlu0 %v164_v49, %s1872_s29  ;;  %v1486_v49 = vld [vmem:[%s3303_s0 + $0x74] sm:$0x1]   ;;  %v1525_v34 = vld [vmem:[%s3303_s0 + $0x99] sm:$0x2]   ;;  %vm188_vm12 = vcmask 950152   ;;  %vm114_vm13 = vcmask 1007552  }
  0x28   :  { %186 = vrot.lane.b32.xlu2 %v185_v56, %s1873_s9  ;;  %v1490_v56 = vld [vmem:[%s3303_s0 + $0xc8] sm:$0x2]   ;;  %v1526_v42 = vld [vmem:[%s3303_s0 + $0x6f] sm:$0x1]   ;;  %vm103_vm14 = vcmask 1015752   ;;  %vm220_vm15 = vcmask 925552  }
  0x29   :  { %v420_v60 = vsel %vm5_vm0, %v1490_v56, %v1489_v55  ;;  %v1527_v43 = vld [vmem:[%s3303_s0 + $0xee] sm:$0x2]   ;;  %v1529_v44 = vld [vmem:[%s3303_s0 + $0x44] sm:$0x1]   ;;  %v1535_v55 = vld [vmem:[%s3303_s0 + $0xed] sm:$0x2]  }
  0x2a   :  { %v1537_v56 = vld [vmem:[%s3303_s0 + $0x43] sm:$0x1]   ;;  %v1546_v9 = vld [vmem:[%s3303_s0 + $0xc1] sm:$0x2]   ;;  %s1917_s8 = smov 70   ;;  %s1918_s23 = smov 68  }
  0x2b   :  { %s1920_s29 = smov 67   ;;  %s1923_s21 = smov 64  }
  0x2c   :  { %208 = vrot.lane.b32.xlu1 %v207_v57, %s1874_s10  ;;  %s1879_s10 = smov 107   ;;  %v409_v57 = vsel %vm5_vm0, %v1487_v50, %v1486_v49  ;;  %v1530_v49 = vld [vmem:[%s3303_s0 + $0xc3] sm:$0x2]   ;;  %v569_v50 = vsel %vm5_vm0, %v1527_v43, %v1526_v42  ;;  %v1572_v42 = vld [vmem:[%s3303_s0 + $0x14] sm:$0x1]   ;;  %s1927_s28 = smov 59  }
  0x2d   :  { %v580_v52 = vsel %vm5_vm0, %v1530_v49, %v1529_v44  ;;  %v1573_v43 = vld [vmem:[%s3303_s0 + $0x93] sm:$0x2]   ;;  %s1945_s9 = smov 41   ;;  %s1951_s22 = smov 35  }
  0x2e   :  { %s1954_s14 = smov 32  }
  0x2f   :  { %197 = vrot.lane.b32.xlu0 %v196_v58, %s1875_s15  ;;  %v6_v58 = vsel %vm5_vm0, %v1386_v54, %v2_v53  ;;  %v1534_v54 = vld [vmem:[%s3303_s0 + $0x6e] sm:$0x1]   ;;  %s1921_s15 = smov 65  }
  0x30   :  { %218 = vrot.lane.b32.xlu2 %v217_v1, %s1876_s24  ;;  %8 = vst.msk [vmem:[%s3304_s1] ss:$3 sm:$0x3] %vm7_vm3, %v6_v58   ;;  %v1501_v1 = vld [vmem:[%s3303_s0 + $0x9c] sm:$0x2]   ;;  %s1906_s24 = smov 80   ;;  %v601_v62 = vsel %vm5_vm0, %v1535_v55, %v1534_v54 }
  0x31   :  { %v463_v5 = vsel %vm5_vm0, %v1501_v1, %v1500_v0  ;;  %v1540_v58 = vld [vmem:[%s3303_s0 + $0x18] sm:$0x1]   ;;  %vm252_vm3 = vcmask 900952   ;;  %v1580_v54 = vld [vmem:[%s3303_s0 + $0x13] sm:$0x1]  }
  0x32   :  { %v1581_v55 = vld [vmem:[%s3303_s0 + $0x92] sm:$0x2]  }
  0x34   :  { %240 = vrot.lane.b32.xlu1 %v239_v2, %s1877_s25  ;;  %s1882_s25 = smov 104   ;;  %v1497_v2 = vld [vmem:[%s3303_s0 + $0x48] sm:$0x1]  }
  0x37   :  { %229 = vrot.lane.b32.xlu0 %v228_v3, %s1878_s30  ;;  %v1498_v3 = vld [vmem:[%s3303_s0 + $0xc7] sm:$0x2]   ;;  %s1948_s30 = smov 38  }
  0x38   :  { %250 = vrot.lane.b32.xlu2 %v249_v10, %s1879_s10  ;;  %s1896_s10 = smov 91   ;;  %v452_v6 = vsel %vm5_vm0, %v1498_v3, %v1497_v2  ;;  %v1508_v10 = vld [vmem:[%s3303_s0 + $0x1c] sm:$0x1]   ;;  %v1542_v2 = vld [vmem:[%s3303_s0 + $0x6d] sm:$0x1]  }
  0x39   :  { %v1543_v3 = vld [vmem:[%s3303_s0 + $0xec] sm:$0x2]  }
  0x3c   :  { %272 = vrot.lane.b32.xlu1 %v271_v11, %s1880_s11  ;;  %s1885_s11 = smov 101   ;;  %v1509_v11 = vld [vmem:[%s3303_s0 + $0x9b] sm:$0x2]  }
  0x3d   :  { %v495_v15 = vsel %vm5_vm0, %v1509_v11, %v1508_v10  ;;  %v633_v10 = vsel %vm5_vm0, %v1543_v3, %v1542_v2  ;;  %v1588_v2 = vld [vmem:[%s3303_s0 + $0x12] sm:$0x1]  }
  0x3e   :  { %v1589_v3 = vld [vmem:[%s3303_s0 + $0x91] sm:$0x2]  }
  0x3f   :  { %261 = vrot.lane.b32.xlu0 %v260_v12, %s1881_s16  ;;  %v1505_v12 = vld [vmem:[%s3303_s0 + $0x47] sm:$0x1]   ;;  %s1914_s16 = smov 73  }
  0x40   :  { %282 = vrot.lane.b32.xlu2 %v281_v19, %s1882_s25  ;;  %s1899_s25 = smov 88   ;;  %v484_v16 = vsel %vm5_vm0, %v1506_v13, %v1505_v12  ;;  %v1511_v19 = vld [vmem:[%s3303_s0 + $0xf0] sm:$0x2]  }
  0x41   :  { %v505_v26 = vsel %vm5_vm0, %v1511_v19, %v1510_v18  ;;  %v1556_v18 = vld [vmem:[%s3303_s0 + $0x16] sm:$0x1]  }
  0x42   :  { %v1557_v19 = vld [vmem:[%s3303_s0 + $0x95] sm:$0x2]  }
  0x44   :  { %304 = vrot.lane.b32.xlu1 %v303_v20, %s1883_s26  ;;  %s1888_s26 = smov 98  }
  0x47   :  { %293 = vrot.lane.b32.xlu0 %v292_v21, %s1884_s2  ;;  %v1516_v21 = vld [vmem:[%s3303_s0 + $0x1b] sm:$0x1]   ;;  %s1904_s2 = smov 81  }
  0x48   :  { %314 = vrot.lane.b32.xlu2 %v313_v28, %s1885_s11  ;;  %s1902_s11 = smov 85   ;;  %v527_v27 = vsel %vm5_vm0, %v1517_v22, %v1516_v21  ;;  %v516_v28 = vsel %vm5_vm0, %v1514_v25, %v1513_v24  ;;  %v1554_v21 = vld [vmem:[%s3303_s0 + $0xc0] sm:$0x2]  }
  0x4c   :  { %336 = vrot.lane.b32.xlu1 %v335_v29, %s1886_s12  ;;  %s1891_s12 = smov 95   ;;  %v1518_v29 = vld [vmem:[%s3303_s0 + $0x70] sm:$0x1]  }
  0x4f   :  { %325 = vrot.lane.b32.xlu0 %v324_v30, %s1887_s17  ;;  %s1942_s17 = smov 44  }
  0x50   :  { %346 = vrot.lane.b32.xlu2 %v345_v37, %s1888_s26  ;;  %s1903_s26 = smov 83   ;;  %v1522_v37 = vld [vmem:[%s3303_s0 + $0xc4] sm:$0x2]  }
  0x51   :  { %v548_v40 = vsel %vm5_vm0, %v1522_v37, %v1521_v36 }
  0x54   :  { %368 = vrot.lane.b32.xlu1 %v367_v38, %s1889_s27  ;;  %v537_v38 = vsel %vm5_vm0, %v1519_v31, %v1518_v29  ;;  %s1907_s27 = smov 78   ;;  %v1565_v31 = vld [vmem:[%s3303_s0 + $0x94] sm:$0x2]  }
  0x57   :  { %357 = vrot.lane.b32.xlu0 %v356_v39, %s1890_s3  ;;  %v559_v39 = vsel %vm5_vm0, %v1525_v34, %v1524_v33  ;;  %s1908_s3 = smov 79   ;;  %v1562_v33 = vld [vmem:[%s3303_s0 + $0xbf] sm:$0x2]  }
  0x58   :  { %378 = vrot.lane.b32.xlu2 %v377_v46, %s1891_s12  ;;  %v1532_v46 = vld [vmem:[%s3303_s0 + $0x19] sm:$0x1]   ;;  %s1933_s12 = smov 53  }
  0x5c   :  { %400 = vrot.lane.b32.xlu1 %v399_v47, %s1892_s13  ;;  %v1533_v47 = vld [vmem:[%s3303_s0 + $0x98] sm:$0x2]   ;;  %s1926_s13 = smov 61  }
  0x5d   :  { %v591_v51 = vsel %vm5_vm0, %v1533_v47, %v1532_v46  ;;  %v751_v47 = vsel %vm5_vm0, %v1573_v43, %v1572_v42 }
  0x5f   :  { %389 = vrot.lane.b32.xlu0 %v388_v48, %s1893_s18  ;;  %s1909_s18 = smov 77  }
  0x60   :  { %410 = vrot.lane.b32.xlu2 %v409_v57, %s1894_s4  ;;  %s1936_s4 = smov 50  }
  0x62   :  { %v2288_v61 = vpop.permute.xlu2 %80  }
  0x64   :  { %432 = vrot.lane.b32.xlu1 %v431_v59, %s1895_s5  ;;  %s1900_s5 = smov 86   ;;  %v1541_v59 = vld [vmem:[%s3303_s0 + $0x97] sm:$0x2]  }
  0x65   :  { %v623_v63 = vsel %vm5_vm0, %v1541_v59, %v1540_v58  ;;  %v783_v59 = vsel %vm5_vm0, %v1581_v55, %v1580_v54 }
  0x67   :  { %421 = vrot.lane.b32.xlu0 %v420_v60, %s1896_s10  ;;  %s1912_s10 = smov 74  }
  0x68   :  { %442 = vrot.lane.b32.xlu2 %v441_v4, %s1897_s19  ;;  %s1910_s19 = smov 75   ;;  %v1545_v4 = vld [vmem:[%s3303_s0 + $0x42] sm:$0x1]  }
  0x69   :  { %v644_v12 = vsel %vm5_vm0, %v1546_v9, %v1545_v4 }
  0x6a   :  { %v91_v7 = vpop.permute.xlu2 %90  }
  0x6c   :  { %464 = vrot.lane.b32.xlu1 %v463_v5, %s1898_s20  ;;  %s1930_s20 = smov 56  }
  0x6f   :  { %453 = vrot.lane.b32.xlu0 %v452_v6, %s1899_s25  ;;  %v1548_v6 = vld [vmem:[%s3303_s0 + $0x17] sm:$0x1]   ;;  %s1939_s25 = smov 47  }
  0x70   :  { %474 = vrot.lane.b32.xlu2 %v473_v14, %s1900_s5  ;;  %v1550_v14 = vld [vmem:[%s3303_s0 + $0x6c] sm:$0x1]   ;;  %s1929_s5 = smov 58  }
  0x72   :  { %v123_v17 = vpop.permute.xlu2 %122  }
  0x74   :  { %496 = vrot.lane.b32.xlu1 %v495_v15, %s1901_s6  ;;  %v1551_v15 = vld [vmem:[%s3303_s0 + $0xeb] sm:$0x2]   ;;  %s1957_s6 = smov 29  }
  0x75   :  { %v665_v22 = vsel %vm5_vm0, %v1551_v15, %v1550_v14  ;;  %v1596_v14 = vld [vmem:[%s3303_s0 + $0x11] sm:$0x1]  }
  0x76   :  { %v59_v20 = vpop.permute.xlu1 %58   ;;  %v1597_v15 = vld [vmem:[%s3303_s0 + $0x90] sm:$0x2]  }
  0x77   :  { %485 = vrot.lane.b32.xlu0 %v484_v16, %s1902_s11  ;;  %s1913_s11 = smov 72   ;;  %v1553_v16 = vld [vmem:[%s3303_s0 + $0x41] sm:$0x1]  }
  0x78   :  { %506 = vrot.lane.b32.xlu2 %v505_v26, %s1903_s26  ;;  %v676_v24 = vsel %vm5_vm0, %v1554_v21, %v1553_v16  ;;  %v1558_v26 = vld [vmem:[%s3303_s0 + $0x6b] sm:$0x1]   ;;  %s1932_s26 = smov 55  }
  0x79   :  { %v24_v23 = vpop.permute.xlu0 %23  }
  0x7a   :  { %1391 = vst.msk [vmem:[%s3304_s1 + $0x2] ss:$3 sm:$0x3] %vm25_vm2, %v24_v23   ;;  %v155_v30 = vpop.permute.xlu2 %154   ;;  %vm135_vm2 = vcmask 991152  }
  0x7b   :  { %1392 = vst.msk [vmem:[%s3304_s1 + $0x1] ss:$3 sm:$0x3] %vm28_vm4, %v24_v23   ;;  %vm178_vm4 = vcmask 958352   ;;  %v687_v23 = vsel %vm5_vm0, %v1557_v19, %v1556_v18  ;;  %v847_v19 = vsel %vm5_vm0, %v1597_v15, %v1596_v14 }
  0x7c   :  { %1400 = vst.msk [vmem:[%s3304_s1 + $0x2] ss:$3 sm:$0x3] %vm60_vm5, %v59_v20   ;;  %528 = vrot.lane.b32.xlu1 %v527_v27, %s1904_s2  ;;  %vm167_vm5 = vcmask 966552   ;;  %s1915_s2 = smov 71  }
  0x7d   :  { %1408 = vst.msk [vmem:[%s3304_s1 + $0x2] ss:$3 sm:$0x3] %vm92_vm6, %v91_v7   ;;  %v1549_v7 = vld [vmem:[%s3303_s0 + $0x96] sm:$0x2]   ;;  %vm284_vm6 = vcmask 876352  }
  0x7e   :  { %1416 = vst.msk [vmem:[%s3304_s1 + $0x2] ss:$3 sm:$0x3] %vm124_vm7, %v123_v17   ;;  %v70_v32 = vpop.permute.xlu1 %69   ;;  %v655_v11 = vsel %vm5_vm0, %v1549_v7, %v1548_v6  ;;  %vm210_vm7 = vcmask 933752   ;;  %v1559_v27 = vld [vmem:[%s3303_s0 + $0xea] sm:$0x2]   ;;  %v815_v7 = vsel %vm5_vm0, %v1589_v3, %v1588_v2 }
  0x7f   :  { %517 = vrot.lane.b32.xlu0 %v516_v28, %s1905_s7  ;;  %1424 = vst.msk [vmem:[%s3304_s1 + $0x2] ss:$3 sm:$0x3] %vm156_vm8, %v155_v30   ;;  %vm199_vm8 = vcmask 941952   ;;  %v1561_v28 = vld [vmem:[%s3303_s0 + $0x40] sm:$0x1]   ;;  %v697_v34 = vsel %vm5_vm0, %v1559_v27, %v1558_v26 }
  0x80   :  { %538 = vrot.lane.b32.xlu2 %v537_v38, %s1906_s24  ;;  %s1911_s24 = smov 76   ;;  %v1564_v30 = vld [vmem:[%s3303_s0 + $0x15] sm:$0x1]   ;;  %v708_v36 = vsel %vm5_vm0, %v1562_v33, %v1561_v28  ;;  %v1566_v38 = vld [vmem:[%s3303_s0 + $0x6a] sm:$0x1]   ;;  %s1924_s7 = smov 62  }
  0x81   :  { %v46_v35 = vpop.permute.xlu0 %45   ;;  %v1604_v26 = vld [vmem:[%s3303_s0 + $0x10] sm:$0x1]  }
  0x82   :  { %1397 = vst.msk [vmem:[%s3304_s1 + $0x1] ss:$3 sm:$0x3] %vm21_vm1, %v46_v35   ;;  %v187_v41 = vpop.permute.xlu2 %186   ;;  %vm146_vm1 = vcmask 982952   ;;  %v1605_v27 = vld [vmem:[%s3303_s0 + $0x8f] sm:$0x2]  }
  0x83   :  { %51 = vst.msk [vmem:[%s3304_s1] ss:$3 sm:$0x3] %vm50_vm9, %v46_v35   ;;  %vm316_vm9 = vcmask 851752   ;;  %v719_v35 = vsel %vm5_vm0, %v1565_v31, %v1564_v30  ;;  %v879_v31 = vsel %vm5_vm0, %v1605_v27, %v1604_v26 }
  0x84   :  { %83 = vst.msk [vmem:[%s3304_s1] ss:$3 sm:$0x3] %vm82_vm10, %v2288_v61   ;;  %560 = vrot.lane.b32.xlu1 %v559_v39, %s1907_s27  ;;  %v1538_v61 = vld [vmem:[%s3303_s0 + $0xc2] sm:$0x2]   ;;  %vm242_vm10 = vcmask 909152  }
  0x85   :  { %1403 = vst.msk [vmem:[%s3304_s1 + $0x1] ss:$3 sm:$0x3] %vm71_vm11, %v70_v32   ;;  %v612_v0 = vsel %vm5_vm0, %v1538_v61, %v1537_v56  ;;  %vm231_vm11 = vcmask 917352   ;;  %v1567_v39 = vld [vmem:[%s3303_s0 + $0xe9] sm:$0x2]  }
  0x86   :  { %1432 = vst.msk [vmem:[%s3304_s1 + $0x2] ss:$3 sm:$0x3] %vm188_vm12, %v187_v41   ;;  %v113_v45 = vpop.permute.xlu1 %112   ;;  %vm348_vm12 = vcmask 827152   ;;  %v729_v46 = vsel %vm5_vm0, %v1567_v39, %v1566_v38  ;;  %v1612_v38 = vld [vmem:[%s3303_s0 + $0xf] sm:$0x1]  }
  0x87   :  { %549 = vrot.lane.b32.xlu0 %v548_v40, %s1908_s3  ;;  %115 = vst.msk [vmem:[%s3304_s1] ss:$3 sm:$0x3] %vm114_vm13, %v113_v45   ;;  %s1916_s3 = smov 69   ;;  %vm274_vm13 = vcmask 884552   ;;  %s1960_s27 = smov 26  }
  0x88   :  { %570 = vrot.lane.b32.xlu2 %v569_v50, %s1909_s18  ;;  %v1569_v40 = vld [vmem:[%s3303_s0 + $0x3f] sm:$0x1]   ;;  %v1574_v50 = vld [vmem:[%s3303_s0 + $0x69] sm:$0x1]   ;;  %s1935_s18 = smov 52  }
  0x89   :  { %v102_v48 = vpop.permute.xlu0 %101   ;;  %v1570_v45 = vld [vmem:[%s3303_s0 + $0xbe] sm:$0x2]   ;;  %v1613_v39 = vld [vmem:[%s3303_s0 + $0x8e] sm:$0x2]  }
  0x8a   :  { %1411 = vst.msk [vmem:[%s3304_s1 + $0x1] ss:$3 sm:$0x3] %vm103_vm14, %v102_v48   ;;  %v219_v53 = vpop.permute.xlu2 %218   ;;  %vm263_vm14 = vcmask 892752   ;;  %v740_v48 = vsel %vm5_vm0, %v1570_v45, %v1569_v40  ;;  %v911_v43 = vsel %vm5_vm0, %v1613_v39, %v1612_v38 }
  0x8b   :  { %1440 = vst.msk [vmem:[%s3304_s1 + $0x2] ss:$3 sm:$0x3] %vm220_vm15, %v219_v53   ;;  %vm380_vm15 = vcmask 802552  }
  0x8c   :  { %592 = vrot.lane.b32.xlu1 %v591_v51, %s1910_s19  ;;  %v1575_v51 = vld [vmem:[%s3303_s0 + $0xe8] sm:$0x2]   ;;  %s1963_s19 = smov 23  }
  0x8d   :  { %v761_v58 = vsel %vm5_vm0, %v1575_v51, %v1574_v50  ;;  %v1620_v50 = vld [vmem:[%s3303_s0 + $0xe] sm:$0x1]  }
  0x8e   :  { %v145_v57 = vpop.permute.xlu1 %144   ;;  %v1621_v51 = vld [vmem:[%s3303_s0 + $0x8d] sm:$0x2]  }
  0x8f   :  { %581 = vrot.lane.b32.xlu0 %v580_v52, %s1911_s24  ;;  %147 = vst.msk [vmem:[%s3304_s1] ss:$3 sm:$0x3] %vm146_vm1, %v145_v57   ;;  %s1919_s24 = smov 66   ;;  %vm306_vm1 = vcmask 859952   ;;  %v943_v55 = vsel %vm5_vm0, %v1621_v51, %v1620_v50 }
  0x90   :  { %602 = vrot.lane.b32.xlu2 %v601_v62, %s1912_s10  ;;  %v1577_v52 = vld [vmem:[%s3303_s0 + $0x3e] sm:$0x1]   ;;  %v1582_v62 = vld [vmem:[%s3303_s0 + $0x68] sm:$0x1]   ;;  %s1938_s10 = smov 49  }
  0x91   :  { %v134_v60 = vpop.permute.xlu0 %133   ;;  %v1578_v57 = vld [vmem:[%s3303_s0 + $0xbd] sm:$0x2]  }
  0x92   :  { %1419 = vst.msk [vmem:[%s3304_s1 + $0x1] ss:$3 sm:$0x3] %vm135_vm2, %v134_v60   ;;  %v251_v1 = vpop.permute.xlu2 %250   ;;  %vm295_vm2 = vcmask 868152   ;;  %v772_v60 = vsel %vm5_vm0, %v1578_v57, %v1577_v52 }
  0x93   :  { %1448 = vst.msk [vmem:[%s3304_s1 + $0x2] ss:$3 sm:$0x3] %vm252_vm3, %v251_v1   ;;  %vm412_vm3 = vcmask 777952  }
  0x94   :  { %624 = vrot.lane.b32.xlu1 %v623_v63, %s1913_s11  ;;  %v1583_v63 = vld [vmem:[%s3303_s0 + $0xe7] sm:$0x2]   ;;  %s1966_s11 = smov 20  }
  0x95   :  { %v793_v6 = vsel %vm5_vm0, %v1583_v63, %v1582_v62  ;;  %v1628_v62 = vld [vmem:[%s3303_s0 + $0xd] sm:$0x1]  }
  0x96   :  { %v177_v5 = vpop.permute.xlu1 %176   ;;  %v1629_v63 = vld [vmem:[%s3303_s0 + $0x8c] sm:$0x2]  }
  0x97   :  { %613 = vrot.lane.b32.xlu0 %v612_v0, %s1914_s16  ;;  %179 = vst.msk [vmem:[%s3304_s1] ss:$3 sm:$0x3] %vm178_vm4, %v177_v5   ;;  %s1922_s16 = smov 63   ;;  %vm338_vm4 = vcmask 835352   ;;  %v975_v3 = vsel %vm5_vm0, %v1629_v63, %v1628_v62 }
  0x98   :  { %634 = vrot.lane.b32.xlu2 %v633_v10, %s1915_s2  ;;  %v1585_v0 = vld [vmem:[%s3303_s0 + $0x3d] sm:$0x1]   ;;  %v1590_v10 = vld [vmem:[%s3303_s0 + $0x67] sm:$0x1]   ;;  %s1941_s2 = smov 46  }
  0x99   :  { %v166_v8 = vpop.permute.xlu0 %165   ;;  %v1586_v5 = vld [vmem:[%s3303_s0 + $0xbc] sm:$0x2]  }
  0x9a   :  { %1427 = vst.msk [vmem:[%s3304_s1 + $0x1] ss:$3 sm:$0x3] %vm167_vm5, %v166_v8   ;;  %v283_v13 = vpop.permute.xlu2 %282   ;;  %vm327_vm5 = vcmask 843552   ;;  %v804_v8 = vsel %vm5_vm0, %v1586_v5, %v1585_v0 }
  0x9b   :  { %1456 = vst.msk [vmem:[%s3304_s1 + $0x2] ss:$3 sm:$0x3] %vm284_vm6, %v283_v13   ;;  %vm444_vm6 = vcmask 753352  }
  0x9c   :  { %656 = vrot.lane.b32.xlu1 %v655_v11, %s1916_s3  ;;  %v1591_v11 = vld [vmem:[%s3303_s0 + $0xe6] sm:$0x2]   ;;  %s1969_s3 = smov 17  }
  0x9d   :  { %v825_v18 = vsel %vm5_vm0, %v1591_v11, %v1590_v10  ;;  %v1636_v10 = vld [vmem:[%s3303_s0 + $0xc] sm:$0x1]  }
  0x9e   :  { %v209_v17 = vpop.permute.xlu1 %208   ;;  %v1637_v11 = vld [vmem:[%s3303_s0 + $0x8b] sm:$0x2]  }
  0x9f   :  { %645 = vrot.lane.b32.xlu0 %v644_v12, %s1917_s8  ;;  %211 = vst.msk [vmem:[%s3304_s1] ss:$3 sm:$0x3] %vm210_vm7, %v209_v17   ;;  %s1925_s8 = smov 60   ;;  %vm370_vm7 = vcmask 810752   ;;  %v1007_v15 = vsel %vm5_vm0, %v1637_v11, %v1636_v10 }
  0xa0   :  { %666 = vrot.lane.b32.xlu2 %v665_v22, %s1918_s23  ;;  %v1593_v12 = vld [vmem:[%s3303_s0 + $0x3c] sm:$0x1]   ;;  %v1598_v22 = vld [vmem:[%s3303_s0 + $0x66] sm:$0x1]   ;;  %s1944_s23 = smov 43  }
  0xa1   :  { %v198_v20 = vpop.permute.xlu0 %197   ;;  %v1594_v17 = vld [vmem:[%s3303_s0 + $0xbb] sm:$0x2]  }
  0xa2   :  { %1435 = vst.msk [vmem:[%s3304_s1 + $0x1] ss:$3 sm:$0x3] %vm199_vm8, %v198_v20   ;;  %v315_v25 = vpop.permute.xlu2 %314   ;;  %vm359_vm8 = vcmask 818952   ;;  %v836_v20 = vsel %vm5_vm0, %v1594_v17, %v1593_v12 }
  0xa3   :  { %1464 = vst.msk [vmem:[%s3304_s1 + $0x2] ss:$3 sm:$0x3] %vm316_vm9, %v315_v25   ;;  %vm476_vm9 = vcmask 728752  }
  0xa4   :  { %688 = vrot.lane.b32.xlu1 %v687_v23, %s1919_s24  ;;  %v1599_v23 = vld [vmem:[%s3303_s0 + $0xe5] sm:$0x2]   ;;  %s1972_s24 = smov 14  }
  0xa5   :  { %v857_v30 = vsel %vm5_vm0, %v1599_v23, %v1598_v22  ;;  %v1644_v22 = vld [vmem:[%s3303_s0 + $0xb] sm:$0x1]  }
  0xa6   :  { %v241_v29 = vpop.permute.xlu1 %240   ;;  %v1645_v23 = vld [vmem:[%s3303_s0 + $0x8a] sm:$0x2]  }
  0xa7   :  { %677 = vrot.lane.b32.xlu0 %v676_v24, %s1920_s29  ;;  %243 = vst.msk [vmem:[%s3304_s1] ss:$3 sm:$0x3] %vm242_vm10, %v241_v29   ;;  %s1928_s29 = smov 57   ;;  %vm402_vm10 = vcmask 786152   ;;  %v1039_v27 = vsel %vm5_vm0, %v1645_v23, %v1644_v22 }
  0xa8   :  { %698 = vrot.lane.b32.xlu2 %v697_v34, %s1921_s15  ;;  %v1601_v24 = vld [vmem:[%s3303_s0 + $0x3b] sm:$0x1]   ;;  %v1606_v34 = vld [vmem:[%s3303_s0 + $0x65] sm:$0x1]   ;;  %s1947_s15 = smov 40  }
  0xa9   :  { %v230_v32 = vpop.permute.xlu0 %229   ;;  %v1602_v29 = vld [vmem:[%s3303_s0 + $0xba] sm:$0x2]  }
  0xaa   :  { %1443 = vst.msk [vmem:[%s3304_s1 + $0x1] ss:$3 sm:$0x3] %vm231_vm11, %v230_v32   ;;  %v347_v37 = vpop.permute.xlu2 %346   ;;  %vm391_vm11 = vcmask 794352   ;;  %v868_v32 = vsel %vm5_vm0, %v1602_v29, %v1601_v24 }
  0xab   :  { %1472 = vst.msk [vmem:[%s3304_s1 + $0x2] ss:$3 sm:$0x3] %vm348_vm12, %v347_v37   ;;  %vm508_vm12 = vcmask 704152  }
  0xac   :  { %720 = vrot.lane.b32.xlu1 %v719_v35, %s1922_s16  ;;  %v1607_v35 = vld [vmem:[%s3303_s0 + $0xe4] sm:$0x2]   ;;  %s1975_s16 = smov 11  }
  0xad   :  { %v889_v42 = vsel %vm5_vm0, %v1607_v35, %v1606_v34  ;;  %v1652_v34 = vld [vmem:[%s3303_s0 + $0xa] sm:$0x1]  }
  0xae   :  { %v273_v41 = vpop.permute.xlu1 %272   ;;  %v1653_v35 = vld [vmem:[%s3303_s0 + $0x89] sm:$0x2]  }
  0xaf   :  { %709 = vrot.lane.b32.xlu0 %v708_v36, %s1923_s21  ;;  %275 = vst.msk [vmem:[%s3304_s1] ss:$3 sm:$0x3] %vm274_vm13, %v273_v41   ;;  %s1931_s21 = smov 54   ;;  %vm434_vm13 = vcmask 761552   ;;  %v1071_v39 = vsel %vm5_vm0, %v1653_v35, %v1652_v34 }
  0xb0   :  { %730 = vrot.lane.b32.xlu2 %v729_v46, %s1924_s7  ;;  %v1609_v36 = vld [vmem:[%s3303_s0 + $0x3a] sm:$0x1]   ;;  %v1614_v46 = vld [vmem:[%s3303_s0 + $0x64] sm:$0x1]   ;;  %s1950_s7 = smov 37  }
  0xb1   :  { %v262_v44 = vpop.permute.xlu0 %261   ;;  %v1610_v41 = vld [vmem:[%s3303_s0 + $0xb9] sm:$0x2]  }
  0xb2   :  { %1451 = vst.msk [vmem:[%s3304_s1 + $0x1] ss:$3 sm:$0x3] %vm263_vm14, %v262_v44   ;;  %v379_v49 = vpop.permute.xlu2 %378   ;;  %vm423_vm14 = vcmask 769752   ;;  %v900_v44 = vsel %vm5_vm0, %v1610_v41, %v1609_v36 }
  0xb3   :  { %1480 = vst.msk [vmem:[%s3304_s1 + $0x2] ss:$3 sm:$0x3] %vm380_vm15, %v379_v49   ;;  %vm540_vm15 = vcmask 679552  }
  0xb4   :  { %752 = vrot.lane.b32.xlu1 %v751_v47, %s1925_s8  ;;  %v1615_v47 = vld [vmem:[%s3303_s0 + $0xe3] sm:$0x2]   ;;  %s1978_s8 = smov 8  }
  0xb5   :  { %v921_v54 = vsel %vm5_vm0, %v1615_v47, %v1614_v46  ;;  %v1660_v46 = vld [vmem:[%s3303_s0 + $0x9] sm:$0x1]  }
  0xb6   :  { %v305_v53 = vpop.permute.xlu1 %304   ;;  %v1661_v47 = vld [vmem:[%s3303_s0 + $0x88] sm:$0x2]  }
  0xb7   :  { %741 = vrot.lane.b32.xlu0 %v740_v48, %s1926_s13  ;;  %307 = vst.msk [vmem:[%s3304_s1] ss:$3 sm:$0x3] %vm306_vm1, %v305_v53   ;;  %s1934_s13 = smov 51   ;;  %vm466_vm1 = vcmask 736952   ;;  %v1103_v51 = vsel %vm5_vm0, %v1661_v47, %v1660_v46 }
  0xb8   :  { %762 = vrot.lane.b32.xlu2 %v761_v58, %s1927_s28  ;;  %v1617_v48 = vld [vmem:[%s3303_s0 + $0x39] sm:$0x1]   ;;  %v1622_v58 = vld [vmem:[%s3303_s0 + $0x63] sm:$0x1]   ;;  %s1953_s28 = smov 34  }
  0xb9   :  { %v294_v56 = vpop.permute.xlu0 %293   ;;  %v1618_v53 = vld [vmem:[%s3303_s0 + $0xb8] sm:$0x2]  }
  0xba   :  { %1459 = vst.msk [vmem:[%s3304_s1 + $0x1] ss:$3 sm:$0x3] %vm295_vm2, %v294_v56   ;;  %v411_v61 = vpop.permute.xlu2 %410   ;;  %vm455_vm2 = vcmask 745152   ;;  %v932_v56 = vsel %vm5_vm0, %v1618_v53, %v1617_v48 }
  0xbb   :  { %1488 = vst.msk [vmem:[%s3304_s1 + $0x2] ss:$3 sm:$0x3] %vm412_vm3, %v411_v61   ;;  %vm572_vm3 = vcmask 654952  }
  0xbc   :  { %784 = vrot.lane.b32.xlu1 %v783_v59, %s1928_s29  ;;  %v1623_v59 = vld [vmem:[%s3303_s0 + $0xe2] sm:$0x2]   ;;  %s1981_s29 = smov 5  }
  0xbd   :  { %v953_v2 = vsel %vm5_vm0, %v1623_v59, %v1622_v58  ;;  %v1668_v58 = vld [vmem:[%s3303_s0 + $0x8] sm:$0x1]  }
  0xbe   :  { %v337_v1 = vpop.permute.xlu1 %336   ;;  %v1669_v59 = vld [vmem:[%s3303_s0 + $0x87] sm:$0x2]  }
  0xbf   :  { %773 = vrot.lane.b32.xlu0 %v772_v60, %s1929_s5  ;;  %339 = vst.msk [vmem:[%s3304_s1] ss:$3 sm:$0x3] %vm338_vm4, %v337_v1   ;;  %s1937_s5 = smov 48   ;;  %vm498_vm4 = vcmask 712352   ;;  %v1135_v63 = vsel %vm5_vm0, %v1669_v59, %v1668_v58 }
  0xc0   :  { %794 = vrot.lane.b32.xlu2 %v793_v6, %s1930_s20  ;;  %v1625_v60 = vld [vmem:[%s3303_s0 + $0x38] sm:$0x1]   ;;  %v1630_v6 = vld [vmem:[%s3303_s0 + $0x62] sm:$0x1]   ;;  %s1956_s20 = smov 31  }
  0xc1   :  { %v326_v4 = vpop.permute.xlu0 %325   ;;  %v1626_v1 = vld [vmem:[%s3303_s0 + $0xb7] sm:$0x2]  }
  0xc2   :  { %1467 = vst.msk [vmem:[%s3304_s1 + $0x1] ss:$3 sm:$0x3] %vm327_vm5, %v326_v4   ;;  %v443_v9 = vpop.permute.xlu2 %442   ;;  %vm487_vm5 = vcmask 720552   ;;  %v964_v4 = vsel %vm5_vm0, %v1626_v1, %v1625_v60 }
  0xc3   :  { %1496 = vst.msk [vmem:[%s3304_s1 + $0x2] ss:$3 sm:$0x3] %vm444_vm6, %v443_v9   ;;  %vm604_vm6 = vcmask 630352  }
  0xc4   :  { %816 = vrot.lane.b32.xlu1 %v815_v7, %s1931_s21  ;;  %v1631_v7 = vld [vmem:[%s3303_s0 + $0xe1] sm:$0x2]  }
  0xc5   :  { %v985_v14 = vsel %vm5_vm0, %v1631_v7, %v1630_v6  ;;  %v1676_v6 = vld [vmem:[%s3303_s0 + $0x7] sm:$0x1]  }
  0xc6   :  { %v369_v13 = vpop.permute.xlu1 %368   ;;  %v1677_v7 = vld [vmem:[%s3303_s0 + $0x86] sm:$0x2]  }
  0xc7   :  { %805 = vrot.lane.b32.xlu0 %v804_v8, %s1932_s26  ;;  %371 = vst.msk [vmem:[%s3304_s1] ss:$3 sm:$0x3] %vm370_vm7, %v369_v13   ;;  %s1940_s26 = smov 45   ;;  %vm530_vm7 = vcmask 687752   ;;  %v1167_v11 = vsel %vm5_vm0, %v1677_v7, %v1676_v6 }
  0xc8   :  { %826 = vrot.lane.b32.xlu2 %v825_v18, %s1933_s12  ;;  %v1633_v8 = vld [vmem:[%s3303_s0 + $0x37] sm:$0x1]   ;;  %v1638_v18 = vld [vmem:[%s3303_s0 + $0x61] sm:$0x1]   ;;  %s1959_s12 = smov 28  }
  0xc9   :  { %v358_v16 = vpop.permute.xlu0 %357   ;;  %v1634_v13 = vld [vmem:[%s3303_s0 + $0xb6] sm:$0x2]  }
  0xca   :  { %1475 = vst.msk [vmem:[%s3304_s1 + $0x1] ss:$3 sm:$0x3] %vm359_vm8, %v358_v16   ;;  %v475_v21 = vpop.permute.xlu2 %474   ;;  %vm519_vm8 = vcmask 695952   ;;  %v996_v16 = vsel %vm5_vm0, %v1634_v13, %v1633_v8 }
  0xcb   :  { %1504 = vst.msk [vmem:[%s3304_s1 + $0x2] ss:$3 sm:$0x3] %vm476_vm9, %v475_v21   ;;  %vm636_vm9 = vcmask 605752  }
  0xcc   :  { %848 = vrot.lane.b32.xlu1 %v847_v19, %s1934_s13  ;;  %v1639_v19 = vld [vmem:[%s3303_s0 + $0xe0] sm:$0x2]  }
  0xcd   :  { %v1017_v26 = vsel %vm5_vm0, %v1639_v19, %v1638_v18  ;;  %v1684_v18 = vld [vmem:[%s3303_s0 + $0x6] sm:$0x1]  }
  0xce   :  { %v401_v25 = vpop.permute.xlu1 %400   ;;  %v1685_v19 = vld [vmem:[%s3303_s0 + $0x85] sm:$0x2]  }
  0xcf   :  { %837 = vrot.lane.b32.xlu0 %v836_v20, %s1935_s18  ;;  %403 = vst.msk [vmem:[%s3304_s1] ss:$3 sm:$0x3] %vm402_vm10, %v401_v25   ;;  %s1943_s18 = smov 42   ;;  %vm562_vm10 = vcmask 663152   ;;  %v1199_v23 = vsel %vm5_vm0, %v1685_v19, %v1684_v18 }
  0xd0   :  { %858 = vrot.lane.b32.xlu2 %v857_v30, %s1936_s4  ;;  %v1641_v20 = vld [vmem:[%s3303_s0 + $0x36] sm:$0x1]   ;;  %v1646_v30 = vld [vmem:[%s3303_s0 + $0x60] sm:$0x1]   ;;  %s1962_s4 = smov 25  }
  0xd1   :  { %v390_v28 = vpop.permute.xlu0 %389   ;;  %v1642_v25 = vld [vmem:[%s3303_s0 + $0xb5] sm:$0x2]  }
  0xd2   :  { %1483 = vst.msk [vmem:[%s3304_s1 + $0x1] ss:$3 sm:$0x3] %vm391_vm11, %v390_v28   ;;  %v507_v33 = vpop.permute.xlu2 %506   ;;  %vm551_vm11 = vcmask 671352   ;;  %v1028_v28 = vsel %vm5_vm0, %v1642_v25, %v1641_v20 }
  0xd3   :  { %1512 = vst.msk [vmem:[%s3304_s1 + $0x2] ss:$3 sm:$0x3] %vm508_vm12, %v507_v33   ;;  %vm668_vm12 = vcmask 581152  }
  0xd4   :  { %880 = vrot.lane.b32.xlu1 %v879_v31, %s1937_s5  ;;  %v1647_v31 = vld [vmem:[%s3303_s0 + $0xdf] sm:$0x2]  }
  0xd5   :  { %v1049_v38 = vsel %vm5_vm0, %v1647_v31, %v1646_v30  ;;  %v1692_v30 = vld [vmem:[%s3303_s0 + $0x5] sm:$0x1]  }
  0xd6   :  { %v433_v37 = vpop.permute.xlu1 %432   ;;  %v1693_v31 = vld [vmem:[%s3303_s0 + $0x84] sm:$0x2]  }
  0xd7   :  { %869 = vrot.lane.b32.xlu0 %v868_v32, %s1938_s10  ;;  %435 = vst.msk [vmem:[%s3304_s1] ss:$3 sm:$0x3] %vm434_vm13, %v433_v37   ;;  %s1946_s10 = smov 39   ;;  %vm594_vm13 = vcmask 638552   ;;  %v1231_v35 = vsel %vm5_vm0, %v1693_v31, %v1692_v30 }
  0xd8   :  { %890 = vrot.lane.b32.xlu2 %v889_v42, %s1939_s25  ;;  %v1649_v32 = vld [vmem:[%s3303_s0 + $0x35] sm:$0x1]   ;;  %v1654_v42 = vld [vmem:[%s3303_s0 + $0x5f] sm:$0x1]   ;;  %s1965_s25 = smov 22  }
  0xd9   :  { %v422_v40 = vpop.permute.xlu0 %421   ;;  %v1650_v37 = vld [vmem:[%s3303_s0 + $0xb4] sm:$0x2]  }
  0xda   :  { %1491 = vst.msk [vmem:[%s3304_s1 + $0x1] ss:$3 sm:$0x3] %vm423_vm14, %v422_v40   ;;  %v539_v45 = vpop.permute.xlu2 %538   ;;  %vm583_vm14 = vcmask 646752   ;;  %v1060_v40 = vsel %vm5_vm0, %v1650_v37, %v1649_v32 }
  0xdb   :  { %1520 = vst.msk [vmem:[%s3304_s1 + $0x2] ss:$3 sm:$0x3] %vm540_vm15, %v539_v45   ;;  %vm700_vm15 = vcmask 556552  }
  0xdc   :  { %912 = vrot.lane.b32.xlu1 %v911_v43, %s1940_s26  ;;  %v1655_v43 = vld [vmem:[%s3303_s0 + $0xde] sm:$0x2]  }
  0xdd   :  { %v1081_v50 = vsel %vm5_vm0, %v1655_v43, %v1654_v42  ;;  %v1700_v42 = vld [vmem:[%s3303_s0 + $0x4] sm:$0x1]  }
  0xde   :  { %v465_v49 = vpop.permute.xlu1 %464   ;;  %v1701_v43 = vld [vmem:[%s3303_s0 + $0x83] sm:$0x2]  }
  0xdf   :  { %901 = vrot.lane.b32.xlu0 %v900_v44, %s1941_s2  ;;  %467 = vst.msk [vmem:[%s3304_s1] ss:$3 sm:$0x3] %vm466_vm1, %v465_v49   ;;  %s1949_s2 = smov 36   ;;  %vm626_vm1 = vcmask 613952   ;;  %v1263_v47 = vsel %vm5_vm0, %v1701_v43, %v1700_v42 }
  0xe0   :  { %922 = vrot.lane.b32.xlu2 %v921_v54, %s1942_s17  ;;  %v1657_v44 = vld [vmem:[%s3303_s0 + $0x34] sm:$0x1]   ;;  %v1662_v54 = vld [vmem:[%s3303_s0 + $0x5e] sm:$0x1]   ;;  %s1968_s17 = smov 19  }
  0xe1   :  { %v454_v52 = vpop.permute.xlu0 %453   ;;  %v1658_v49 = vld [vmem:[%s3303_s0 + $0xb3] sm:$0x2]  }
  0xe2   :  { %1499 = vst.msk [vmem:[%s3304_s1 + $0x1] ss:$3 sm:$0x3] %vm455_vm2, %v454_v52   ;;  %v571_v57 = vpop.permute.xlu2 %570   ;;  %vm615_vm2 = vcmask 622152   ;;  %v1092_v52 = vsel %vm5_vm0, %v1658_v49, %v1657_v44 }
  0xe3   :  { %1528 = vst.msk [vmem:[%s3304_s1 + $0x2] ss:$3 sm:$0x3] %vm572_vm3, %v571_v57   ;;  %vm732_vm3 = vcmask 531952  }
  0xe4   :  { %944 = vrot.lane.b32.xlu1 %v943_v55, %s1943_s18  ;;  %v1663_v55 = vld [vmem:[%s3303_s0 + $0xdd] sm:$0x2]  }
  0xe5   :  { %v1113_v62 = vsel %vm5_vm0, %v1663_v55, %v1662_v54  ;;  %v1708_v54 = vld [vmem:[%s3303_s0 + $0x3] sm:$0x1]  }
  0xe6   :  { %v497_v61 = vpop.permute.xlu1 %496   ;;  %v1709_v55 = vld [vmem:[%s3303_s0 + $0x82] sm:$0x2]  }
  0xe7   :  { %933 = vrot.lane.b32.xlu0 %v932_v56, %s1944_s23  ;;  %499 = vst.msk [vmem:[%s3304_s1] ss:$3 sm:$0x3] %vm498_vm4, %v497_v61   ;;  %s1952_s23 = smov 33   ;;  %vm658_vm4 = vcmask 589352   ;;  %v1295_v59 = vsel %vm5_vm0, %v1709_v55, %v1708_v54 }
  0xe8   :  { %954 = vrot.lane.b32.xlu2 %v953_v2, %s1945_s9  ;;  %v1665_v56 = vld [vmem:[%s3303_s0 + $0x33] sm:$0x1]   ;;  %v1670_v2 = vld [vmem:[%s3303_s0 + $0x5d] sm:$0x1]   ;;  %s1971_s9 = smov 16  }
  0xe9   :  { %v486_v0 = vpop.permute.xlu0 %485   ;;  %v1666_v61 = vld [vmem:[%s3303_s0 + $0xb2] sm:$0x2]  }
  0xea   :  { %1507 = vst.msk [vmem:[%s3304_s1 + $0x1] ss:$3 sm:$0x3] %vm487_vm5, %v486_v0   ;;  %v603_v5 = vpop.permute.xlu2 %602   ;;  %vm647_vm5 = vcmask 597552   ;;  %v1124_v0 = vsel %vm5_vm0, %v1666_v61, %v1665_v56 }
  0xeb   :  { %1536 = vst.msk [vmem:[%s3304_s1 + $0x2] ss:$3 sm:$0x3] %vm604_vm6, %v603_v5   ;;  %vm764_vm6 = vcmask 507352  }
  0xec   :  { %976 = vrot.lane.b32.xlu1 %v975_v3, %s1946_s10  ;;  %v1671_v3 = vld [vmem:[%s3303_s0 + $0xdc] sm:$0x2]  }
  0xed   :  { %v1145_v10 = vsel %vm5_vm0, %v1671_v3, %v1670_v2  ;;  %v1716_v2 = vld [vmem:[%s3303_s0 + $0x2] sm:$0x1]  }
  0xee   :  { %v529_v9 = vpop.permute.xlu1 %528   ;;  %v1717_v3 = vld [vmem:[%s3303_s0 + $0x81] sm:$0x2]  }
  0xef   :  { %965 = vrot.lane.b32.xlu0 %v964_v4, %s1947_s15  ;;  %531 = vst.msk [vmem:[%s3304_s1] ss:$3 sm:$0x3] %vm530_vm7, %v529_v9   ;;  %s1955_s15 = smov 30   ;;  %vm690_vm7 = vcmask 564752   ;;  %v1327_v7 = vsel %vm5_vm0, %v1717_v3, %v1716_v2 }
  0xf0   :  { %986 = vrot.lane.b32.xlu2 %v985_v14, %s1948_s30  ;;  %v1673_v4 = vld [vmem:[%s3303_s0 + $0x32] sm:$0x1]   ;;  %v1678_v14 = vld [vmem:[%s3303_s0 + $0x5c] sm:$0x1]   ;;  %s1974_s30 = smov 13  }
  0xf1   :  { %v518_v12 = vpop.permute.xlu0 %517   ;;  %v1674_v9 = vld [vmem:[%s3303_s0 + $0xb1] sm:$0x2]  }
  0xf2   :  { %1515 = vst.msk [vmem:[%s3304_s1 + $0x1] ss:$3 sm:$0x3] %vm519_vm8, %v518_v12   ;;  %v635_v17 = vpop.permute.xlu2 %634   ;;  %vm679_vm8 = vcmask 572952   ;;  %v1156_v12 = vsel %vm5_vm0, %v1674_v9, %v1673_v4 }
  0xf3   :  { %1544 = vst.msk [vmem:[%s3304_s1 + $0x2] ss:$3 sm:$0x3] %vm636_vm9, %v635_v17   ;;  %vm796_vm9 = vcmask 482752  }
  0xf4   :  { %1008 = vrot.lane.b32.xlu1 %v1007_v15, %s1949_s2  ;;  %v1679_v15 = vld [vmem:[%s3303_s0 + $0xdb] sm:$0x2]  }
  0xf5   :  { %v1177_v22 = vsel %vm5_vm0, %v1679_v15, %v1678_v14  ;;  %v1724_v14 = vld [vmem:[%s3303_s0 + $0x1] sm:$0x1]  }
  0xf6   :  { %v561_v21 = vpop.permute.xlu1 %560   ;;  %v1725_v15 = vld [vmem:[%s3303_s0 + $0x80] sm:$0x2]  }
  0xf7   :  { %997 = vrot.lane.b32.xlu0 %v996_v16, %s1950_s7  ;;  %563 = vst.msk [vmem:[%s3304_s1] ss:$3 sm:$0x3] %vm562_vm10, %v561_v21   ;;  %s1958_s7 = smov 27   ;;  %vm722_vm10 = vcmask 540152   ;;  %v1359_v19 = vsel %vm5_vm0, %v1725_v15, %v1724_v14 }
  0xf8   :  { %1018 = vrot.lane.b32.xlu2 %v1017_v26, %s1951_s22  ;;  %v1681_v16 = vld [vmem:[%s3303_s0 + $0x31] sm:$0x1]   ;;  %v1686_v26 = vld [vmem:[%s3303_s0 + $0x5b] sm:$0x1]   ;;  %s1977_s22 = smov 10  }
  0xf9   :  { %v550_v24 = vpop.permute.xlu0 %549   ;;  %v1682_v21 = vld [vmem:[%s3303_s0 + $0xb0] sm:$0x2]  }
  0xfa   :  { %1523 = vst.msk [vmem:[%s3304_s1 + $0x1] ss:$3 sm:$0x3] %vm551_vm11, %v550_v24   ;;  %v667_v29 = vpop.permute.xlu2 %666   ;;  %vm711_vm11 = vcmask 548352   ;;  %v1188_v24 = vsel %vm5_vm0, %v1682_v21, %v1681_v16 }
  0xfb   :  { %1552 = vst.msk [vmem:[%s3304_s1 + $0x2] ss:$3 sm:$0x3] %vm668_vm12, %v667_v29   ;;  %vm828_vm12 = vcmask 458152  }
  0xfc   :  { %1040 = vrot.lane.b32.xlu1 %v1039_v27, %s1952_s23  ;;  %v1687_v27 = vld [vmem:[%s3303_s0 + $0xda] sm:$0x2]  }
  0xfd   :  { %v1209_v34 = vsel %vm5_vm0, %v1687_v27, %v1686_v26  ;;  %v1730_v27 = vld [vmem:[%s3303_s0 + $0xaa] sm:$0x2]  }
  0xfe   :  { %v593_v33 = vpop.permute.xlu1 %592  }
  0xff   :  { %1029 = vrot.lane.b32.xlu0 %v1028_v28, %s1953_s28  ;;  %595 = vst.msk [vmem:[%s3304_s1] ss:$3 sm:$0x3] %vm594_vm13, %v593_v33   ;;  %s1961_s28 = smov 24   ;;  %vm754_vm13 = vcmask 515552  }
 0x100   :  { %1050 = vrot.lane.b32.xlu2 %v1049_v38, %s1954_s14  ;;  %v1689_v28 = vld [vmem:[%s3303_s0 + $0x30] sm:$0x1]   ;;  %v1694_v38 = vld [vmem:[%s3303_s0 + $0x5a] sm:$0x1]   ;;  %s1980_s14 = smov 7  }
 0x101   :  { %v582_v36 = vpop.permute.xlu0 %581   ;;  %v1690_v33 = vld [vmem:[%s3303_s0 + $0xaf] sm:$0x2]  }
 0x102   :  { %1531 = vst.msk [vmem:[%s3304_s1 + $0x1] ss:$3 sm:$0x3] %vm583_vm14, %v582_v36   ;;  %v699_v41 = vpop.permute.xlu2 %698   ;;  %vm743_vm14 = vcmask 523752   ;;  %v1220_v36 = vsel %vm5_vm0, %v1690_v33, %v1689_v28 }
 0x103   :  { %1560 = vst.msk [vmem:[%s3304_s1 + $0x2] ss:$3 sm:$0x3] %vm700_vm15, %v699_v41   ;;  %vm860_vm15 = vcmask 433552  }
 0x104   :  { %1072 = vrot.lane.b32.xlu1 %v1071_v39, %s1955_s15  ;;  %v1695_v39 = vld [vmem:[%s3303_s0 + $0xd9] sm:$0x2]  }
 0x105   :  { %v1241_v46 = vsel %vm5_vm0, %v1695_v39, %v1694_v38 }
 0x106   :  { %v625_v45 = vpop.permute.xlu1 %624  }
 0x107   :  { %1061 = vrot.lane.b32.xlu0 %v1060_v40, %s1956_s20  ;;  %627 = vst.msk [vmem:[%s3304_s1] ss:$3 sm:$0x3] %vm626_vm1, %v625_v45   ;;  %s1964_s20 = smov 21   ;;  %vm786_vm1 = vcmask 490952  }
 0x108   :  { %1082 = vrot.lane.b32.xlu2 %v1081_v50, %s1957_s6  ;;  %v1697_v40 = vld [vmem:[%s3303_s0 + $0x2f] sm:$0x1]   ;;  %v1702_v50 = vld [vmem:[%s3303_s0 + $0x59] sm:$0x1]   ;;  %s1983_s6 = smov 4  }
 0x109   :  { %v614_v48 = vpop.permute.xlu0 %613   ;;  %v1698_v45 = vld [vmem:[%s3303_s0 + $0xae] sm:$0x2]  }
 0x10a   :  { %1539 = vst.msk [vmem:[%s3304_s1 + $0x1] ss:$3 sm:$0x3] %vm615_vm2, %v614_v48   ;;  %v731_v53 = vpop.permute.xlu2 %730   ;;  %vm775_vm2 = vcmask 499152   ;;  %v1252_v48 = vsel %vm5_vm0, %v1698_v45, %v1697_v40 }
 0x10b   :  { %1568 = vst.msk [vmem:[%s3304_s1 + $0x2] ss:$3 sm:$0x3] %vm732_vm3, %v731_v53   ;;  %vm892_vm3 = vcmask 408952  }
 0x10c   :  { %1104 = vrot.lane.b32.xlu1 %v1103_v51, %s1958_s7  ;;  %v1703_v51 = vld [vmem:[%s3303_s0 + $0xd8] sm:$0x2]  }
 0x10d   :  { %v1273_v58 = vsel %vm5_vm0, %v1703_v51, %v1702_v50 }
 0x10e   :  { %v657_v57 = vpop.permute.xlu1 %656  }
 0x10f   :  { %1093 = vrot.lane.b32.xlu0 %v1092_v52, %s1959_s12  ;;  %659 = vst.msk [vmem:[%s3304_s1] ss:$3 sm:$0x3] %vm658_vm4, %v657_v57   ;;  %s1967_s12 = smov 18   ;;  %vm818_vm4 = vcmask 466352  }
 0x110   :  { %1114 = vrot.lane.b32.xlu2 %v1113_v62, %s1960_s27  ;;  %v1705_v52 = vld [vmem:[%s3303_s0 + $0x2e] sm:$0x1]   ;;  %v1710_v62 = vld [vmem:[%s3303_s0 + $0x58] sm:$0x1]  }
 0x111   :  { %v646_v60 = vpop.permute.xlu0 %645   ;;  %v1706_v57 = vld [vmem:[%s3303_s0 + $0xad] sm:$0x2]  }
 0x112   :  { %1547 = vst.msk [vmem:[%s3304_s1 + $0x1] ss:$3 sm:$0x3] %vm647_vm5, %v646_v60   ;;  %v763_v1 = vpop.permute.xlu2 %762   ;;  %vm807_vm5 = vcmask 474552   ;;  %v1284_v60 = vsel %vm5_vm0, %v1706_v57, %v1705_v52 }
 0x113   :  { %1576 = vst.msk [vmem:[%s3304_s1 + $0x2] ss:$3 sm:$0x3] %vm764_vm6, %v763_v1   ;;  %vm924_vm6 = vcmask 384352  }
 0x114   :  { %1136 = vrot.lane.b32.xlu1 %v1135_v63, %s1961_s28  ;;  %v1711_v63 = vld [vmem:[%s3303_s0 + $0xd7] sm:$0x2]  }
 0x115   :  { %v1305_v6 = vsel %vm5_vm0, %v1711_v63, %v1710_v62 }
 0x116   :  { %v689_v5 = vpop.permute.xlu1 %688  }
 0x117   :  { %1125 = vrot.lane.b32.xlu0 %v1124_v0, %s1962_s4  ;;  %691 = vst.msk [vmem:[%s3304_s1] ss:$3 sm:$0x3] %vm690_vm7, %v689_v5   ;;  %s1970_s4 = smov 15   ;;  %vm850_vm7 = vcmask 441752  }
 0x118   :  { %1146 = vrot.lane.b32.xlu2 %v1145_v10, %s1963_s19  ;;  %v1713_v0 = vld [vmem:[%s3303_s0 + $0x2d] sm:$0x1]   ;;  %v1718_v10 = vld [vmem:[%s3303_s0 + $0x57] sm:$0x1]  }
 0x119   :  { %v678_v8 = vpop.permute.xlu0 %677   ;;  %v1714_v5 = vld [vmem:[%s3303_s0 + $0xac] sm:$0x2]  }
 0x11a   :  { %1555 = vst.msk [vmem:[%s3304_s1 + $0x1] ss:$3 sm:$0x3] %vm679_vm8, %v678_v8   ;;  %v795_v13 = vpop.permute.xlu2 %794   ;;  %vm839_vm8 = vcmask 449952   ;;  %v1316_v8 = vsel %vm5_vm0, %v1714_v5, %v1713_v0 }
 0x11b   :  { %1584 = vst.msk [vmem:[%s3304_s1 + $0x2] ss:$3 sm:$0x3] %vm796_vm9, %v795_v13   ;;  %vm956_vm9 = vcmask 359752  }
 0x11c   :  { %1168 = vrot.lane.b32.xlu1 %v1167_v11, %s1964_s20  ;;  %v1719_v11 = vld [vmem:[%s3303_s0 + $0xd6] sm:$0x2]  }
 0x11d   :  { %v1337_v18 = vsel %vm5_vm0, %v1719_v11, %v1718_v10 }
 0x11e   :  { %v721_v17 = vpop.permute.xlu1 %720  }
 0x11f   :  { %1157 = vrot.lane.b32.xlu0 %v1156_v12, %s1965_s25  ;;  %723 = vst.msk [vmem:[%s3304_s1] ss:$3 sm:$0x3] %vm722_vm10, %v721_v17   ;;  %s1973_s25 = smov 12   ;;  %vm882_vm10 = vcmask 417152  }
 0x120   :  { %1178 = vrot.lane.b32.xlu2 %v1177_v22, %s1966_s11  ;;  %v1721_v12 = vld [vmem:[%s3303_s0 + $0x2c] sm:$0x1]   ;;  %v1726_v22 = vld [vmem:[%s3303_s0 + $0x56] sm:$0x1]  }
 0x121   :  { %v710_v20 = vpop.permute.xlu0 %709   ;;  %v1722_v17 = vld [vmem:[%s3303_s0 + $0xab] sm:$0x2]  }
 0x122   :  { %1563 = vst.msk [vmem:[%s3304_s1 + $0x1] ss:$3 sm:$0x3] %vm711_vm11, %v710_v20   ;;  %v827_v25 = vpop.permute.xlu2 %826   ;;  %vm871_vm11 = vcmask 425352   ;;  %v1348_v20 = vsel %vm5_vm0, %v1722_v17, %v1721_v12 }
 0x123   :  { %1592 = vst.msk [vmem:[%s3304_s1 + $0x2] ss:$3 sm:$0x3] %vm828_vm12, %v827_v25   ;;  %vm988_vm12 = vcmask 335152  }
 0x124   :  { %1200 = vrot.lane.b32.xlu1 %v1199_v23, %s1967_s12  ;;  %v1727_v23 = vld [vmem:[%s3303_s0 + $0xd5] sm:$0x2]  }
 0x125   :  { %v1369_v28 = vsel %vm5_vm0, %v1727_v23, %v1726_v22 }
 0x126   :  { %v753_v29 = vpop.permute.xlu1 %752  }
 0x127   :  { %1189 = vrot.lane.b32.xlu0 %v1188_v24, %s1968_s17  ;;  %755 = vst.msk [vmem:[%s3304_s1] ss:$3 sm:$0x3] %vm754_vm13, %v753_v29   ;;  %s1976_s17 = smov 9   ;;  %vm914_vm13 = vcmask 392552  }
 0x128   :  { %1210 = vrot.lane.b32.xlu2 %v1209_v34, %s1969_s3  ;;  %v1729_v24 = vld [vmem:[%s3303_s0 + $0x2b] sm:$0x1]  }
 0x129   :  { %v742_v32 = vpop.permute.xlu0 %741   ;;  %v1380_v29 = vsel %vm5_vm0, %v1730_v27, %v1729_v24  ;;  %vm1020_vm0 = vcmask 310552  }
 0x12a   :  { %1571 = vst.msk [vmem:[%s3304_s1 + $0x1] ss:$3 sm:$0x3] %vm743_vm14, %v742_v32   ;;  %v859_v37 = vpop.permute.xlu2 %858   ;;  %vm903_vm14 = vcmask 400752  }
 0x12b   :  { %1600 = vst.msk [vmem:[%s3304_s1 + $0x2] ss:$3 sm:$0x3] %vm860_vm15, %v859_v37   ;;  %vm946_vm15 = vcmask 367952  }
 0x12c   :  { %1232 = vrot.lane.b32.xlu1 %v1231_v35, %s1970_s4 }
 0x12e   :  { %v785_v41 = vpop.permute.xlu1 %784  }
 0x12f   :  { %1221 = vrot.lane.b32.xlu0 %v1220_v36, %s1971_s9  ;;  %787 = vst.msk [vmem:[%s3304_s1] ss:$3 sm:$0x3] %vm786_vm1, %v785_v41   ;;  %s1979_s9 = smov 6   ;;  %vm935_vm1 = vcmask 376152  }
 0x130   :  { %1242 = vrot.lane.b32.xlu2 %v1241_v46, %s1972_s24 }
 0x131   :  { %v774_v44 = vpop.permute.xlu0 %773  }
 0x132   :  { %1579 = vst.msk [vmem:[%s3304_s1 + $0x1] ss:$3 sm:$0x3] %vm775_vm2, %v774_v44   ;;  %v891_v49 = vpop.permute.xlu2 %890   ;;  %vm1052_vm2 = vcmask 285952  }
 0x133   :  { %1608 = vst.msk [vmem:[%s3304_s1 + $0x2] ss:$3 sm:$0x3] %vm892_vm3, %v891_v49   ;;  %vm978_vm3 = vcmask 343352  }
 0x134   :  { %1264 = vrot.lane.b32.xlu1 %v1263_v47, %s1973_s25 }
 0x136   :  { %v817_v53 = vpop.permute.xlu1 %816  }
 0x137   :  { %1253 = vrot.lane.b32.xlu0 %v1252_v48, %s1974_s30  ;;  %819 = vst.msk [vmem:[%s3304_s1] ss:$3 sm:$0x3] %vm818_vm4, %v817_v53   ;;  %s1982_s30 = smov 3   ;;  %vm967_vm4 = vcmask 351552  }
 0x138   :  { %1274 = vrot.lane.b32.xlu2 %v1273_v58, %s1975_s16  ;;  %s1984_s16 = smov 2  }
 0x139   :  { %v806_v56 = vpop.permute.xlu0 %805  }
 0x13a   :  { %1587 = vst.msk [vmem:[%s3304_s1 + $0x1] ss:$3 sm:$0x3] %vm807_vm5, %v806_v56   ;;  %v923_v61 = vpop.permute.xlu2 %922   ;;  %vm1084_vm5 = vcmask 261352  }
 0x13b   :  { %1616 = vst.msk [vmem:[%s3304_s1 + $0x2] ss:$3 sm:$0x3] %vm924_vm6, %v923_v61   ;;  %vm1010_vm6 = vcmask 318752  }
 0x13c   :  { %1296 = vrot.lane.b32.xlu1 %v1295_v59, %s1976_s17  ;;  %s1985_s17 = smov 1  }
 0x13e   :  { %v849_v1 = vpop.permute.xlu1 %848  }
 0x13f   :  { %1285 = vrot.lane.b32.xlu0 %v1284_v60, %s1977_s22  ;;  %851 = vst.msk [vmem:[%s3304_s1] ss:$3 sm:$0x3] %vm850_vm7, %v849_v1   ;;  %vm999_vm7 = vcmask 326952  }
 0x140   :  { %1306 = vrot.lane.b32.xlu2 %v1305_v6, %s1978_s8 }
 0x141   :  { %v838_v4 = vpop.permute.xlu0 %837  }
 0x142   :  { %1595 = vst.msk [vmem:[%s3304_s1 + $0x1] ss:$3 sm:$0x3] %vm839_vm8, %v838_v4   ;;  %v955_v9 = vpop.permute.xlu2 %954   ;;  %vm1116_vm8 = vcmask 236752  }
 0x143   :  { %1624 = vst.msk [vmem:[%s3304_s1 + $0x2] ss:$3 sm:$0x3] %vm956_vm9, %v955_v9   ;;  %vm1042_vm9 = vcmask 294152  }
 0x144   :  { %1328 = vrot.lane.b32.xlu1 %v1327_v7, %s1979_s9 }
 0x146   :  { %v881_v13 = vpop.permute.xlu1 %880  }
 0x147   :  { %1317 = vrot.lane.b32.xlu0 %v1316_v8, %s1980_s14  ;;  %883 = vst.msk [vmem:[%s3304_s1] ss:$3 sm:$0x3] %vm882_vm10, %v881_v13   ;;  %vm1031_vm10 = vcmask 302352  }
 0x148   :  { %1338 = vrot.lane.b32.xlu2 %v1337_v18, %s1981_s29 }
 0x149   :  { %v870_v16 = vpop.permute.xlu0 %869  }
 0x14a   :  { %1603 = vst.msk [vmem:[%s3304_s1 + $0x1] ss:$3 sm:$0x3] %vm871_vm11, %v870_v16   ;;  %v987_v21 = vpop.permute.xlu2 %986   ;;  %vm1148_vm11 = vcmask 212152  }
 0x14b   :  { %1632 = vst.msk [vmem:[%s3304_s1 + $0x2] ss:$3 sm:$0x3] %vm988_vm12, %v987_v21   ;;  %vm1074_vm12 = vcmask 269552  }
 0x14c   :  { %1360 = vrot.lane.b32.xlu1 %v1359_v19, %s1982_s30 }
 0x14e   :  { %v913_v25 = vpop.permute.xlu1 %912  }
 0x14f   :  { %1349 = vrot.lane.b32.xlu0 %v1348_v20, %s1983_s6  ;;  %915 = vst.msk [vmem:[%s3304_s1] ss:$3 sm:$0x3] %vm914_vm13, %v913_v25   ;;  %vm1063_vm13 = vcmask 277752  }
 0x150   :  { %1370 = vrot.lane.b32.xlu2 %v1369_v28, %s1984_s16 }
 0x151   :  { %v902_v26 = vpop.permute.xlu0 %901  }
 0x152   :  { %1611 = vst.msk [vmem:[%s3304_s1 + $0x1] ss:$3 sm:$0x3] %vm903_vm14, %v902_v26   ;;  %v1019_v30 = vpop.permute.xlu2 %1018   ;;  %vm1180_vm14 = vcmask 187552  }
 0x153   :  { %1640 = vst.msk [vmem:[%s3304_s1 + $0x2] ss:$3 sm:$0x3] %vm1020_vm0, %v1019_v30   ;;  %vm1106_vm0 = vcmask 244952  }
 0x156   :  { %v945_v31 = vpop.permute.xlu1 %944  }
 0x157   :  { %1381 = vrot.lane.b32.xlu0 %v1380_v29, %s1985_s17  ;;  %947 = vst.msk [vmem:[%s3304_s1] ss:$3 sm:$0x3] %vm946_vm15, %v945_v31   ;;  %vm1095_vm15 = vcmask 253152  }
 0x159   :  { %v934_v32 = vpop.permute.xlu0 %933  }
 0x15a   :  { %1619 = vst.msk [vmem:[%s3304_s1 + $0x1] ss:$3 sm:$0x3] %vm935_vm1, %v934_v32   ;;  %v1051_v33 = vpop.permute.xlu2 %1050   ;;  %vm1212_vm1 = vcmask 162952  }
 0x15b   :  { %1648 = vst.msk [vmem:[%s3304_s1 + $0x2] ss:$3 sm:$0x3] %vm1052_vm2, %v1051_v33   ;;  %vm1138_vm2 = vcmask 220352  }
 0x15e   :  { %v977_v34 = vpop.permute.xlu1 %976  }
 0x15f   :  { %979 = vst.msk [vmem:[%s3304_s1] ss:$3 sm:$0x3] %vm978_vm3, %v977_v34   ;;  %vm1127_vm3 = vcmask 228552  }
 0x161   :  { %v966_v35 = vpop.permute.xlu0 %965  }
 0x162   :  { %1627 = vst.msk [vmem:[%s3304_s1 + $0x1] ss:$3 sm:$0x3] %vm967_vm4, %v966_v35   ;;  %v1083_v36 = vpop.permute.xlu2 %1082   ;;  %vm1244_vm4 = vcmask 138352  }
 0x163   :  { %1656 = vst.msk [vmem:[%s3304_s1 + $0x2] ss:$3 sm:$0x3] %vm1084_vm5, %v1083_v36   ;;  %vm1170_vm5 = vcmask 195752  }
 0x166   :  { %v1009_v37 = vpop.permute.xlu1 %1008  }
 0x167   :  { %1011 = vst.msk [vmem:[%s3304_s1] ss:$3 sm:$0x3] %vm1010_vm6, %v1009_v37   ;;  %vm1159_vm6 = vcmask 203952  }
 0x169   :  { %v998_v38 = vpop.permute.xlu0 %997  }
 0x16a   :  { %1635 = vst.msk [vmem:[%s3304_s1 + $0x1] ss:$3 sm:$0x3] %vm999_vm7, %v998_v38   ;;  %v1115_v39 = vpop.permute.xlu2 %1114   ;;  %vm1276_vm7 = vcmask 113752  }
 0x16b   :  { %1664 = vst.msk [vmem:[%s3304_s1 + $0x2] ss:$3 sm:$0x3] %vm1116_vm8, %v1115_v39   ;;  %vm1202_vm8 = vcmask 171152  }
 0x16e   :  { %v1041_v40 = vpop.permute.xlu1 %1040  }
 0x16f   :  { %1043 = vst.msk [vmem:[%s3304_s1] ss:$3 sm:$0x3] %vm1042_vm9, %v1041_v40   ;;  %vm1191_vm9 = vcmask 179352  }
 0x171   :  { %v1030_v41 = vpop.permute.xlu0 %1029  }
 0x172   :  { %1643 = vst.msk [vmem:[%s3304_s1 + $0x1] ss:$3 sm:$0x3] %vm1031_vm10, %v1030_v41   ;;  %v1147_v42 = vpop.permute.xlu2 %1146   ;;  %vm1308_vm10 = vcmask 89152  }
 0x173   :  { %1672 = vst.msk [vmem:[%s3304_s1 + $0x2] ss:$3 sm:$0x3] %vm1148_vm11, %v1147_v42   ;;  %vm1234_vm11 = vcmask 146552  }
 0x176   :  { %v1073_v43 = vpop.permute.xlu1 %1072  }
 0x177   :  { %1075 = vst.msk [vmem:[%s3304_s1] ss:$3 sm:$0x3] %vm1074_vm12, %v1073_v43   ;;  %vm1223_vm12 = vcmask 154752  }
 0x179   :  { %v1062_v44 = vpop.permute.xlu0 %1061  }
 0x17a   :  { %1651 = vst.msk [vmem:[%s3304_s1 + $0x1] ss:$3 sm:$0x3] %vm1063_vm13, %v1062_v44   ;;  %v1179_v45 = vpop.permute.xlu2 %1178   ;;  %vm1340_vm13 = vcmask 64552  }
 0x17b   :  { %1680 = vst.msk [vmem:[%s3304_s1 + $0x2] ss:$3 sm:$0x3] %vm1180_vm14, %v1179_v45   ;;  %vm1266_vm14 = vcmask 121952  }
 0x17e   :  { %v1105_v46 = vpop.permute.xlu1 %1104  }
 0x17f   :  { %1107 = vst.msk [vmem:[%s3304_s1] ss:$3 sm:$0x3] %vm1106_vm0, %v1105_v46   ;;  %vm1255_vm0 = vcmask 130152  }
 0x181   :  { %v1094_v47 = vpop.permute.xlu0 %1093  }
 0x182   :  { %1659 = vst.msk [vmem:[%s3304_s1 + $0x1] ss:$3 sm:$0x3] %vm1095_vm15, %v1094_v47   ;;  %v1211_v48 = vpop.permute.xlu2 %1210   ;;  %vm1372_vm15 = vcmask 39952  }
 0x183   :  { %1688 = vst.msk [vmem:[%s3304_s1 + $0x2] ss:$3 sm:$0x3] %vm1212_vm1, %v1211_v48   ;;  %vm1298_vm1 = vcmask 97352  }
 0x186   :  { %v1137_v49 = vpop.permute.xlu1 %1136  }
 0x187   :  { %1139 = vst.msk [vmem:[%s3304_s1] ss:$3 sm:$0x3] %vm1138_vm2, %v1137_v49   ;;  %vm1287_vm2 = vcmask 105552  }
 0x189   :  { %v1126_v50 = vpop.permute.xlu0 %1125  }
 0x18a   :  { %1667 = vst.msk [vmem:[%s3304_s1 + $0x1] ss:$3 sm:$0x3] %vm1127_vm3, %v1126_v50   ;;  %v1243_v51 = vpop.permute.xlu2 %1242   ;;  %vm1330_vm3 = vcmask 72752  }
 0x18b   :  { %1696 = vst.msk [vmem:[%s3304_s1 + $0x2] ss:$3 sm:$0x3] %vm1244_vm4, %v1243_v51   ;;  %vm1319_vm4 = vcmask 80952  }
 0x18e   :  { %v1169_v52 = vpop.permute.xlu1 %1168  }
 0x18f   :  { %1171 = vst.msk [vmem:[%s3304_s1] ss:$3 sm:$0x3] %vm1170_vm5, %v1169_v52   ;;  %vm1362_vm5 = vcmask 48152  }
 0x191   :  { %v1158_v53 = vpop.permute.xlu0 %1157  }
 0x192   :  { %1675 = vst.msk [vmem:[%s3304_s1 + $0x1] ss:$3 sm:$0x3] %vm1159_vm6, %v1158_v53   ;;  %v1275_v54 = vpop.permute.xlu2 %1274   ;;  %vm1351_vm6 = vcmask 56352  }
 0x193   :  { %1704 = vst.msk [vmem:[%s3304_s1 + $0x2] ss:$3 sm:$0x3] %vm1276_vm7, %v1275_v54   ;;  %vm1383_vm7 = vcmask 31752  }
 0x196   :  { %v1201_v55 = vpop.permute.xlu1 %1200  }
 0x197   :  { %1203 = vst.msk [vmem:[%s3304_s1] ss:$3 sm:$0x3] %vm1202_vm8, %v1201_v55  }
 0x199   :  { %v1190_v56 = vpop.permute.xlu0 %1189  }
 0x19a   :  { %1683 = vst.msk [vmem:[%s3304_s1 + $0x1] ss:$3 sm:$0x3] %vm1191_vm9, %v1190_v56   ;;  %v1307_v57 = vpop.permute.xlu2 %1306  }
 0x19b   :  { %1712 = vst.msk [vmem:[%s3304_s1 + $0x2] ss:$3 sm:$0x3] %vm1308_vm10, %v1307_v57  }
 0x19e   :  { %v1233_v58 = vpop.permute.xlu1 %1232  }
 0x19f   :  { %1235 = vst.msk [vmem:[%s3304_s1] ss:$3 sm:$0x3] %vm1234_vm11, %v1233_v58  }
 0x1a1   :  { %v1222_v59 = vpop.permute.xlu0 %1221  }
 0x1a2   :  { %1691 = vst.msk [vmem:[%s3304_s1 + $0x1] ss:$3 sm:$0x3] %vm1223_vm12, %v1222_v59   ;;  %v1339_v60 = vpop.permute.xlu2 %1338  }
 0x1a3   :  { %1720 = vst.msk [vmem:[%s3304_s1 + $0x2] ss:$3 sm:$0x3] %vm1340_vm13, %v1339_v60  }
 0x1a6   :  { %v1265_v61 = vpop.permute.xlu1 %1264  }
 0x1a7   :  { %1267 = vst.msk [vmem:[%s3304_s1] ss:$3 sm:$0x3] %vm1266_vm14, %v1265_v61  }
 0x1a9   :  { %v1254_v62 = vpop.permute.xlu0 %1253  }
 0x1aa   :  { %1699 = vst.msk [vmem:[%s3304_s1 + $0x1] ss:$3 sm:$0x3] %vm1255_vm0, %v1254_v62   ;;  %v1371_v63 = vpop.permute.xlu2 %1370  }
 0x1ab   :  { %1728 = vst.msk [vmem:[%s3304_s1 + $0x2] ss:$3 sm:$0x3] %vm1372_vm15, %v1371_v63  }
 0x1ae   :  { %v1297_v0 = vpop.permute.xlu1 %1296  }
 0x1af   :  { %1299 = vst.msk [vmem:[%s3304_s1] ss:$3 sm:$0x3] %vm1298_vm1, %v1297_v0  }
 0x1b1   :  { %v1286_v1 = vpop.permute.xlu0 %1285  }
 0x1b2   :  { %1707 = vst.msk [vmem:[%s3304_s1 + $0x1] ss:$3 sm:$0x3] %vm1287_vm2, %v1286_v1  }
 0x1b6   :  { %v1329_v2 = vpop.permute.xlu1 %1328  }
 0x1b7   :  { %1331 = vst.msk [vmem:[%s3304_s1] ss:$3 sm:$0x3] %vm1330_vm3, %v1329_v2  }
 0x1b9   :  { %v1318_v3 = vpop.permute.xlu0 %1317  }
 0x1ba   :  { %1715 = vst.msk [vmem:[%s3304_s1 + $0x1] ss:$3 sm:$0x3] %vm1319_vm4, %v1318_v3  }
 0x1be   :  { %v1361_v4 = vpop.permute.xlu1 %1360  }
 0x1bf   :  { %1363 = vst.msk [vmem:[%s3304_s1] ss:$3 sm:$0x3] %vm1362_vm5, %v1361_v4  }
 0x1c1   :  { %v1350_v5 = vpop.permute.xlu0 %1349  }
 0x1c2   :  { %1723 = vst.msk [vmem:[%s3304_s1 + $0x1] ss:$3 sm:$0x3] %vm1351_vm6, %v1350_v5  }
 0x1c9   :  { %v1382_v6 = vpop.permute.xlu0 %1381  }
 0x1ca   :  { %1731 = vst.msk [vmem:[%s3304_s1 + $0x1] ss:$3 sm:$0x3] %vm1383_vm7, %v1382_v6  }

// kernel: sub.1
= control target key start
LH: loop header
LB: loop body
LE: loop exit
PB: predicated region body
PF: predicated region fallthrough
CT: control target
= control target key end

     0   :  { %s34_s0 = inlined_call_operand.vmem [shape: f32[32], index: 0, kind: input, shape index: {}]   ;;  %s35_s1 = inlined_call_operand.vmem [shape: f32[32], index: 1, kind: input, shape index: {}]   ;;  %s36_s2 = inlined_call_operand.vmem [shape: f32[32], index: 2, kind: output, shape index: {}]  }
   0x1   :  { %v3_v0 = vld [vmem:[%s34_s0] sm:$0x1] }
   0x2   :  { %v4_v1 = vld [vmem:[%s35_s1] sm:$0x1] }
   0x3   :  { %v7_v2 = vsub.f32 %v3_v0, %v4_v1 }
   0x5   :  { %9 = vst [vmem:[%s36_s2] sm:$0x1] %v7_v2 }

// kernel: modified_sapiens_vit_forward.4
= control target key start
LH: loop header
LB: loop body
LE: loop exit
PB: predicated region body
PF: predicated region fallthrough
CT: control target
= control target key end

     0   :  { %s1173_s1 = inlined_call_operand.vmem [shape: bf16[768,128], index: 1, kind: input, shape index: {}]   ;;  %s1174_s2 = inlined_call_operand.vmem [shape: f32[1,128], index: 2, kind: input, shape index: {}]   ;;  %s1175_s0 = inlined_call_operand.vmem [shape: bf16[32,768], index: 0, kind: input, shape index: {}]   ;;  %s1176_s3 = inlined_call_operand.vmem [shape: bf16[32,128], index: 3, kind: output, shape index: {}]  }
   0x1   :  { %v859_v0 = vld [vmem:[%s1173_s1 + $0x38] sm:$0xff]  ;;  %v858_v4 = vld [vmem:[%s1173_s1 + $0x30] sm:$0xff]  ;;  %v857_v8 = vld [vmem:[%s1173_s1 + $0x28] sm:$0xff] }
   0x2   :  { %v867_v1 = vld [vmem:[%s1173_s1 + $0x78] sm:$0xff]  ;;  %474 = vmatpush.bf16.msra.mxu0 %v859_v0  ;;  %v866_v5 = vld [vmem:[%s1173_s1 + $0x70] sm:$0xff]  ;;  %v865_v9 = vld [vmem:[%s1173_s1 + $0x68] sm:$0xff] }
   0x3   :  { %v875_v2 = vld [vmem:[%s1173_s1 + $0xb8] sm:$0xff]  ;;  %493 = vmatpush.bf16.msra.mxu1 %v867_v1  ;;  %v874_v6 = vld [vmem:[%s1173_s1 + $0xb0] sm:$0xff]  ;;  %v873_v10 = vld [vmem:[%s1173_s1 + $0xa8] sm:$0xff] }
   0x4   :  { %v883_v3 = vld [vmem:[%s1173_s1 + $0xf8] sm:$0xff]  ;;  %512 = vmatpush.bf16.msra.mxu2 %v875_v2  ;;  %v882_v7 = vld [vmem:[%s1173_s1 + $0xf0] sm:$0xff]  ;;  %v881_v11 = vld [vmem:[%s1173_s1 + $0xe8] sm:$0xff] }
   0x5   :  { %531 = vmatpush.bf16.msra.mxu3 %v883_v3  ;;  %v856_v12 = vld [vmem:[%s1173_s1 + $0x20] sm:$0xff]  ;;  %v855_v16 = vld [vmem:[%s1173_s1 + $0x18] sm:$0xff]  ;;  %v854_v20 = vld [vmem:[%s1173_s1 + $0x10] sm:$0xff] }
   0x6   :  { %475 = vmatpush.bf16.msra.mxu0 %v858_v4  ;;  %v864_v13 = vld [vmem:[%s1173_s1 + $0x60] sm:$0xff]  ;;  %v863_v17 = vld [vmem:[%s1173_s1 + $0x58] sm:$0xff]  ;;  %v862_v21 = vld [vmem:[%s1173_s1 + $0x50] sm:$0xff] }
   0x7   :  { %494 = vmatpush.bf16.msra.mxu1 %v866_v5  ;;  %v872_v14 = vld [vmem:[%s1173_s1 + $0xa0] sm:$0xff]  ;;  %v871_v18 = vld [vmem:[%s1173_s1 + $0x98] sm:$0xff]  ;;  %v870_v22 = vld [vmem:[%s1173_s1 + $0x90] sm:$0xff] }
   0x8   :  { %513 = vmatpush.bf16.msra.mxu2 %v874_v6  ;;  %v880_v15 = vld [vmem:[%s1173_s1 + $0xe0] sm:$0xff]  ;;  %v879_v19 = vld [vmem:[%s1173_s1 + $0xd8] sm:$0xff]  ;;  %v878_v23 = vld [vmem:[%s1173_s1 + $0xd0] sm:$0xff] }
   0x9   :  { %532 = vmatpush.bf16.msra.mxu3 %v882_v7  ;;  %v853_v24 = vld [vmem:[%s1173_s1 + $0x8] sm:$0xff]  ;;  %v852_v28 = vld [vmem:[%s1173_s1] sm:$0xff]  ;;  %v843_v33 = vld [vmem:[%s1175_s0 + $0x14] sm:$0xf0] }
   0xa   :  { %476 = vmatpush.bf16.msra.mxu0 %v857_v8  ;;  %v861_v25 = vld [vmem:[%s1173_s1 + $0x48] sm:$0xff]  ;;  %v860_v29 = vld [vmem:[%s1173_s1 + $0x40] sm:$0xff]  ;;  %v604_v35 = vld [vmem:[%s1175_s0 + $0x18] sm:$0xf0] }
   0xb   :  { %495 = vmatpush.bf16.msra.mxu1 %v865_v9  ;;  %v869_v26 = vld [vmem:[%s1173_s1 + $0x88] sm:$0xff]  ;;  %v868_v30 = vld [vmem:[%s1173_s1 + $0x80] sm:$0xff]  ;;  %v891_v40 = vld [vmem:[%s1173_s1 + $0x138] sm:$0xff] }
   0xc   :  { %514 = vmatpush.bf16.msra.mxu2 %v873_v10  ;;  %v877_v27 = vld [vmem:[%s1173_s1 + $0xc8] sm:$0xff]  ;;  %v876_v31 = vld [vmem:[%s1173_s1 + $0xc0] sm:$0xff]  ;;  %v899_v45 = vld [vmem:[%s1173_s1 + $0x178] sm:$0xff] }
   0xd   :  { %533 = vmatpush.bf16.msra.mxu3 %v881_v11  ;;  %v602_v32 = vld [vmem:[%s1175_s0] sm:$0xf]  ;;  %v840_v34 = vld [vmem:[%s1175_s0 + $0x4] sm:$0xf]  ;;  %v610_v36 = vld [vmem:[%s1175_s0 + $0x8] sm:$0xf] }
   0xe   :  { %477 = vmatpush.bf16.msra.mxu0 %v856_v12  ;;  %v844_v37 = vld [vmem:[%s1175_s0 + $0x1c] sm:$0xf0]  ;;  %v841_v38 = vld [vmem:[%s1175_s0 + $0xc] sm:$0xf]  ;;  %v612_v39 = vld [vmem:[%s1175_s0 + $0x20] sm:$0xf0]  ;;  %v603_v41 = vor.u32 %v843_v33, %v602_v32  ;;  %v607_v42 = vor.u32 %v840_v34, %v604_v35 }
   0xf   :  { %496 = vmatpush.bf16.msra.mxu1 %v864_v13  ;;  %v611_v43 = vor.u32 %v844_v37, %v610_v36  ;;  %v615_v44 = vor.u32 %v841_v38, %v612_v39  ;;  %v890_v46 = vld [vmem:[%s1173_s1 + $0x130] sm:$0xff]  ;;  %v889_v48 = vld [vmem:[%s1173_s1 + $0x128] sm:$0xff]  ;;  %v888_v50 = vld [vmem:[%s1173_s1 + $0x120] sm:$0xff] }
  0x10   :  { %515 = vmatpush.bf16.msra.mxu2 %v872_v14  ;;  %v898_v47 = vld [vmem:[%s1173_s1 + $0x170] sm:$0xff]  ;;  %v897_v49 = vld [vmem:[%s1173_s1 + $0x168] sm:$0xff]  ;;  %v896_v51 = vld [vmem:[%s1173_s1 + $0x160] sm:$0xff] }
  0x11   :  { %534 = vmatpush.bf16.msra.mxu3 %v880_v15  ;;  %v626_v52 = vld [vmem:[%s1175_s0 + $0x30] sm:$0xf]  ;;  %v849_v53 = vld [vmem:[%s1175_s0 + $0x44] sm:$0xf0]  ;;  %v846_v54 = vld [vmem:[%s1175_s0 + $0x34] sm:$0xf] }
  0x12   :  { %478 = vmatpush.bf16.msra.mxu0 %v855_v16  ;;  %v628_v55 = vld [vmem:[%s1175_s0 + $0x48] sm:$0xf0]  ;;  %v634_v56 = vld [vmem:[%s1175_s0 + $0x38] sm:$0xf]  ;;  %v850_v57 = vld [vmem:[%s1175_s0 + $0x4c] sm:$0xf0]  ;;  %v627_v61 = vor.u32 %v849_v53, %v626_v52 }
  0x13   :  { %497 = vmatpush.bf16.msra.mxu1 %v863_v17  ;;  %v847_v58 = vld [vmem:[%s1175_s0 + $0x3c] sm:$0xf]  ;;  %v636_v59 = vld [vmem:[%s1175_s0 + $0x50] sm:$0xf0]  ;;  %v631_v62 = vor.u32 %v846_v54, %v628_v55  ;;  %v635_v63 = vor.u32 %v850_v57, %v634_v56  ;;  %v885_v4 = vld [vmem:[%s1173_s1 + $0x108] sm:$0xff] }
  0x14   :  { %516 = vmatpush.bf16.msra.mxu2 %v871_v18  ;;  %v887_v60 = vld [vmem:[%s1173_s1 + $0x118] sm:$0xff]  ;;  %v639_v0 = vor.u32 %v847_v58, %v636_v59  ;;  %v886_v2 = vld [vmem:[%s1173_s1 + $0x110] sm:$0xff]  ;;  %v893_v5 = vld [vmem:[%s1173_s1 + $0x148] sm:$0xff] }
  0x15   :  { %535 = vmatpush.bf16.msra.mxu3 %v879_v19  ;;  %v895_v1 = vld [vmem:[%s1173_s1 + $0x158] sm:$0xff]  ;;  %v894_v3 = vld [vmem:[%s1173_s1 + $0x150] sm:$0xff]  ;;  %v884_v6 = vld [vmem:[%s1173_s1 + $0x100] sm:$0xff] }
  0x16   :  { %479 = vmatpush.bf16.msra.mxu0 %v854_v20  ;;  %v892_v7 = vld [vmem:[%s1173_s1 + $0x140] sm:$0xff]  ;;  %v618_v8 = vld [vmem:[%s1175_s0 + $0x10] sm:$0xf]  ;;  %v845_v9 = vld [vmem:[%s1175_s0 + $0x24] sm:$0xf0] }
  0x17   :  { %498 = vmatpush.bf16.msra.mxu1 %v862_v21  ;;  %v642_v10 = vld [vmem:[%s1175_s0 + $0x40] sm:$0xf]  ;;  %v851_v11 = vld [vmem:[%s1175_s0 + $0x54] sm:$0xf0]  ;;  %v842_v12 = vld [vmem:[%s1175_s0 + $0x14] sm:$0xf]  ;;  %v619_v16 = vor.u32 %v845_v9, %v618_v8 }
  0x18   :  { %517 = vmatpush.bf16.msra.mxu2 %v870_v22  ;;  %v620_v13 = vld [vmem:[%s1175_s0 + $0x28] sm:$0xf0]  ;;  %v848_v14 = vld [vmem:[%s1175_s0 + $0x44] sm:$0xf]  ;;  %v644_v15 = vld [vmem:[%s1175_s0 + $0x58] sm:$0xf0]  ;;  %v643_v17 = vor.u32 %v851_v11, %v642_v10 }
  0x19   :  { %536 = vmatpush.bf16.msra.mxu3 %v878_v23  ;;  %v623_v18 = vor.u32 %v842_v12, %v620_v13  ;;  %v647_v19 = vor.u32 %v848_v14, %v644_v15 }
  0x1a   :  { %480 = vmatpush.bf16.msra.mxu0 %v853_v24 }
  0x1b   :  { %499 = vmatpush.bf16.msra.mxu1 %v861_v25 }
  0x1c   :  { %518 = vmatpush.bf16.msra.mxu2 %v869_v26 }
  0x1d   :  { %537 = vmatpush.bf16.msra.mxu3 %v877_v27 }
  0x1e   :  { %481 = vmatpush.bf16.msra.mxu0 %v852_v28 }
  0x1f   :  { %500 = vmatpush.bf16.msra.mxu1 %v860_v29 }
  0x20   :  { %519 = vmatpush.bf16.msra.mxu2 %v868_v30  ;;  %v927_v30 = vld [vmem:[%s1174_s2] ss:$0 sm:$0xff] }
  0x21   :  { %538 = vmatpush.bf16.msra.mxu3 %v876_v31  ;;  %482 = vmatmul.bf16.vlgmr.msra.gmra.mxu0 %v603_v41 }
  0x22   :  { %550 = vmatpush.bf16.msrb.mxu0 %v891_v40  ;;  %501 = vmatmul.bf16.vlgmr.msra.gmra.mxu1 %v607_v42 }
  0x23   :  { %520 = vmatmul.bf16.vlgmr.msra.gmra.mxu2 %v611_v43  ;;  %569 = vmatpush.bf16.msrb.mxu1 %v899_v45 }
  0x24   :  { %911 = vmatpush.bf16.msrb.mxu2 %v891_v40  ;;  %539 = vmatmul.bf16.vlgmr.msra.gmra.mxu3 %v615_v44 }
  0x25   :  { %919 = vmatpush.bf16.msrb.mxu3 %v899_v45 }
  0x26   :  { %551 = vmatpush.bf16.msrb.mxu0 %v890_v46 }
  0x27   :  { %570 = vmatpush.bf16.msrb.mxu1 %v898_v47 }
  0x28   :  { %912 = vmatpush.bf16.msrb.mxu2 %v890_v46 }
  0x29   :  { %920 = vmatpush.bf16.msrb.mxu3 %v898_v47 }
  0x2a   :  { %552 = vmatpush.bf16.msrb.mxu0 %v889_v48 }
  0x2b   :  { %571 = vmatpush.bf16.msrb.mxu1 %v897_v49 }
  0x2c   :  { %913 = vmatpush.bf16.msrb.mxu2 %v889_v48 }
  0x2d   :  { %921 = vmatpush.bf16.msrb.mxu3 %v897_v49 }
  0x2e   :  { %553 = vmatpush.bf16.msrb.mxu0 %v888_v50 }
  0x2f   :  { %572 = vmatpush.bf16.msrb.mxu1 %v896_v51 }
  0x30   :  { %914 = vmatpush.bf16.msrb.mxu2 %v888_v50 }
  0x31   :  { %922 = vmatpush.bf16.msrb.mxu3 %v896_v51  ;;  %487 = vmatmul.bf16.gmra.mxu0 %v627_v61 }
  0x32   :  { %554 = vmatpush.bf16.msrb.mxu0 %v887_v60  ;;  %506 = vmatmul.bf16.gmra.mxu1 %v631_v62 }
  0x33   :  { %525 = vmatmul.bf16.gmra.mxu2 %v635_v63  ;;  %573 = vmatpush.bf16.msrb.mxu1 %v895_v1 }
  0x34   :  { %915 = vmatpush.bf16.msrb.mxu2 %v887_v60  ;;  %544 = vmatmul.bf16.gmra.mxu3 %v639_v0 }
  0x35   :  { %923 = vmatpush.bf16.msrb.mxu3 %v895_v1 }
  0x36   :  { %555 = vmatpush.bf16.msrb.mxu0 %v886_v2 }
  0x37   :  { %574 = vmatpush.bf16.msrb.mxu1 %v894_v3 }
  0x38   :  { %916 = vmatpush.bf16.msrb.mxu2 %v886_v2 }
  0x39   :  { %924 = vmatpush.bf16.msrb.mxu3 %v894_v3 }
  0x3a   :  { %556 = vmatpush.bf16.msrb.mxu0 %v885_v4 }
  0x3b   :  { %575 = vmatpush.bf16.msrb.mxu1 %v893_v5 }
  0x3c   :  { %917 = vmatpush.bf16.msrb.mxu2 %v885_v4 }
  0x3d   :  { %925 = vmatpush.bf16.msrb.mxu3 %v893_v5 }
  0x3e   :  { %557 = vmatpush.bf16.msrb.mxu0 %v884_v6 }
  0x3f   :  { %576 = vmatpush.bf16.msrb.mxu1 %v892_v7 }
  0x40   :  { %918 = vmatpush.bf16.msrb.mxu2 %v884_v6 }
  0x41   :  { %926 = vmatpush.bf16.msrb.mxu3 %v892_v7  ;;  %558 = vmatmul.bf16.vlgmr.msrb.gmra.mxu0 %v619_v16 }
  0x42   :  { %577 = vmatmul.bf16.vlgmr.msrb.gmra.mxu1 %v623_v18 }
  0x43   :  { %563 = vmatmul.bf16.vlgmr.msrb.gmra.mxu2 %v643_v17 }
  0x44   :  { %582 = vmatmul.bf16.vlgmr.msrb.gmra.mxu3 %v647_v19 }
  0x9e   :  { %v483_v20 = vpop.f32.mrf.mxu0 }
  0x9f   :  { %v502_v21 = vpop.f32.mrf.mxu1  ;;  %v484_v35 = vadd.f32 %v927_v30, %v483_v20 }
  0xa1   :  { %v503_v36 = vadd.f32 %v502_v21, %v484_v35 }
  0xa6   :  { %v521_v22 = vpop.f32.mrf.mxu2  ;;  %v485_v24 = vpop.f32.mrf.mxu0 }
  0xa7   :  { %v540_v23 = vpop.f32.mrf.mxu3  ;;  %v504_v25 = vpop.f32.mrf.mxu1  ;;  %v486_v37 = vadd.f32 %v927_v30, %v485_v24  ;;  %v522_v42 = vadd.f32 %v521_v22, %v503_v36 }
  0xa9   :  { %v505_v43 = vadd.f32 %v504_v25, %v486_v37  ;;  %v541_v48 = vadd.f32 %v540_v23, %v522_v42 }
  0xae   :  { %v523_v26 = vpop.f32.mrf.mxu2  ;;  %v488_v28 = vpop.f32.mrf.mxu0 }
  0xaf   :  { %v542_v27 = vpop.f32.mrf.mxu3  ;;  %v507_v29 = vpop.f32.mrf.mxu1  ;;  %v489_v40 = vadd.f32 %v927_v30, %v488_v28  ;;  %v524_v45 = vadd.f32 %v523_v26, %v505_v43 }
  0xb1   :  { %v508_v46 = vadd.f32 %v507_v29, %v489_v40  ;;  %v543_v49 = vadd.f32 %v542_v27, %v524_v45 }
  0xb6   :  { %v526_v31 = vpop.f32.mrf.mxu2  ;;  %v490_v33 = vpop.f32.mrf.mxu0 }
  0xb7   :  { %v545_v32 = vpop.f32.mrf.mxu3  ;;  %v509_v34 = vpop.f32.mrf.mxu1  ;;  %v491_v47 = vadd.f32 %v927_v30, %v490_v33  ;;  %v527_v52 = vadd.f32 %v526_v31, %v508_v46 }
  0xb9   :  { %v510_v53 = vadd.f32 %v509_v34, %v491_v47  ;;  %v546_v61 = vadd.f32 %v545_v32, %v527_v52 }
  0xbe   :  { %v528_v38 = vpop.f32.mrf.mxu2  ;;  %v559_v41 = vpop.f32.mrf.mxu0 }
  0xbf   :  { %v547_v39 = vpop.f32.mrf.mxu3  ;;  %v578_v44 = vpop.f32.mrf.mxu1  ;;  %v560_v50 = vadd.f32 %v559_v41, %v541_v48  ;;  %v529_v57 = vadd.f32 %v528_v38, %v510_v53 }
  0xc1   :  { %v579_v59 = vadd.f32 %v578_v44, %v560_v50  ;;  %v548_v63 = vadd.f32 %v547_v39, %v529_v57 }
  0xc6   :  { %v564_v51 = vpop.f32.mrf.mxu2  ;;  %v561_v55 = vpop.f32.mrf.mxu0 }
  0xc7   :  { %v583_v54 = vpop.f32.mrf.mxu3  ;;  %v562_v56 = vadd.f32 %v561_v55, %v543_v49  ;;  %v580_v58 = vpop.f32.mrf.mxu1  ;;  %v565_v0 = vadd.f32 %v564_v51, %v546_v61 }
  0xc9   :  { %v581_v60 = vadd.f32 %v580_v58, %v562_v56  ;;  %v584_v4 = vadd.f32 %v583_v54, %v565_v0 }
  0xcb   :  { %v903_v62 = vpack.c.bf16 %v581_v60, %v579_v59 }
  0xcd   :  { %904 = vst [vmem:[%s1176_s3] sm:$0xff] %v903_v62  }
  0xce   :  { %v566_v1 = vpop.f32.mrf.mxu2 }
  0xcf   :  { %v567_v2 = vadd.f32 %v566_v1, %v548_v63  ;;  %v585_v3 = vpop.f32.mrf.mxu3 }
  0xd1   :  { %v586_v5 = vadd.f32 %v585_v3, %v567_v2 }
  0xd3   :  { %v908_v6 = vpack.c.bf16 %v586_v5, %v584_v4 }
  0xd5   :  { %910 = vst [vmem:[%s1176_s3 + $0x8] sm:$0xff] %v908_v6  }

// kernel: modified_sapiens_vit_forward.5
= control target key start
LH: loop header
LB: loop body
LE: loop exit
PB: predicated region body
PF: predicated region fallthrough
CT: control target
= control target key end

     0   :  { %s1567_s18 = smov 0   ;;  %s1569_s19 = smov 0   ;;  %s2067_s0 = inlined_call_operand.vmem [shape: bf16[2,4,4,32], index: 0, kind: input, shape index: {}, may-alias: {0,1,2}]   ;;  %s2068_s1 = inlined_call_operand.vmem [shape: bf16[2,4,4,32], index: 1, kind: input, shape index: {}, may-alias: {0,1,2}]   ;;  %s2069_s2 = inlined_call_operand.vmem [shape: bf16[2,4,4,32], index: 2, kind: input, shape index: {}, may-alias: {0,1,2}]   ;;  %s2070_s3 = inlined_call_operand.vmem [shape: bf16[288,128], index: 3, kind: input, shape index: {}]   ;;  %s2071_s4 = inlined_call_operand.vmem [shape: f32[1,128], index: 4, kind: input, shape index: {}]   ;;  %s2072_s5 = inlined_call_operand.vmem [shape: f32[2,8,4,256], index: 5, kind: output, shape index: {}]  }
   0x1   :  { %s1571_s20 = smov 0   ;;  %s1573_s21 = smov 0  }
   0x2   :  { %s1575_s22 = smov 0  }
   0x3 LB: > { %s24_s23 = sadd.s32 1, %s1524_s20  ;;  %s27_s24 = sadd.s32 1, %s1528_s21  ;;  %s1532_s22 = sphi %s1575_s22, %s15_s22   ;;  %s1528_s21 = sphi %s1573_s21, %s2079_s21   ;;  %s1524_s20 = sphi %s1571_s20, %s2078_s20   ;;  %s1520_s19 = sphi %s1569_s19, %s2077_s19   ;;  %s1516_s18 = sphi %s1567_s18, %s2076_s18  }
   0x4   : > { %p25_p0 = scmp.ge.s32.totalorder %s24_s23, 2  ;;  %p1323_p1 = scmp.ge.s32.totalorder %s1532_s22, 1 }
   0x5   : > { %p270_p2 = scmp.lt.s32.totalorder %s1532_s22, 5 }
   0x6   : > { %s2081_s23 = smov (%p25_p0, %s24_s23), 0  ;;  %s2083_s24 = smov (!%p25_p0, %s27_s24), %s1528_s21 }
   0x7   : > { %p271_p3 = pnand %p1323_p1, %p270_p2  ;;  %p29_p4 = scmp.ge.s32.totalorder %s2083_s24, 2 }
   0x8   : > { %s1600_s25 = sshll.u32 (!%p271_p3), %s1516_s18, 1  ;;  %p335_p5 = scmp.lt.s32.totalorder (!%p271_p3), %s1520_s19, 1 }
   0x9   : > { %s2085_s24 = smov (%p29_p4, %s2083_s24), 0  ;;  %274 = sbr.rel (%p271_p3) target bundleno = 538 (0x21a), region = 40 }
   0xa   : > { %p350_p6 = scmp.lt.s32.totalorder (!%p271_p3), %s1600_s25, 3  ;;  %s1325_s29 = sadd.s32 (!%p271_p3), 4294967295, %s1600_s25 }
   0xb   : > { %p333_p7 = scmp.gt.s32.totalorder (!%p271_p3), %s1325_s29, 0  ;;  %p1326_p8 = scmp.lt.s32.totalorder (!%p271_p3), %s1325_s29, 3 }
   0xc   : > { %s1431_s9 = sadd.s32 (!%p271_p3), 2, %s1600_s25  ;;  %s1616_s10 = sshll.u32 (!%p271_p3), %s1516_s18, 2 }
   0xd   : > { %p1620_p9 = scmp.lt.s32.totalorder (!%p271_p3), %s1431_s9, 3  ;;  %s412_s12 = sadd.s32 (!%p271_p3), 4, %s1616_s10 }
   0xe   : > { %s2087_s19 = smov (!%p335_p5, %s1520_s19), 1  ;;  %s2089_s29 = smov (!%p333_p7, %s1325_s29), 0  ;;  %vm453_vm0 = vcmask 1040384   ;;  %vm487_vm1 = vcmask 1042432   ;;  %vm686_vm2 = vcmask 261120   ;;  %vm691_vm3 = vcmask 523264  }
   0xf   : > { %s351_s26 = scalar_select %p350_p6, %s1600_s25, 3  ;;  %vm696_vm4 = vcmask 785408   ;;  %vm725_vm5 = vcmask 1043456  }
  0x10   : > { %s1607_s27 = sshll.u32 %s2087_s19, 2  ;;  %s2091_s29 = smov (!%p1326_p8, %s2089_s29), 3 }
  0x11   : > { %s353_s28 = sadd.s32 %s1607_s27, %s351_s26  ;;  %s340_s13 = sadd.s32 %s2091_s29, %s1607_s27 }
  0x12   : > { %s1335_s30 = sshll.u32 %s353_s28, 1  ;;  %s1332_s14 = sshll.u32 %s340_s13, 1 }
  0x13   : > { %s355_s8 = scalar_lea.vmem %s2068_s1, %s1335_s30  ;;  %s342_s17 = scalar_lea.vmem %s2067_s0, %s1332_s14 }
  0x14   : > { %v386_v0 = vld [vmem:[%s355_s8] sm:$0x3]  ;;  %v387_v1 = vld [vmem:[%s355_s8 + $0x2] sm:$0x3]  ;;  %p1632_p10 = scmp.le.s32.totalorder %s412_s12, 7  ;;  %s2093_s9 = smov (!%p1620_p9, %s1431_s9), 3 }
  0x15   : > { %v390_v2 = vunpack.c.l.bf16 %v386_v0  ;;  %v391_v3 = vunpack.c.l.bf16 %v387_v1  ;;  %v385_v10 = vld [vmem:[%s342_s17] sm:$0x3]  ;;  %s1347_s25 = sadd.s32 4294967295, %s1616_s10  ;;  %s2095_s9 = smov (!%p1620_p9, %s2093_s9), 3 }
  0x16   : > { %v389_v11 = vunpack.c.l.bf16 %v385_v10  ;;  %s414_s26 = scalar_select %p1632_p10, 1, 0 }
  0x17   : > { %v1618_v4 = vmul.f32 0.75, %v391_v3  ;;  %v396_v5 = vmul.f32 0.25, %v390_v2  ;;  %v394_v6 = vmul.f32 0.75, %v390_v2  ;;  %v397_v7 = vmul.f32 0.25, %v391_v3  ;;  %s366_s28 = sadd.s32 %s1607_s27, %s2095_s9  ;;  %p1645_p11 = scmp.ge.s32.totalorder %s1347_s25, 0 }
  0x18   : > { %v402_v12 = vmul.f32 0.25, %v389_v11  ;;  %s1341_s29 = sshll.u32 %s366_s28, 1  ;;  %v393_v14 = vmul.f32 0.75, %v389_v11  ;;  %s415_s11 = scvt.s32.f32 %s414_s26 }
  0x19   : > { %v405_v8 = vadd.f32 %v396_v5, %v1618_v4  ;;  %v1627_v9 = vadd.f32 %v397_v7, %v394_v6  ;;  %s368_s8 = scalar_lea.vmem %s2069_s2, %s1341_s29  ;;  %s1534_s12 = smov 32  }
  0x1a   : > { %v1652_v13 = vadd.f32 %v402_v12, %v394_v6  ;;  %v388_v16 = vld [vmem:[%s368_s8] sm:$0x3]  ;;  %s410_s27 = scalar_select %p1645_p11, 1, 0  ;;  %v399_v25 = vadd.f32 %v396_v5, %v393_v14  ;;  %v418_v28 = vstv %s415_s11 }
  0x1b   : > { %435 = vst [vmem:[#allocation1 + $0x30] ss:$2 sm:$0xff] %v405_v8  ;;  %v392_v19 = vunpack.c.l.bf16 %v388_v16  ;;  %v503_v20 = vmul.f32 0.75, %v405_v8  ;;  %v502_v23 = vmul.f32 0.75, %v1627_v9  ;;  %s1535_s13 = smov 96   ;;  %s1536_s14 = smov 64  }
  0x1c   : > { %432 = vst [vmem:[#allocation1 + $0x20] ss:$2 sm:$0xff] %v1627_v9  ;;  %s411_s9 = scvt.s32.f32 %s410_s27  ;;  %v501_v46 = vmul.f32 0.75, %v1652_v13  ;;  %p376_p12 = scmp.lt.s32.totalorder %s1616_s10, 7 }
  0x1d   : > { %v403_v24 = vmul.f32 0.75, %v392_v19  ;;  %429 = vst [vmem:[#allocation1 + $0x10] ss:$2 sm:$0xff] %v1652_v13  ;;  %v398_v41 = vmul.f32 0.25, %v392_v19  ;;  %s1344_s28 = sshll.u32 %s2087_s19, 4 }
  0x1e   : > { %v416_v32 = vstv %s411_s9  ;;  %s2097_s10 = smov (!%p376_p12, %s1616_s10), 7 }
  0x1f   : > { %v406_v30 = vadd.f32 %v403_v24, %v397_v7  ;;  %v1668_v35 = vmul.f32 %v416_v32, %v399_v25  ;;  %v1687_v51 = vadd.f32 %v398_v41, %v1618_v4 }
  0x21   : > { %v1666_v34 = vmul.f32 %v418_v28, %v406_v30  ;;  %426 = vst [vmem:[#allocation1] ss:$2 sm:$0xff] %v1668_v35  ;;  %v500_v57 = vmul.f32 0.75, %v1668_v35 }
  0x22   : > { %v436_v15 = vld.sshfl [vmem:[#allocation1 + $0x30] sm:$0xff pattern:$0x75316420] }
  0x23   : > { %v444_v17 = vrot.slane %v436_v15, 7  ;;  %469 = vst [vmem:[#allocation1 + $0x30] ss:$2 sm:$0xff] %v405_v8  ;;  %v433_v18 = vld.sshfl [vmem:[#allocation1 + $0x20] sm:$0xff pattern:$0x75316420] }
  0x24   : > { %v443_v21 = vrot.slane %v433_v18, 7  ;;  %466 = vst [vmem:[#allocation1 + $0x20] ss:$2 sm:$0xff] %v1627_v9  ;;  %v430_v40 = vld.sshfl [vmem:[#allocation1 + $0x10] sm:$0xff pattern:$0x75316420] }
  0x25   : > { %v457_v22 = vsel %vm453_vm0, %v405_v8, %v444_v17  ;;  %v442_v43 = vrot.slane %v430_v40, 7  ;;  %439 = vst [vmem:[#allocation1 + $0x10] ss:$2 sm:$0xff] %v1666_v34  ;;  %v505_v61 = vmul.f32 0.75, %v1666_v34 }
  0x26   : > { %v497_v26 = vmul.f32 0.25, %v457_v22  ;;  %v456_v27 = vsel %vm453_vm0, %v1627_v9, %v443_v21 }
  0x27   : > { %v496_v29 = vmul.f32 0.25, %v456_v27  ;;  %v455_v48 = vsel %vm453_vm0, %v1652_v13, %v442_v43 }
  0x28   : > { %v1662_v31 = vadd.f32 %v503_v20, %v497_v26  ;;  %v495_v50 = vmul.f32 0.25, %v455_v48  ;;  %v427_v54 = vld.sshfl [vmem:[#allocation1] sm:$0xff pattern:$0x75316420] }
  0x29   : > { %v1664_v33 = vadd.f32 %v502_v23, %v496_v29  ;;  %v441_v55 = vrot.slane %v427_v54, 7  ;;  %437 = vst [vmem:[#allocation1] ss:$2 sm:$0xff] %v1687_v51 }
  0x2a   : > { %v470_v36 = vld.sshfl [vmem:[#allocation1 + $0x30] sm:$0xff pattern:$0x75316420]  ;;  %593 = vrot.lane.b32.xlu2 %v1662_v31, %s1534_s12  ;;  %v1692_v53 = vadd.f32 %v501_v46, %v495_v50 }
  0x2b   : > { %v478_v37 = vrot.slane %v470_v36, 1  ;;  %v467_v38 = vld.sshfl [vmem:[#allocation1 + $0x20] sm:$0xff pattern:$0x75316420]  ;;  %674 = vrot.lane.b32.xlu0 %v1664_v33, %s1535_s13  ;;  %591 = vrot.lane.b32.xlu1 %v1664_v33, %s1534_s12  ;;  %v454_v58 = vsel %vm453_vm0, %v1668_v35, %v441_v55 }
  0x2c   : > { %v477_v39 = vrot.slane %v467_v38, 1  ;;  %v440_v56 = vld.sshfl [vmem:[#allocation1 + $0x10] sm:$0xff pattern:$0x75316420]  ;;  %v494_v60 = vmul.f32 0.25, %v454_v58 }
  0x2d   : > { %v491_v42 = vsel %vm487_vm1, %v478_v37, %v405_v8  ;;  %463 = vst [vmem:[#allocation1 + $0x10] ss:$2 sm:$0xff] %v1652_v13  ;;  %v446_v59 = vrot.slane %v440_v56, 7  ;;  %v504_v8 = vmul.f32 0.75, %v1687_v51 }
  0x2e   : > { %v515_v44 = vmul.f32 0.25, %v491_v42  ;;  %v490_v45 = vsel %vm487_vm1, %v477_v39, %v1627_v9  ;;  %v1707_v63 = vadd.f32 %v500_v57, %v494_v60 }
  0x2f   : > { %v514_v47 = vmul.f32 0.25, %v490_v45  ;;  %v459_v62 = vsel %vm453_vm0, %v1666_v34, %v446_v59 }
  0x30   : > { %v1684_v49 = vadd.f32 %v515_v44, %v503_v20  ;;  %v499_v0 = vmul.f32 0.25, %v459_v62  ;;  %v438_v4 = vld.sshfl [vmem:[#allocation1] sm:$0xff pattern:$0x75316420] }
  0x31   : > { %v1689_v52 = vadd.f32 %v514_v47, %v502_v23  ;;  %460 = vst [vmem:[#allocation1] ss:$2 sm:$0xff] %v1668_v35  ;;  %v445_v7 = vrot.slane %v438_v4, 7 }
  0x32   : > { %539 = vst [vmem:[#allocation1 + $0x30] ss:$2 sm:$0xff] %v1684_v49  ;;  %587 = vrot.lane.b32.xlu2 %v1707_v63, %s1534_s12  ;;  %v1711_v2 = vadd.f32 %v505_v61, %v499_v0  ;;  %v571_v0 = vrot.slane %v1664_v33, 1 }
  0x33   : > { %536 = vst [vmem:[#allocation1 + $0x20] ss:$2 sm:$0xff] %v1689_v52  ;;  %676 = vrot.lane.b32.xlu1 %v1662_v31, %s1535_s13  ;;  %589 = vrot.lane.b32.xlu0 %v1692_v53, %s1534_s12  ;;  %v458_v10 = vsel %vm453_vm0, %v1687_v51, %v445_v7 }
  0x34   : > { %v464_v5 = vld.sshfl [vmem:[#allocation1 + $0x10] sm:$0xff pattern:$0x75316420]  ;;  %v498_v12 = vmul.f32 0.25, %v458_v10  ;;  %v574_v60 = vrot.slane %v1711_v2, 1 }
  0x35   : > { %473 = vst [vmem:[#allocation1 + $0x10] ss:$2 sm:$0xff] %v1666_v34  ;;  %v476_v6 = vrot.slane %v464_v5, 1  ;;  %v1800_v5 = vsel %vm487_vm1, %v571_v0, 0.0 }
  0x36   : > { %v1726_v16 = vadd.f32 %v504_v8, %v498_v12 }
  0x37   : > { %v489_v9 = vsel %vm487_vm1, %v476_v6, %v1652_v13  ;;  %v570_v6 = vrot.slane %v1692_v53, 1 }
  0x38   : > { %v513_v11 = vmul.f32 0.25, %v489_v9  ;;  %v461_v18 = vld.sshfl [vmem:[#allocation1] sm:$0xff pattern:$0x75316420]  ;;  %v573_v62 = vrot.slane %v1726_v16, 1  ;;  %v572_v9 = vrot.slane %v1662_v31, 1 }
  0x39   : > { %v540_v1 = vld.sshfl [vmem:[#allocation1 + $0x30] sm:$0xff pattern:$0x75316420]  ;;  %471 = vst [vmem:[#allocation1] ss:$2 sm:$0xff] %v1687_v51  ;;  %v475_v13 = vrot.slane %v461_v18, 1 }
  0x3a   : > { %608 = vst [vmem:[#allocation1 + $0x30] ss:$2 sm:$0xff] %v1684_v49  ;;  %v537_v3 = vld.sshfl [vmem:[#allocation1 + $0x20] sm:$0xff pattern:$0x75316420]  ;;  %v1724_v15 = vadd.f32 %v513_v11, %v501_v46  ;;  %678 = vrot.lane.b32.xlu2 %v1726_v16, %s1535_s13  ;;  %v548_v36 = vrot.slane %v540_v1, 7 }
  0x3b   : > { %605 = vst [vmem:[#allocation1 + $0x20] ss:$2 sm:$0xff] %v1689_v52  ;;  %680 = vrot.lane.b32.xlu0 %v1711_v2, %s1535_s13  ;;  %v547_v21 = vrot.slane %v537_v3, 7  ;;  %v488_v22 = vsel %vm487_vm1, %v475_v13, %v1668_v35  ;;  %v585_v4 = vsel %vm487_vm1, %v573_v62, 0.0  ;;  %v582_v7 = vsel %vm487_vm1, %v570_v6, 0.0 }
  0x3c   : > { %v474_v19 = vld.sshfl [vmem:[#allocation1 + $0x10] sm:$0xff pattern:$0x75316420]  ;;  %v512_v23 = vmul.f32 0.25, %v488_v22  ;;  %v1753_v39 = vsel %vm453_vm0, 0.0, %v548_v36  ;;  %v1810_v10 = vsel %vm487_vm1, %v572_v9, 0.0 }
  0x3d   : > { %533 = vst [vmem:[#allocation1 + $0x10] ss:$2 sm:$0xff] %v1724_v15  ;;  %v480_v20 = vrot.slane %v474_v19, 1  ;;  %v1742_v27 = vsel %vm453_vm0, 0.0, %v547_v21  ;;  %v569_v11 = vrot.slane %v1707_v63, 1 }
  0x3e   : > { %v1739_v26 = vadd.f32 %v512_v23, %v500_v57  ;;  %v1439_v23 = vld [vmem:[%s2070_s3 + $0x38] sm:$0xff] }
  0x3f   : > { %v493_v24 = vsel %vm487_vm1, %v480_v20, %v1666_v34  ;;  %911 = vmatpush.bf16.msra.mxu0 %v1439_v23  ;;  %1121 = vmatpush.bf16.msra.mxu3 %v1439_v23 }
  0x40   : > { %v517_v25 = vmul.f32 0.25, %v493_v24  ;;  %v472_v30 = vld.sshfl [vmem:[#allocation1] sm:$0xff pattern:$0x75316420]  ;;  %v1447_v24 = vld [vmem:[%s2070_s3 + $0x78] sm:$0xff] }
  0x41   : > { %v609_v14 = vld.sshfl [vmem:[#allocation1 + $0x30] sm:$0xff pattern:$0x75316420]  ;;  %530 = vst [vmem:[#allocation1] ss:$2 sm:$0xff] %v1739_v26  ;;  %v479_v32 = vrot.slane %v472_v30, 1  ;;  %925 = vmatpush.bf16.msra.mxu1 %v1447_v24 }
  0x42   : > { %616 = vrot.lane.b32.xlu1 %v609_v14, %s1536_s14  ;;  %v606_v17 = vld.sshfl [vmem:[#allocation1 + $0x20] sm:$0xff pattern:$0x75316420]  ;;  %v523_v28 = vadd.f32 %v517_v25, %v505_v61  ;;  %662 = vrot.lane.b32.xlu2 %v1742_v27, %s1536_s14  ;;  %v586_v61 = vsel %vm487_vm1, %v574_v60, 0.0  ;;  %v581_v14 = vsel %vm487_vm1, %v569_v11, 0.0 }
  0x43   : > { %644 = vst [vmem:[#allocation1 + $0x20] ss:$2 sm:$0xff] %v1684_v49  ;;  %614 = vrot.lane.b32.xlu0 %v606_v17, %s1536_s14  ;;  %v492_v34 = vsel %vm487_vm1, %v479_v32, %v1687_v51  ;;  %v1437_v32 = vld [vmem:[%s2070_s3 + $0x28] sm:$0xff]  ;;  %v1432_v60 = vld [vmem:[%s2070_s3] sm:$0xff] }
  0x44   : > { %v534_v35 = vld.sshfl [vmem:[#allocation1 + $0x10] sm:$0xff pattern:$0x75316420]  ;;  %v516_v37 = vmul.f32 0.25, %v492_v34 }
  0x45   : > { %543 = vst [vmem:[#allocation1 + $0x10] ss:$2 sm:$0xff] %v523_v28  ;;  %v546_v42 = vrot.slane %v534_v35, 7  ;;  %v1870_v35 = vld [vmem:[%s2070_s3 + $0x68] sm:$0xff] }
  0x46   : > { %v1750_v38 = vadd.f32 %v516_v37, %v504_v8  ;;  %v1436_v37 = vld [vmem:[%s2070_s3 + $0x20] sm:$0xff] }
  0x47   : > { %v1763_v43 = vsel %vm453_vm0, 0.0, %v546_v42  ;;  %v1435_v42 = vld [vmem:[%s2070_s3 + $0x18] sm:$0xff] }
  0x48   : > { %v1755_v40 = vld.sshfl [vmem:[#allocation1] sm:$0xff pattern:$0x75316420]  ;;  %647 = vst [vmem:[#allocation1 + $0x30] ss:$2 sm:$0xff] %v1750_v38 }
  0x49   : > { %541 = vst [vmem:[#allocation1] ss:$2 sm:$0xff] %v1750_v38  ;;  %v545_v11 = vrot.slane %v1755_v40, 7 }
  0x4a   : > { %v645_v29 = vld.sshfl [vmem:[#allocation1 + $0x20] sm:$0xff pattern:$0x75316420]  ;;  %664 = vrot.lane.b32.xlu2 %v1753_v39, %s1536_s14 }
  0x4b   : > { %653 = vrot.lane.b32.xlu1 %v645_v29, %s1534_s12  ;;  %v1446_v29 = vld [vmem:[%s2070_s3 + $0x70] sm:$0xff] }
  0x4c   : > { %v544_v41 = vld.sshfl [vmem:[#allocation1 + $0x10] sm:$0xff pattern:$0x75316420]  ;;  %926 = vmatpush.bf16.msra.mxu1 %v1446_v29 }
  0x4d   : > { %602 = vst [vmem:[#allocation1 + $0x10] ss:$2 sm:$0xff] %v1724_v15  ;;  %v550_v46 = vrot.slane %v544_v41, 7  ;;  %v1444_v41 = vld [vmem:[%s2070_s3 + $0x60] sm:$0xff] }
  0x4f   : > { %v648_v44 = vld.sshfl [vmem:[#allocation1 + $0x30] sm:$0xff pattern:$0x75316420]  ;;  %v562_v51 = vsel %vm453_vm0, 0.0, %v550_v46 }
  0x50   : > { %742 = vst [vmem:[#allocation1 + $0x30] ss:$2 sm:$0xff] %v1750_v38  ;;  %v542_v45 = vld.sshfl [vmem:[#allocation1] sm:$0xff pattern:$0x75316420]  ;;  %927 = vmatpush.bf16.msra.mxu1 %v1870_v35 }
  0x51   : > { %744 = vst [vmem:[#allocation1 + $0x31] ss:$2 sm:$0xff] %v523_v28  ;;  %v549_v47 = vrot.slane %v542_v45, 7 }
  0x52   : > { %626 = vrot.lane.b32.xlu2 %v1763_v43, %s1535_s13  ;;  %599 = vst [vmem:[#allocation1] ss:$2 sm:$0xff] %v1739_v26 }
  0x53   : > { %655 = vrot.lane.b32.xlu1 %v648_v44, %s1534_s12  ;;  %v561_v50 = vsel %vm453_vm0, 0.0, %v549_v47  ;;  %v1887_v44 = vld [vmem:[%s2070_s3 + $0x58] sm:$0xff]  ;;  %v1434_v47 = vld [vmem:[%s2070_s3 + $0x10] sm:$0xff] }
  0x54   : > { %v603_v48 = vld.sshfl [vmem:[#allocation1 + $0x10] sm:$0xff pattern:$0x75316420]  ;;  %666 = vrot.lane.b32.xlu0 %v561_v50, %s1536_s14  ;;  %928 = vmatpush.bf16.msra.mxu1 %v1444_v41 }
  0x55   : > { %641 = vst [vmem:[#allocation1 + $0x10] ss:$2 sm:$0xff] %v1689_v52 }
  0x58   : > { %v1774_v54 = vld.sshfl [vmem:[#allocation1 + $0x30] sm:$0xff pattern:$0x75316420]  ;;  %929 = vmatpush.bf16.msra.mxu1 %v1887_v44 }
  0x59   : > { %966 = vst [vmem:[#allocation1 + $0x30] ss:$2 sm:$0xff] %v1684_v49  ;;  %v600_v55 = vld.sshfl [vmem:[#allocation1] sm:$0xff pattern:$0x75316420] }
  0x5a   : > { %612 = vrot.lane.b32.xlu2 %v603_v48, %s1536_s14  ;;  %638 = vst [vmem:[#allocation1] ss:$2 sm:$0xff] %v1724_v15  ;;  %v1900_v48 = vld [vmem:[%s2070_s3 + $0x50] sm:$0xff] }
  0x5b   : > { %668 = vrot.lane.b32.xlu1 %v562_v51, %s1536_s14 }
  0x5c   : > { %v642_v56 = vld.sshfl [vmem:[#allocation1 + $0x10] sm:$0xff pattern:$0x75316420]  ;;  %930 = vmatpush.bf16.msra.mxu1 %v1900_v48 }
  0x5d   : > { %734 = vst [vmem:[#allocation1 + $0x10] ss:$2 sm:$0xff] %v1689_v52  ;;  %651 = vrot.lane.b32.xlu0 %v642_v56, %s1534_s12  ;;  %v1912_v56 = vld [vmem:[%s2070_s3 + $0x48] sm:$0xff] }
  0x5e   : > { %736 = vst [vmem:[#allocation1 + $0x11] ss:$2 sm:$0xff] %v1684_v49 }
  0x60   : > { %v967_v57 = vld.sshfl [vmem:[#allocation1 + $0x30] sm:$0xff pattern:$0x75316420]  ;;  %931 = vmatpush.bf16.msra.mxu1 %v1912_v56 }
  0x61   : > { %1033 = vst [vmem:[#allocation1 + $0x30] ss:$2 sm:$0xff] %v523_v28  ;;  %v639_v58 = vld.sshfl [vmem:[#allocation1] sm:$0xff pattern:$0x75316420]  ;;  %v1438_v28 = vld [vmem:[%s2070_s3 + $0x30] sm:$0xff] }
  0x62   : > { %632 = vrot.lane.b32.xlu2 %v561_v50, %s1535_s13  ;;  %912 = vmatpush.bf16.msra.mxu0 %v1438_v28  ;;  %v1449_v50 = vld [vmem:[%s2070_s3 + $0x88] sm:$0xff] }
  0x63   : > { %610 = vrot.lane.b32.xlu1 %v600_v55, %s1536_s14  ;;  %1122 = vmatpush.bf16.msra.mxu3 %v1438_v28  ;;  %v1433_v55 = vld [vmem:[%s2070_s3 + $0x8] sm:$0xff] }
  0x64   : > { %945 = vmatpush.bf16.msra.mxu2 %v1449_v50 }
  0x65   : > { %v1785_v59 = vld.sshfl [vmem:[#allocation1 + $0x10] sm:$0xff pattern:$0x75316420]  ;;  %649 = vrot.lane.b32.xlu0 %v639_v58, %s1534_s12 }
  0x66   : > { %960 = vst [vmem:[#allocation1 + $0x10] ss:$2 sm:$0xff] %v1724_v15  ;;  %913 = vmatpush.bf16.msra.mxu0 %v1437_v32  ;;  %v759_v0 = vpack.c.bf16 %v1774_v54, %v1785_v59 }
  0x67   : > { %1123 = vmatpush.bf16.msra.mxu3 %v1437_v32 }
  0x68   : > { %v1034_v1 = vld.sshfl [vmem:[#allocation1 + $0x30] sm:$0xff pattern:$0x75316420] }
  0x69   : > { %1102 = vst [vmem:[#allocation1 + $0x31] ss:$2 sm:$0xff] %v586_v61  ;;  %v1924_v61 = vld [vmem:[%s2070_s3 + $0x40] sm:$0xff] }
  0x6a   : > { %1100 = vst [vmem:[#allocation1 + $0x30] ss:$2 sm:$0xff] %v585_v4  ;;  %1004 = vrot.lane.b32.xlu2 %v1810_v10, %s1534_s12  ;;  %914 = vmatpush.bf16.msra.mxu0 %v1436_v37 }
  0x6b   : > { %630 = vrot.lane.b32.xlu1 %v1753_v39, %s1535_s13  ;;  %1124 = vmatpush.bf16.msra.mxu3 %v1436_v37 }
  0x6c   : > { %932 = vmatpush.bf16.msra.mxu1 %v1924_v61 }
  0x6d   : > { %v961_v3 = vld.sshfl [vmem:[#allocation1 + $0x10] sm:$0xff pattern:$0x75316420]  ;;  %628 = vrot.lane.b32.xlu0 %v1742_v27, %s1535_s13 }
  0x6e   : > { %1027 = vst [vmem:[#allocation1 + $0x10] ss:$2 sm:$0xff] %v1684_v49  ;;  %915 = vmatpush.bf16.msra.mxu0 %v1435_v42 }
  0x6f   : > { %1125 = vmatpush.bf16.msra.mxu3 %v1435_v42 }
  0x72   : > { %1014 = vrot.lane.b32.xlu2 %v1662_v31, %s1536_s14  ;;  %916 = vmatpush.bf16.msra.mxu0 %v1434_v47 }
  0x73   : > { %1002 = vrot.lane.b32.xlu1 %v1800_v5, %s1534_s12  ;;  %1126 = vmatpush.bf16.msra.mxu3 %v1434_v47 }
  0x75   : > { %v1028_v8 = vld.sshfl [vmem:[#allocation1 + $0x10] sm:$0xff pattern:$0x75316420]  ;;  %1000 = vrot.lane.b32.xlu0 %v582_v7, %s1534_s12 }
  0x76   : > { %1092 = vst [vmem:[#allocation1 + $0x10] ss:$2 sm:$0xff] %v1800_v5  ;;  %917 = vmatpush.bf16.msra.mxu0 %v1433_v55 }
  0x77   : > { %1094 = vst [vmem:[#allocation1 + $0x11] ss:$2 sm:$0xff] %v1810_v10  ;;  %1127 = vmatpush.bf16.msra.mxu3 %v1433_v55 }
  0x7a   : > { %974 = vrot.lane.b32.xlu2 %v967_v57, %s1534_s12  ;;  %v1448_v57 = vld [vmem:[%s2070_s3 + $0x80] sm:$0xff]  ;;  %918 = vmatpush.bf16.msra.mxu0 %v1432_v60 }
  0x7b   : > { %1012 = vrot.lane.b32.xlu1 %v1664_v33, %s1536_s14  ;;  %946 = vmatpush.bf16.msra.mxu2 %v1448_v57 }
  0x7c   : > { %1128 = vmatpush.bf16.msra.mxu3 %v1432_v60 }
  0x7d   : > { %1006 = vrot.lane.b32.xlu0 %v585_v4, %s1534_s12 }
  0x7e   : > { %1420 = vmatmul.msk.bf16.vlgmr.msra.gmra.mxu2 %vm686_vm2, %v759_v0  ;;  %1155 = vmatpush.bf16.msrb.mxu0 %v1449_v50 }
  0x7f   : > { %1135 = vmatpush.bf16.msrb.mxu2 %v1447_v24 }
  0x82   : > { %986 = vrot.lane.b32.xlu2 %v582_v7, %s1536_s14  ;;  %1156 = vmatpush.bf16.msrb.mxu0 %v1448_v57 }
  0x83   : > { %1018 = vrot.lane.b32.xlu1 %v1711_v2, %s1536_s14  ;;  %1136 = vmatpush.bf16.msrb.mxu2 %v1446_v29 }
  0x84   : > { %v1825_v12 = vpop.permute.xlu2 %593 }
  0x85   : > { %1016 = vrot.lane.b32.xlu0 %v1726_v16, %s1536_s14  ;;  %v690_v6 = vsel %vm686_vm2, %v1753_v39, %v1825_v12 }
  0x87   : > { %1137 = vmatpush.bf16.msrb.mxu2 %v1870_v35 }
  0x8b   : > { %984 = vrot.lane.b32.xlu1 %v581_v14, %s1536_s14  ;;  %v557_v14 = vsel %vm453_vm0, 0.0, %v545_v11  ;;  %1138 = vmatpush.bf16.msrb.mxu2 %v1444_v41 }
  0x8c   : > { %v1831_v17 = vpop.permute.xlu2 %587 }
  0x8d   : > { %1041 = vrot.lane.b32.xlu0 %v1034_v1, %s1535_s13  ;;  %v687_v40 = vsel %vm686_vm2, %v557_v14, %v1831_v17 }
  0x8f   : > { %1139 = vmatpush.bf16.msrb.mxu2 %v1887_v44 }
  0x93   : > { %1037 = vrot.lane.b32.xlu1 %v1028_v8, %s1535_s13  ;;  %1140 = vmatpush.bf16.msrb.mxu2 %v1900_v48 }
  0x94   : > { %v1836_v2 = vpop.permute.xlu2 %678 }
  0x95   : > { %970 = vrot.lane.b32.xlu0 %v961_v3, %s1534_s12 }
  0x97   : > { %1141 = vmatpush.bf16.msrb.mxu2 %v1912_v56 }
  0x9b   : > { %1142 = vmatpush.bf16.msrb.mxu2 %v1924_v61 }
  0x9c   : > { %v1842_v13 = vpop.permute.xlu2 %662 }
  0x9d   : > { %v1838_v18 = vpop.permute.xlu1 %591  ;;  %v1840_v19 = vpop.permute.xlu0 %674 }
  0xa4   : > { %v1848_v22 = vpop.permute.xlu2 %664 }
  0xa5   : > { %v1844_v20 = vpop.permute.xlu1 %676  ;;  %v1846_v21 = vpop.permute.xlu0 %589 }
  0xa6   : > { %v688_v44 = vsel %vm686_vm2, %v1763_v43, %v1846_v21 }
  0xac   : > { %v1872_v36 = vpop.permute.xlu2 %626 }
  0xad   : > { %v681_v30 = vpop.permute.xlu0 %680 }
  0xb4   : > { %v1856_v25 = vpop.permute.xlu1 %616  ;;  %v1892_v46 = vpop.permute.xlu2 %612 }
  0xb5   : > { %v1889_v45 = vpop.permute.xlu0 %614  ;;  %v695_v54 = vsel %vm691_vm3, %v690_v6, %v1856_v25 }
  0xbc   : > { %v633_v3 = vpop.permute.xlu2 %632 }
  0xbd   : > { %v654_v34 = vpop.permute.xlu1 %653  ;;  %v700_v7 = vsel %vm696_vm4, %v695_v54, %v633_v3 }
  0xbe   : > { %v703_v39 = vsel %vm686_vm2, %v1662_v31, %v654_v34  ;;  %v689_v34 = vsel %vm686_vm2, %v1742_v27, %v1838_v18 }
  0xbf   : > { %v694_v37 = vsel %vm691_vm3, %v689_v34, %v1889_v45  ;;  %v693_v45 = vsel %vm691_vm3, %v688_v44, %v1892_v46 }
  0xc4   : > { %v1005_v21 = vpop.permute.xlu2 %1004 }
  0xc5   : > { %v656_v51 = vpop.permute.xlu1 %655 }
  0xc6   : > { %v667_v58 = vpop.permute.xlu0 %666  ;;  %v704_v62 = vsel %vm686_vm2, %v1726_v16, %v656_v51 }
  0xc7   : > { %v707_v23 = vsel %vm691_vm3, %v703_v39, %v667_v58 }
  0xc8   : > { %v711_v28 = vsel %vm696_vm4, %v707_v23, %v1836_v2 }
  0xc9   : > { %v723_v41 = vrot.slane %v711_v28, 4 }
  0xcc   : > { %v1015_v54 = vpop.permute.xlu2 %1014 }
  0xcd   : > { %v669_v1 = vpop.permute.xlu1 %668 }
  0xce   : > { %v708_v4 = vsel %vm691_vm3, %v704_v62, %v669_v1 }
  0xcf   : > { %v712_v16 = vsel %vm696_vm4, %v708_v4, %v681_v30  ;;  %v652_v8 = vpop.permute.xlu0 %651 }
  0xd0   : > { %v724_v59 = vrot.slane %v712_v16, 4  ;;  %v702_v24 = vsel %vm686_vm2, %v1664_v33, %v652_v8 }
  0xd1   : > { %v706_v30 = vsel %vm691_vm3, %v702_v24, %v1848_v22 }
  0xd2   : > { %v729_v9 = vsel %vm725_vm5, %v700_v7, %v724_v59  ;;  %v710_v47 = vsel %vm696_vm4, %v706_v30, %v1844_v20  ;;  %v1061_v7 = vsel %vm686_vm2, %v1684_v49, %v1005_v21 }
  0xd3   : > { %740 = vst [vmem:[#allocation1 + $0x21] ss:$2 sm:$0xff] %v729_v9  ;;  %v722_v51 = vrot.slane %v710_v47, 4 }
  0xd5   : > { %v611_v12 = vpop.permute.xlu1 %610 }
  0xd6   : > { %v692_v32 = vsel %vm691_vm3, %v687_v40, %v611_v12  ;;  %v975_v12 = vpop.permute.xlu2 %974 }
  0xd7   : > { %v650_v25 = vpop.permute.xlu0 %649 }
  0xd8   : > { %v701_v29 = vsel %vm686_vm2, %v1692_v53, %v650_v25 }
  0xd9   : > { %v705_v35 = vsel %vm691_vm3, %v701_v29, %v1842_v13  ;;  %v697_v13 = vsel %vm696_vm4, %v692_v32, %v1872_v36 }
  0xda   : > { %v709_v17 = vsel %vm696_vm4, %v705_v35, %v1840_v19 }
  0xdb   : > { %v721_v42 = vrot.slane %v709_v17, 4 }
  0xdd   : > { %v631_v22 = vpop.permute.xlu1 %630  ;;  %v726_v27 = vsel %vm725_vm5, %v697_v13, %v721_v42 }
  0xde   : > { %v699_v50 = vsel %vm696_vm4, %v694_v37, %v631_v22  ;;  %730 = vst [vmem:[#allocation1] ss:$2 sm:$0xff] %v726_v27  ;;  %v987_v40 = vpop.permute.xlu2 %986  ;;  %v1105_v37 = vld.sshfl [vmem:[#allocation1 + $0x10] sm:$0xff pattern:$0x75316420]  ;;  %v1050_v22 = vsel %vm686_vm2, %v1662_v31, %v975_v12 }
  0xdf   : > { %v728_v18 = vsel %vm725_vm5, %v699_v50, %v723_v41  ;;  %v629_v55 = vpop.permute.xlu0 %628  ;;  %v1108_v41 = vld.sshfl [vmem:[#allocation1 + $0x30] sm:$0xff pattern:$0x75316420] }
  0xe0   : > { %738 = vst [vmem:[#allocation1 + $0x20] ss:$2 sm:$0xff] %v728_v18  ;;  %v698_v36 = vsel %vm696_vm4, %v693_v45, %v629_v55  ;;  %v1117_v42 = vpack.c.bf16 %v1108_v41, %v1105_v37 }
  0xe1   : > { %v727_v57 = vsel %vm725_vm5, %v698_v36, %v722_v51 }
  0xe2   : > { %732 = vst [vmem:[#allocation1 + $0x1] ss:$2 sm:$0xff] %v727_v57 }
  0xe5   : > { %v1003_v58 = vpop.permute.xlu1 %1002 }
  0xe6   : > { %v1060_v14 = vsel %vm686_vm2, %v1689_v52, %v1003_v58 }
  0xe7   : > { %v748_v60 = vld.sshfl [vmem:[#allocation1 + $0x20] sm:$0xff pattern:$0x75316420]  ;;  %v749_v62 = vld.sshfl [vmem:[#allocation1 + $0x28] sm:$0xff pattern:$0x75316420]  ;;  %v1001_v43 = vpop.permute.xlu0 %1000 }
  0xe8   : > { %963 = vst [vmem:[#allocation1 + $0x20] ss:$2 sm:$0xff] %v1689_v52  ;;  %v1059_v46 = vsel %vm686_vm2, %v1724_v15, %v1001_v43 }
  0xe9   : > { %v745_v48 = vld.sshfl [vmem:[#allocation1] sm:$0xff pattern:$0x75316420]  ;;  %v746_v0 = vld.sshfl [vmem:[#allocation1 + $0x8] sm:$0xff pattern:$0x75316420] }
  0xea   : > { %v757_v1 = vpack.c.bf16 %v748_v60, %v745_v48  ;;  %v758_v3 = vpack.c.bf16 %v749_v62, %v746_v0  ;;  %957 = vst [vmem:[#allocation1] ss:$2 sm:$0xff] %v1739_v26 }
  0xec   : > { %919 = vmatmul.bf16.vlgmr.msra.gmra.mxu0 %v757_v1  ;;  %933 = vmatmul.bf16.vlgmr.msra.gmra.mxu1 %v758_v3 }
  0xed   : > { %v1013_v4 = vpop.permute.xlu1 %1012 }
  0xee   : > { %v1063_v56 = vsel %vm691_vm3, %v1059_v46, %v1013_v4 }
  0xef   : > { %v964_v6 = vld.sshfl [vmem:[#allocation1 + $0x20] sm:$0xff pattern:$0x75316420]  ;;  %v1007_v61 = vpop.permute.xlu0 %1006 }
  0xf0   : > { %972 = vrot.lane.b32.xlu1 %v964_v6, %s1534_s12  ;;  %1030 = vst [vmem:[#allocation1 + $0x20] ss:$2 sm:$0xff] %v1750_v38  ;;  %v1062_v15 = vsel %vm686_vm2, %v1750_v38, %v1007_v61 }
  0xf1   : > { %v958_v16 = vld.sshfl [vmem:[#allocation1] sm:$0xff pattern:$0x75316420] }
  0xf2   : > { %1024 = vst [vmem:[#allocation1] ss:$2 sm:$0xff] %v1689_v52 }
  0xf5   : > { %v1019_v59 = vpop.permute.xlu1 %1018 }
  0xf6   : > { %v1066_v26 = vsel %vm691_vm3, %v1062_v15, %v1019_v59 }
  0xf7   : > { %v1031_v8 = vld.sshfl [vmem:[#allocation1 + $0x20] sm:$0xff pattern:$0x75316420]  ;;  %v1017_v9 = vpop.permute.xlu0 %1016 }
  0xf8   : > { %990 = vrot.lane.b32.xlu1 %v1810_v10, %s1536_s14  ;;  %1039 = vrot.lane.b32.xlu2 %v1031_v8, %s1535_s13  ;;  %v1065_v11 = vsel %vm691_vm3, %v1061_v7, %v1017_v9  ;;  %v1064_v10 = vsel %vm691_vm3, %v1060_v14, %v1015_v54 }
  0xf9   : > { %v1025_v39 = vld.sshfl [vmem:[#allocation1] sm:$0xff pattern:$0x75316420] }
  0xfa   : > { %1035 = vrot.lane.b32.xlu0 %v1025_v39, %s1535_s13 }
  0xfc   : > { %1421 = vmatmul.msk.bf16.vlgmr.msrb.gmra.mxu0 %vm686_vm2, %v1117_v42 }
  0xfd   : > { %v985_v38 = vpop.permute.xlu1 %984 }
  0xff   : > { %v1042_v49 = vpop.permute.xlu0 %1041 }
 0x100   : > { %968 = vrot.lane.b32.xlu2 %v958_v16, %s1534_s12  ;;  %v1070_v23 = vsel %vm696_vm4, %v1066_v26, %v1042_v49 }
 0x101   : > { %v1083_v47 = vrot.slane %v1070_v23, 4 }
 0x102   : > { %988 = vrot.lane.b32.xlu0 %v1800_v5, %s1536_s14  ;;  %s1343_s14 = sshll.u32 %s2097_s10, 1 }
 0x103   : > { %s380_s29 = sadd.s32 %s1344_s28, %s1343_s14 }
 0x104   : > { %s1345_s30 = sshll.u32 %s380_s29, 2 }
 0x105   : > { %v1038_v24 = vpop.permute.xlu1 %1037  ;;  %s382_s8 = scalar_lea.vmem %s2072_s5, %s1345_s30 }
 0x106   : > { %v1068_v25 = vsel %vm696_vm4, %v1064_v10, %v1038_v24 }
 0x107   : > { %v1081_v28 = vrot.slane %v1068_v25, 4  ;;  %v971_v29 = vpop.permute.xlu0 %970 }
 0x108   : > { %996 = vrot.lane.b32.xlu2 %v1692_v53, %s1535_s13  ;;  %v1048_v52 = vsel %vm686_vm2, %v1692_v53, %v971_v29 }
 0x109   : > { %v1052_v30 = vsel %vm691_vm3, %v1048_v52, %v987_v40 }
 0x10a   : > { %v1056_v32 = vsel %vm696_vm4, %v1052_v30, %v1840_v19 }
 0x10b   : > { %v1085_v35 = vsel %vm725_vm5, %v1056_v32, %v1081_v28 }
 0x10c   : > { %1090 = vst [vmem:[#allocation1 + $0x1] ss:$2 sm:$0xff] %v1085_v35 }
 0x152   : > { %v1040_v5 = vpop.permute.xlu2 %1039 }
 0x15a   : > { %v969_v17 = vpop.permute.xlu2 %968 }
 0x15b   : > { %v1047_v19 = vsel %vm686_vm2, %v1707_v63, %v969_v17  ;;  %v1069_v63 = vsel %vm696_vm4, %v1065_v11, %v1040_v5 }
 0x15c   : > { %v1051_v51 = vsel %vm691_vm3, %v1047_v19, %v985_v38  ;;  %v1082_v58 = vrot.slane %v1069_v63, 4 }
 0x162   : > { %v973_v34 = vpop.permute.xlu1 %972  ;;  %v997_v27 = vpop.permute.xlu2 %996 }
 0x163   : > { %v1055_v55 = vsel %vm696_vm4, %v1051_v51, %v997_v27 }
 0x169   : > { %v920_v4 = vpop.f32.mrf.mxu0  ;;  %v934_v16 = vpop.f32.mrf.mxu1 }
 0x16a   : > { %v991_v53 = vpop.permute.xlu1 %990 }
 0x16b   : > { %v1054_v13 = vsel %vm691_vm3, %v1050_v22, %v991_v53 }
 0x16c   : > { %v1058_v50 = vsel %vm696_vm4, %v1054_v13, %v1836_v2  ;;  %v1036_v44 = vpop.permute.xlu0 %1035  ;;  %v1049_v2 = vsel %vm686_vm2, %v1664_v33, %v973_v34  ;;  %v948_v33 = vpop.f32.mrf.mxu2 }
 0x16d   : > { %v1087_v18 = vsel %vm725_vm5, %v1058_v50, %v1083_v47  ;;  %v1067_v45 = vsel %vm696_vm4, %v1063_v56, %v1036_v44 }
 0x16e   : > { %1098 = vst [vmem:[#allocation1 + $0x21] ss:$2 sm:$0xff] %v1087_v18  ;;  %v1080_v31 = vrot.slane %v1067_v45, 4 }
 0x170   : > { %v1084_v36 = vsel %vm725_vm5, %v1055_v55, %v1080_v31 }
 0x171   : > { %1088 = vst [vmem:[#allocation1] ss:$2 sm:$0xff] %v1084_v36  ;;  %v922_v6 = vpop.f32.mrf.mxu0  ;;  %v936_v14 = vpop.f32.mrf.mxu1 }
 0x174   : > { %v989_v57 = vpop.permute.xlu0 %988  ;;  %v950_v56 = vpop.f32.mrf.mxu2 }
 0x175   : > { %v1053_v60 = vsel %vm691_vm3, %v1049_v2, %v989_v57 }
 0x176   : > { %v1057_v62 = vsel %vm696_vm4, %v1053_v60, %v1844_v20  ;;  %v1493_v20 = vld [vmem:[%s2071_s4] ss:$0 sm:$0xff] }
 0x177   : > { %v1086_v43 = vsel %vm725_vm5, %v1057_v62, %v1082_v58  ;;  %v921_v61 = vadd.f32 %v1493_v20, %v920_v4  ;;  %v923_v11 = vadd.f32 %v1493_v20, %v922_v6 }
 0x178   : > { %1096 = vst [vmem:[#allocation1 + $0x20] ss:$2 sm:$0xff] %v1086_v43  ;;  %v1103_v21 = vld.sshfl [vmem:[#allocation1] sm:$0xff pattern:$0x75316420] }
 0x179   : > { %v1104_v46 = vld.sshfl [vmem:[#allocation1 + $0x8] sm:$0xff pattern:$0x75316420]  ;;  %v935_v15 = vadd.f32 %v934_v16, %v921_v61  ;;  %v1158_v7 = vpop.f32.mrf.mxu0  ;;  %v937_v23 = vadd.f32 %v936_v14, %v923_v11 }
 0x17b   : > { %v949_v9 = vadd.f32 %v948_v33, %v935_v15  ;;  %v951_v30 = vadd.f32 %v950_v56, %v937_v23 }
 0x17d   : > { %v955_v12 = vrot.slane %v949_v9, 4  ;;  %v956_v5 = vrot.slane %v951_v30, 4 }
 0x17f   : > { %v1106_v48 = vld.sshfl [vmem:[#allocation1 + $0x20] sm:$0xff pattern:$0x75316420]  ;;  %v1107_v0 = vld.sshfl [vmem:[#allocation1 + $0x28] sm:$0xff pattern:$0x75316420] }
 0x180   : > { %v1115_v1 = vpack.c.bf16 %v1106_v48, %v1103_v21  ;;  %v1116_v3 = vpack.c.bf16 %v1107_v0, %v1104_v46 }
 0x181   : > { %v1160_v52 = vpop.f32.mrf.mxu0 }
 0x182   : > { %1129 = vmatmul.bf16.vlgmr.msra.gmra.mxu3 %v1115_v1  ;;  %1143 = vmatmul.bf16.vlgmr.msrb.gmra.mxu2 %v1116_v3 }
 0x205   : > { %v1130_v54 = vpop.f32.mrf.mxu3  ;;  %v1144_v59 = vpop.f32.mrf.mxu2 }
 0x206   : > { %v1131_v26 = vadd.f32 %v1493_v20, %v1130_v54 }
 0x208   : > { %v1145_v8 = vadd.f32 %v1144_v59, %v1131_v26 }
 0x20a   : > { %v1159_v39 = vadd.f32 %v1158_v7, %v1145_v8 }
 0x20c   : > { %v1165_v38 = vrot.slane %v1159_v39, 4 }
 0x20d   : > { %v1132_v49 = vpop.f32.mrf.mxu3  ;;  %v1146_v40 = vpop.f32.mrf.mxu2 }
 0x20e   : > { %v1167_v10 = vrot.slane %v1165_v38, 4  ;;  %v1169_v24 = vsel %vm725_vm5, %v949_v9, %v1165_v38  ;;  %v1133_v25 = vadd.f32 %v1493_v20, %v1132_v49 }
 0x20f   : > { %1177 = vst [vmem:[%s382_s8] sm:$0xff] %v1169_v24 }
 0x210   : > { %v1170_v28 = vsel %vm725_vm5, %v955_v12, %v1167_v10  ;;  %v1147_v29 = vadd.f32 %v1146_v40, %v1133_v25 }
 0x211   : > { %1178 = vst [vmem:[%s382_s8 + $0x8] sm:$0xff] %v1170_v28 }
 0x212   : > { %v1161_v32 = vadd.f32 %v1160_v52, %v1147_v29 }
 0x214   : > { %v1166_v35 = vrot.slane %v1161_v32, 4 }
 0x216   : > { %v1168_v34 = vrot.slane %v1166_v35, 4  ;;  %v1171_v17 = vsel %vm725_vm5, %v951_v30, %v1166_v35 }
 0x217   : > { %1179 = vst [vmem:[%s382_s8 + $0x10] sm:$0xff] %v1171_v17 }
 0x218   : > { %v1172_v37 = vsel %vm725_vm5, %v956_v5, %v1168_v34 }
 0x219   : > { %1180 = vst [vmem:[%s382_s8 + $0x18] sm:$0xff] %v1172_v37 }
 0x21a PF: > { %s15_s22 = sadd.s32 1, %s1532_s22   ;;  %s2076_s18 = smov %s1524_s20 }
 0x21b   : > { %p12_p13 = scmp.ge.s32.totalorder %s15_s22, 6   ;;  %s2077_s19 = smov %s1528_s21 }
 0x21c   : > { %s2078_s20 = smov %s2081_s23  ;;  %s2079_s21 = smov %s2085_s24 }
 0x21d   :  { %14 = sbr.rel (!%p12_p13) target bundleno = 3 (0x3), region = 111 }

// kernel: modified_sapiens_vit_forward.6
= control target key start
LH: loop header
LB: loop body
LE: loop exit
PB: predicated region body
PF: predicated region fallthrough
CT: control target
= control target key end

     0   :  { %s193_s0 = inlined_call_operand.vmem [shape: bf16[32,32], index: 0, kind: input, shape index: {}]   ;;  %s194_s1 = inlined_call_operand.vmem [shape: bf16[32,128], index: 1, kind: input, shape index: {}]   ;;  %s195_s2 = inlined_call_operand.vmem [shape: f32[1,128], index: 2, kind: input, shape index: {}]   ;;  %s196_s3 = inlined_call_operand.hbm [shape: f32[32,128], index: 3, kind: output, shape index: {}]  }
   0x1   :  { %v119_v0 = vld [vmem:[%s194_s1 + $0x8] sm:$0xff]  ;;  %v118_v1 = vld [vmem:[%s194_s1] sm:$0xff] }
   0x2   :  { %63 = vmatpush.bf16.msra.mxu0 %v119_v0  ;;  %120 = vmatpush.bf16.msra.mxu1 %v119_v0 }
   0x3   :  { %8 = vsyncpa [#allocation3], 0  ;;  %v116_v2 = vld [vmem:[%s193_s0] sm:$0xff]  ;;  %v117_v3 = vld [vmem:[%s193_s0 + $0x8] sm:$0xff]  ;;  %vm50_vm0 = vcmask 261120   ;;  %s152_s1 = smov [#allocation2]  }
   0x4   :  { %v125_v4 = vld [vmem:[%s195_s2] ss:$0 sm:$0xff]  ;;  %s84_s22 = sshll.u32 %s152_s1, 4  ;;  %s86_s0 = sshll.u32 %s196_s3, 4  ;;  %s85_s22 = int_to_ptr.vmem [resolvable:$true] %s84_s22  ;;  %s87_s0 = int_to_ptr.hbm [resolvable:$true] %s86_s0 }
   0x5   :  { %s153_s2 = smov 128   ;;  %s154_s25 = smov 8  }
   0x6   :  { %64 = vmatpush.bf16.msra.mxu0 %v118_v1  ;;  %121 = vmatpush.bf16.msra.mxu1 %v118_v1 }
   0x9   :  { %114 = vmatmul.msk.bf16.vlgmr.msra.gmra.mxu0 %vm50_vm0, %v116_v2  ;;  %115 = vmatmul.msk.bf16.vlgmr.msra.gmra.mxu1 %vm50_vm0, %v117_v3 }
  0x86   :  { %v66_v5 = vpop.f32.mrf.mxu0  ;;  %v71_v6 = vpop.f32.mrf.mxu1 }
  0x87   :  { %v67_v7 = vadd.f32 %v125_v4, %v66_v5  ;;  %v72_v8 = vadd.f32 %v125_v4, %v71_v6 }
  0x89   :  { %76 = vst [vmem:[#allocation2] sm:$0xff] %v67_v7 }
  0x8a   :  { %78 = vst [vmem:[#allocation2 + $0x10] sm:$0xff] %v72_v8 }
  0x8e   :  { %v68_v9 = vpop.f32.mrf.mxu0  ;;  %v73_v10 = vpop.f32.mrf.mxu1 }
  0x8f   :  { %v69_v11 = vadd.f32 %v125_v4, %v68_v9  ;;  %v74_v12 = vadd.f32 %v125_v4, %v73_v10 }
  0x91   :  { %77 = vst [vmem:[#allocation2 + $0x8] sm:$0xff] %v69_v11 }
  0x92   :  { %79 = vst [vmem:[#allocation2 + $0x18] sm:$0xff] %v74_v12 }
  0x93   :  { %92 = dma.vmem_to_hbm [thread:$0]  %s85_s22, 512, %s87_s0, [#allocation3], %s153_s2, %s153_s2, %s154_s25  }
  0x94   :  { %150 = dma.done.wait [#allocation3], 512  }
  0x95   :  { %151 = vsyncadd [#allocation3], 4294966784 }
  0x96   :  { %97 = vsyncpa [#allocation3], 1 }

// kernel: modified_sapiens_vit_forward.7
= control target key start
LH: loop header
LB: loop body
LE: loop exit
PB: predicated region body
PF: predicated region fallthrough
CT: control target
= control target key end

     0   :  { %s1332_s15 = smov 0   ;;  %s1334_s16 = smov 0   ;;  %s1505_s0 = inlined_call_operand.vmem [shape: bf16[2,4,3,3,32], index: 0, kind: input, shape index: {}, may-alias: {0,1}]   ;;  %s1506_s1 = inlined_call_operand.vmem [shape: bf16[2,4,3,3,32], index: 1, kind: input, shape index: {}, may-alias: {0,1}]   ;;  %s1507_s2 = inlined_call_operand.vmem [shape: bf16[288,128], index: 2, kind: input, shape index: {}]   ;;  %s1508_s3 = inlined_call_operand.vmem [shape: f32[1,128], index: 3, kind: input, shape index: {}]   ;;  %s1509_s4 = inlined_call_operand.vmem [shape: f32[2,2,2,128], index: 4, kind: output, shape index: {}]  }
   0x1   :  { %s1336_s17 = smov 0   ;;  %s1338_s18 = smov 0  }
   0x2   :  { %s1340_s19 = smov 0  }
   0x3 LB: > { %s26_s20 = sadd.s32 1, %s1294_s18  ;;  %p42_p1 = scmp.ne.s32.totalorder %s1286_s16, %s1282_s15  ;;  %s1298_s19 = sphi %s1340_s19, %s14_s19   ;;  %s1294_s18 = sphi %s1338_s18, %s1514_s18   ;;  %s1290_s17 = sphi %s1336_s17, %s1513_s17   ;;  %s1286_s16 = sphi %s1334_s16, %s1512_s16   ;;  %s1282_s15 = sphi %s1332_s15, %s1511_s15  }
   0x4   : > { %p28_p0 = scmp.ge.s32.totalorder %s26_s20, 2  ;;  %p43_p2 = scmp.eq.s32.totalorder %s1298_s19, 0 }
   0x5   : > { %s35_s23 = sadd.s32 1, %s1286_s16  ;;  %p1051_p5 = scmp.ge.s32.totalorder %s1298_s19, 2 }
   0x6   : > { %s1516_s20 = smov (%p28_p0, %s26_s20), 0  ;;  %p1363_p3 = por %p43_p2, %p42_p1 }
   0x7   : > { %s30_s22 = ssub.s32 %s1294_s18, %s1516_s20  ;;  %176 = sbr.rel (%p1051_p5) target bundleno = 36 (0x24), region = 24 }
   0x8   : > { %p33_p4 = scmp.eq.s32.totalorder %s30_s22, 0 }
   0xa   : > { %s1371_s24 = scalar_select %p33_p4, %s1286_s16, %s35_s23  }
   0xc   : > { %179 = sbr.rel (!%p1363_p3) target bundleno = 27 (0x1b), region = 28  ;;  %s181_s25 = sand.u32 (%p1363_p3), 1, %s1286_s16  }
   0xd   : > { %s1167_s26 = smul.u32 (%p1363_p3), 24, %s1294_s18  ;;  %s1052_s27 = sshll.u32 (%p1363_p3), %s181_s25, 4 }
   0xe   : > { %s183_s5 = scalar_lea.vmem (%p1363_p3), [#allocation2], %s1052_s27   ;;  %s1300_s6 = smov (%p1363_p3), 0  }
   0xf   : > { %s193_s30 = scalar_lea.vmem (%p1363_p3), %s1505_s0, %s1167_s26  }
  0x11 LB: >> { %v213_v0 = vld [vmem:[%s193_s30] sm:$0x3]  ;;  %v215_v1 = vld [vmem:[%s193_s30 + $0x2] sm:$0x3]  ;;  %v217_v2 = vld [vmem:[%s193_s30 + $0x6] sm:$0x3]  ;;  %s1302_s6 = sphi %s1300_s6, %s207_s6  }
  0x12   : >> { %214 = vst [vmem:[%s183_s5] sm:$0x3] %v213_v0  ;;  %v219_v3 = vld [vmem:[%s193_s30 + $0x8] sm:$0x3]  ;;  %v221_v4 = vld [vmem:[%s193_s30 + $0xc] sm:$0x3]  ;;  %s207_s6 = sadd.s32 1, %s1302_s6  }
  0x13   : >> { %216 = vst [vmem:[%s183_s5 + $0x2] sm:$0x3] %v215_v1  ;;  %v223_v5 = vld [vmem:[%s193_s30 + $0xe] sm:$0x3]  ;;  %v225_v6 = vld [vmem:[%s193_s30 + $0x12] sm:$0x3] }
  0x14   : >> { %218 = vst [vmem:[%s183_s5 + $0x4] sm:$0x3] %v217_v2  ;;  %v227_v7 = vld [vmem:[%s193_s30 + $0x14] sm:$0x3]  ;;  %p206_p6 = scmp.ge.s32.totalorder %s207_s6, 1 }
  0x15   : >> { %220 = vst [vmem:[%s183_s5 + $0x6] sm:$0x3] %v219_v3 }
  0x16   : >> { %222 = vst [vmem:[%s183_s5 + $0x8] sm:$0x3] %v221_v4  ;;  %209 = sbr.rel (!%p206_p6) target bundleno = 17 (0x11), region = 204 }
  0x17   : >> { %224 = vst [vmem:[%s183_s5 + $0xa] sm:$0x3] %v223_v5 }
  0x18   : >> { %226 = vst [vmem:[%s183_s5 + $0xc] sm:$0x3] %v225_v6 }
  0x19   : >> { %228 = vst [vmem:[%s183_s5 + $0xe] sm:$0x3] %v227_v7 }
  0x1b PF: > { %378 = sbr.rel (!%p1363_p3) target bundleno = 36 (0x24), region = 90  ;;  %s380_s7 = sand.u32 (%p1363_p3), 1, %s1286_s16  }
  0x1c   : > { %s1063_s8 = smul.u32 (%p1363_p3), 24, %s1294_s18  ;;  %s1062_s9 = sshll.u32 (%p1363_p3), %s380_s7, 3 }
  0x1d   : > { %s382_s13 = scalar_lea.vmem (%p1363_p3), [#allocation3], %s1062_s9 }
  0x1e   : > { %s955_s12 = scalar_lea.vmem (%p1363_p3), %s1506_s1, %s1063_s8 }
  0x1f   : > { %v1064_v8 = vld [vmem:[%s955_s12 + $0x4] sm:$0x3] (%p1363_p3)  ;;  %v1065_v9 = vld [vmem:[%s955_s12 + $0xa] sm:$0x3] (%p1363_p3)  ;;  %v1066_v10 = vld [vmem:[%s955_s12 + $0x10] sm:$0x3] (%p1363_p3) }
  0x20   : > { %406 = vst [vmem:[%s382_s13] sm:$0x3] %v1064_v8  ;;  %v1067_v11 = vld [vmem:[%s955_s12 + $0x16] sm:$0x3] }
  0x21   : > { %408 = vst [vmem:[%s382_s13 + $0x2] sm:$0x3] %v1065_v9 }
  0x22   : > { %410 = vst [vmem:[%s382_s13 + $0x4] sm:$0x3] %v1066_v10 }
  0x23   : > { %412 = vst [vmem:[%s382_s13 + $0x6] sm:$0x3] %v1067_v11 }
  0x24 PF: > { %p1068_p7 = scmp.ge.s32.totalorder %s1298_s19, 1  ;;  %p443_p8 = scmp.lt.s32.totalorder %s1298_s19, 3 }
  0x26   : > { %p444_p9 = pnand %p1068_p7, %p443_p8 }
  0x27   : > { %s450_s14 = sand.u32 (!%p444_p9), 1, %s1282_s15   ;;  %s1304_s15 = smov (!%p444_p9), 32  }
  0x28   : > { %447 = sbr.rel (%p444_p9) target bundleno = 377 (0x179), region = 131  ;;  %s1069_s21 = sshll.u32 (!%p444_p9), %s450_s14, 4 }
  0x29   : > { %s1391_s22 = scalar_lea.vmem (!%p444_p9), [#allocation2], %s1069_s21  ;;  %s1070_s23 = sshll.u32 (!%p444_p9), %s450_s14, 3 }
  0x2a   : > { %s459_s25 = scalar_lea.vmem (!%p444_p9), [#allocation3], %s1070_s23  ;;  %s1305_s26 = smov (!%p444_p9), 64  }
  0x2b   : > { %s1306_s27 = smov (!%p444_p9), 96   ;;  %p498_p10 = scmp.lt.s32.totalorder (!%p444_p9), %s1290_s17, 1 }
  0x2d   : > { %v510_v12 = vld [vmem:[%s1391_s22 + $0x4] sm:$0x3]  ;;  %v511_v13 = vld [vmem:[%s1391_s22 + $0x6] sm:$0x3]  ;;  %v1396_v14 = vld [vmem:[%s1391_s22] sm:$0x3] }
  0x2e   : > { %519 = vst [vmem:[#allocation1] ss:$4 sm:$0xff] %v510_v12  ;;  %v1399_v15 = vld [vmem:[%s1391_s22 + $0x2] sm:$0x3]  ;;  %v512_v18 = vld [vmem:[%s1391_s22 + $0x8] sm:$0x3] }
  0x2f   : > { %524 = vst [vmem:[#allocation1 + $0x20] ss:$4 sm:$0xff] %v511_v13  ;;  %v513_v19 = vld [vmem:[%s1391_s22 + $0xa] sm:$0x3]  ;;  %v516_v28 = vld [vmem:[%s459_s25] sm:$0x3] }
  0x30   : > { %v517_v39 = vld [vmem:[%s459_s25 + $0x2] sm:$0x3]  ;;  %v1156_v48 = vld [vmem:[%s1507_s2 + $0x38] sm:$0xff]  ;;  %v1153_v54 = vld [vmem:[%s1507_s2 + $0x20] sm:$0xff]  ;;  %vm629_vm0 = vcmask 261120   ;;  %vm634_vm1 = vcmask 523264  }
  0x31   : > { %v1164_v49 = vld [vmem:[%s1507_s2 + $0x78] sm:$0xff]  ;;  %832 = vmatpush.bf16.msra.mxu0 %v1156_v48  ;;  %v1155_v50 = vld [vmem:[%s1507_s2 + $0x30] sm:$0xff]  ;;  %v1154_v52 = vld [vmem:[%s1507_s2 + $0x28] sm:$0xff]  ;;  %vm639_vm2 = vcmask 785408   ;;  %vm664_vm3 = vcmask 1040384   ;;  %vm667_vm4 = vcmask 1041408  }
  0x32   : > { %845 = vmatpush.bf16.msra.mxu1 %v1164_v49  ;;  %v1163_v51 = vld [vmem:[%s1507_s2 + $0x70] sm:$0xff]  ;;  %v1162_v53 = vld [vmem:[%s1507_s2 + $0x68] sm:$0xff]  ;;  %v1161_v55 = vld [vmem:[%s1507_s2 + $0x60] sm:$0xff]  ;;  %s1518_s17 = smov (!%p498_p10, %s1290_s17), 1 }
  0x33   : > { %v1152_v56 = vld [vmem:[%s1507_s2 + $0x18] sm:$0xff]  ;;  %v1151_v58 = vld [vmem:[%s1507_s2 + $0x10] sm:$0xff]  ;;  %v1150_v61 = vld [vmem:[%s1507_s2 + $0x8] sm:$0xff] }
  0x34   : > { %v1160_v57 = vld [vmem:[%s1507_s2 + $0x58] sm:$0xff]  ;;  %v1159_v59 = vld [vmem:[%s1507_s2 + $0x50] sm:$0xff]  ;;  %v1158_v62 = vld [vmem:[%s1507_s2 + $0x48] sm:$0xff] }
  0x35   : > { %v520_v16 = vld.sshfl [vmem:[#allocation1] sm:$0xff pattern:$0x73625140]  ;;  %833 = vmatpush.bf16.msra.mxu0 %v1155_v50  ;;  %v1166_v63 = vld [vmem:[%s1507_s2 + $0x88] sm:$0xff] }
  0x36   : > { %532 = vst [vmem:[#allocation1] ss:$4 sm:$0xff] %v1396_v14  ;;  %v525_v17 = vld.sshfl [vmem:[#allocation1 + $0x20] sm:$0xff pattern:$0x73625140]  ;;  %527 = vrot.lane.b32.xlu2 %v520_v16, %s1304_s15  ;;  %846 = vmatpush.bf16.msra.mxu1 %v1163_v51 }
  0x37   : > { %536 = vst [vmem:[#allocation1 + $0x20] ss:$4 sm:$0xff] %v1399_v15  ;;  %v1149_v0 = vld [vmem:[%s1507_s2] sm:$0xff]  ;;  %864 = vmatpush.bf16.msra.mxu2 %v1166_v63 }
  0x38   : > { %v1157_v1 = vld [vmem:[%s1507_s2 + $0x40] sm:$0xff] }
  0x39   : > { %834 = vmatpush.bf16.msra.mxu0 %v1154_v52  ;;  %v1165_v3 = vld [vmem:[%s1507_s2 + $0x80] sm:$0xff] }
  0x3a   : > { %847 = vmatpush.bf16.msra.mxu1 %v1162_v53  ;;  %v514_v16 = vld [vmem:[%s1391_s22 + $0xc] sm:$0x3]  ;;  %v1243_v49 = vld [vmem:[%s1508_s3] ss:$0 sm:$0xff] }
  0x3b   : > { %865 = vmatpush.bf16.msra.mxu2 %v1165_v3 }
  0x3d   : > { %v533_v20 = vld.sshfl [vmem:[#allocation1] sm:$0xff pattern:$0x73625140]  ;;  %835 = vmatpush.bf16.msra.mxu0 %v1153_v54 }
  0x3e   : > { %555 = vst [vmem:[#allocation1] ss:$4 sm:$0xff] %v512_v18  ;;  %v537_v21 = vld.sshfl [vmem:[#allocation1 + $0x20] sm:$0xff pattern:$0x73625140]  ;;  %529 = vrot.lane.b32.xlu2 %v525_v17, %s1304_s15  ;;  %v540_v24 = vshll.u32 %v533_v20, 16  ;;  %848 = vmatpush.bf16.msra.mxu1 %v1161_v55 }
  0x3f   : > { %560 = vst [vmem:[#allocation1 + $0x20] ss:$4 sm:$0xff] %v513_v19  ;;  %v538_v25 = vshrl.u32 %v533_v20, 16  ;;  %v546_v44 = vshll.u32 %v537_v21, 16  ;;  %v544_v45 = vshrl.u32 %v537_v21, 16 }
  0x40   : > { %v542_v26 = vrot.slane %v540_v24, 1 }
  0x41   : > { %v548_v46 = vrot.slane %v546_v44, 1  ;;  %836 = vmatpush.bf16.msra.mxu0 %v1152_v56 }
  0x42   : > { %v543_v29 = vor.u32 %v542_v26, %v538_v25  ;;  %849 = vmatpush.bf16.msra.mxu1 %v1160_v57 }
  0x43   : > { %v549_v47 = vor.u32 %v548_v46, %v544_v45 }
  0x45   : > { %v556_v22 = vld.sshfl [vmem:[#allocation1] sm:$0xff pattern:$0x73625140]  ;;  %837 = vmatpush.bf16.msra.mxu0 %v1151_v58 }
  0x46   : > { %567 = vst [vmem:[#allocation1] ss:$4 sm:$0xff] %v512_v18  ;;  %v561_v23 = vld.sshfl [vmem:[#allocation1 + $0x20] sm:$0xff pattern:$0x73625140]  ;;  %550 = vrot.lane.b32.xlu2 %v543_v29, %s1305_s26  ;;  %850 = vmatpush.bf16.msra.mxu1 %v1159_v59 }
  0x47   : > { %570 = vst [vmem:[#allocation1 + $0x20] ss:$4 sm:$0xff] %v513_v19 }
  0x49   : > { %838 = vmatpush.bf16.msra.mxu0 %v1150_v61 }
  0x4a   : > { %851 = vmatpush.bf16.msra.mxu1 %v1158_v62 }
  0x4d   : > { %v568_v27 = vld.sshfl [vmem:[#allocation1] sm:$0xff pattern:$0x73625140]  ;;  %839 = vmatpush.bf16.msra.mxu0 %v1149_v0 }
  0x4e   : > { %v572_v30 = vshrl.u32 %v568_v27, 16  ;;  %v574_v31 = vshll.u32 %v568_v27, 16  ;;  %588 = vst [vmem:[#allocation1] ss:$4 sm:$0xff] %v1399_v15  ;;  %565 = vrot.lane.b32.xlu2 %v561_v23, %s1306_s27  ;;  %852 = vmatpush.bf16.msra.mxu1 %v1157_v1 }
  0x4f   : > { %v571_v32 = vld.sshfl [vmem:[#allocation1 + $0x20] sm:$0xff pattern:$0x73625140] }
  0x50   : > { %v576_v33 = vrot.slane %v574_v31, 1  ;;  %v580_v34 = vshll.u32 %v571_v32, 16  ;;  %593 = vst [vmem:[#allocation1 + $0x20] ss:$4 sm:$0xff] %v516_v28  ;;  %v578_v36 = vshrl.u32 %v571_v32, 16 }
  0x52   : > { %v577_v35 = vor.u32 %v576_v33, %v572_v30  ;;  %v582_v37 = vrot.slane %v580_v34, 1 }
  0x54   : > { %584 = vrot.lane.b32.xlu0 %v577_v35, %s1304_s15  ;;  %v583_v41 = vor.u32 %v582_v37, %v578_v36 }
  0x55   : > { %v589_v38 = vld.sshfl [vmem:[#allocation1] sm:$0xff pattern:$0x73625140] }
  0x56   : > { %596 = vrot.lane.b32.xlu1 %v589_v38, %s1305_s26  ;;  %600 = vst [vmem:[#allocation1] ss:$4 sm:$0xff] %v511_v13  ;;  %v515_v13 = vld [vmem:[%s1391_s22 + $0xe] sm:$0x3] }
  0x57   : > { %v594_v40 = vld.sshfl [vmem:[#allocation1 + $0x20] sm:$0xff pattern:$0x73625140] }
  0x58   : > { %605 = vst [vmem:[#allocation1 + $0x20] ss:$4 sm:$0xff] %v517_v39 }
  0x5c   : > { %586 = vrot.lane.b32.xlu0 %v583_v41, %s1304_s15 }
  0x5d   : > { %v601_v42 = vld.sshfl [vmem:[#allocation1] sm:$0xff pattern:$0x73625140] }
  0x5e   : > { %598 = vrot.lane.b32.xlu1 %v594_v40, %s1305_s26  ;;  %612 = vst [vmem:[#allocation1] ss:$4 sm:$0xff] %v1399_v15 }
  0x5f   : > { %v606_v43 = vld.sshfl [vmem:[#allocation1 + $0x20] sm:$0xff pattern:$0x73625140] }
  0x60   : > { %615 = vst [vmem:[#allocation1 + $0x20] ss:$4 sm:$0xff] %v516_v28 }
  0x64   : > { %608 = vrot.lane.b32.xlu0 %v601_v42, %s1306_s27 }
  0x65   : > { %v613_v9 = vld.sshfl [vmem:[#allocation1] sm:$0xff pattern:$0x73625140] }
  0x66   : > { %610 = vrot.lane.b32.xlu1 %v606_v43, %s1306_s27  ;;  %v619_v11 = vshll.u32 %v613_v9, 16  ;;  %v617_v20 = vshrl.u32 %v613_v9, 16 }
  0x67   : > { %v616_v7 = vld.sshfl [vmem:[#allocation1 + $0x20] sm:$0xff pattern:$0x73625140] }
  0x68   : > { %v625_v10 = vshll.u32 %v616_v7, 16  ;;  %v623_v18 = vshrl.u32 %v616_v7, 16  ;;  %v621_v21 = vrot.slane %v619_v11, 1 }
  0x6a   : > { %v627_v19 = vrot.slane %v625_v10, 1  ;;  %v622_v27 = vor.u32 %v621_v21, %v617_v20 }
  0x6c   : > { %552 = vrot.lane.b32.xlu0 %v549_v47, %s1305_s26  ;;  %v628_v25 = vor.u32 %v627_v19, %v623_v18  ;;  %v661_v38 = vrot.slane %v622_v27, 6 }
  0x6e   : > { %563 = vrot.lane.b32.xlu1 %v556_v22, %s1306_s27  ;;  %v663_v35 = vrot.slane %v628_v25, 6  ;;  %s1148_s27 = sshll.u32 %s1518_s17, 2 }
  0x6f   : > { %s505_s30 = scalar_lea.vmem %s1509_s4, %s1148_s27 }
  0x90   : > { %v528_v60 = vpop.permute.xlu2 %527 }
  0x91   : > { %v631_v30 = vsel %vm629_vm0, %v1396_v14, %v528_v60 }
  0x98   : > { %v530_v5 = vpop.permute.xlu2 %529 }
  0x99   : > { %v633_v33 = vsel %vm629_vm0, %v1399_v15, %v530_v5 }
  0xa0   : > { %v551_v12 = vpop.permute.xlu2 %550 }
  0xa1   : > { %v636_v39 = vsel %vm634_vm1, %v631_v30, %v551_v12 }
  0xa8   : > { %v566_v32 = vpop.permute.xlu2 %565 }
  0xc6   : > { %v585_v2 = vpop.permute.xlu0 %584 }
  0xc7   : > { %v646_v24 = vsel %vm629_vm0, %v514_v16, %v585_v2 }
  0xc8   : > { %v597_v4 = vpop.permute.xlu1 %596 }
  0xc9   : > { %v651_v28 = vsel %vm634_vm1, %v646_v24, %v597_v4 }
  0xce   : > { %v587_v6 = vpop.permute.xlu0 %586 }
  0xcf   : > { %v649_v22 = vsel %vm629_vm0, %v515_v13, %v587_v6 }
  0xd0   : > { %v599_v8 = vpop.permute.xlu1 %598 }
  0xd1   : > { %v653_v26 = vsel %vm634_vm1, %v649_v22, %v599_v8 }
  0xd6   : > { %v609_v17 = vpop.permute.xlu0 %608 }
  0xd7   : > { %v655_v31 = vsel %vm639_vm2, %v651_v28, %v609_v17 }
  0xd8   : > { %v611_v23 = vpop.permute.xlu1 %610  ;;  %v660_v40 = vrot.slane %v655_v31, 7 }
  0xd9   : > { %v657_v29 = vsel %vm639_vm2, %v653_v26, %v611_v23 }
  0xda   : > { %v662_v36 = vrot.slane %v657_v29, 7 }
  0xde   : > { %v553_v34 = vpop.permute.xlu0 %552 }
  0xdf   : > { %v638_v37 = vsel %vm634_vm1, %v633_v33, %v553_v34 }
  0xe0   : > { %v643_v14 = vsel %vm639_vm2, %v638_v37, %v566_v32  ;;  %v564_v41 = vpop.permute.xlu1 %563 }
  0xe1   : > { %v671_v42 = vsel %vm664_vm3, %v643_v14, %v662_v36  ;;  %v641_v43 = vsel %vm639_vm2, %v636_v39, %v564_v41 }
  0xe2   : > { %v673_v15 = vsel %vm667_vm4, %v671_v42, %v663_v35  ;;  %v666_v44 = vsel %vm664_vm3, %v641_v43, %v660_v40 }
  0xe3   : > { %v669_v45 = vsel %vm667_vm4, %v666_v44, %v661_v38  ;;  %716 = vst [vmem:[#allocation1 + $0x1] ss:$9 sm:$0xff] %v673_v15 }
  0xe4   : > { %714 = vst [vmem:[#allocation1] ss:$9 sm:$0xff] %v669_v45 }
  0xeb   : > { %v717_v46 = vld [vmem:[#allocation1] sm:$0xff]  ;;  %v718_v47 = vld [vmem:[#allocation1 + $0x9] sm:$0xff]  ;;  %v719_v48 = vld [vmem:[#allocation1 + $0x12] sm:$0xff] }
  0xec   : > { %840 = vmatmul.bf16.vlgmr.msra.gmra.mxu0 %v717_v46  ;;  %853 = vmatmul.bf16.vlgmr.msra.gmra.mxu1 %v718_v47 }
  0xed   : > { %1145 = vmatmul.msk.bf16.vlgmr.msra.gmra.mxu2 %vm629_vm0, %v719_v48 }
 0x169   : > { %v841_v50 = vpop.f32.mrf.mxu0  ;;  %v854_v51 = vpop.f32.mrf.mxu1 }
 0x16a   : > { %v842_v52 = vadd.f32 %v1243_v49, %v841_v50 }
 0x16c   : > { %v855_v53 = vadd.f32 %v854_v51, %v842_v52 }
 0x170   : > { %v867_v54 = vpop.f32.mrf.mxu2 }
 0x171   : > { %v868_v55 = vadd.f32 %v867_v54, %v855_v53  ;;  %v843_v56 = vpop.f32.mrf.mxu0  ;;  %v856_v57 = vpop.f32.mrf.mxu1 }
 0x173   : > { %v872_v58 = vrot.slane %v868_v55, 2  ;;  %874 = vst [vmem:[%s505_s30] sm:$0x3] %v868_v55 }
 0x175   : > { %875 = vst [vmem:[%s505_s30 + $0x2] sm:$0x3] %v872_v58 }
 0x178   : > { %v869_v59 = vpop.f32.mrf.mxu2 }
 0x179 PF: > { %s14_s19 = sadd.s32 1, %s1298_s19   ;;  %s1511_s15 = smov %s1286_s16 }
 0x17a   : > { %p11_p11 = scmp.ge.s32.totalorder %s14_s19, 4   ;;  %s1512_s16 = smov %s1371_s24 }
 0x17b   : > { %s1513_s17 = smov %s1294_s18  ;;  %s1514_s18 = smov %s1516_s20 }
 0x17c   :  { %13 = sbr.rel (!%p11_p11) target bundleno = 3 (0x3), region = 226 }

</bundles_post_ra>
